<compile_context>
chip_gen: v7x
topology: tpu7x:2x2x1
jax: 0.10.0
libtpu: 0.0.40
codegen_flags: <defaults>
</compile_context>

<pallas_src>
import functools

import jax
import jax.numpy as jnp
from jax.experimental import pallas as pl
from jax.experimental.pallas import tpu as pltpu

N_EMBD = 384
HIDDEN = 4 * N_EMBD
DROPOUT_P = 0.2
# Keep iff uint32 bits >= round(p * 2^32)  =>  P(keep) = 1 - p (to within 2^-32).
_DROP_THRESHOLD = int(round(DROPOUT_P * (1 << 32)))   # 858993459
_KEEP_SCALE = 1.0 / (1.0 - DROPOUT_P)


def _ffn_kernel(seed_ref, x_ref, w1_ref, b1_ref, w2_ref, b2_ref, o_ref, *, training):
    # First linear + ReLU: bf16 operands, f32 accumulation on the MXU.
    x = x_ref[...].astype(jnp.bfloat16)
    h = jnp.dot(x, w1_ref[...], preferred_element_type=jnp.float32)
    h = jnp.maximum(h + b1_ref[...], 0.0)

    # Second linear (hidden re-cast to bf16 for the MXU, still f32 accumulation).
    y = jnp.dot(h.astype(jnp.bfloat16), w2_ref[...], preferred_element_type=jnp.float32)
    y = y + b2_ref[...]

    if training:
        # Inverted dropout: keep with prob (1 - p), scale kept values by 1/(1-p).
        # Integer-threshold compare on the raw PRNG bits (no float conversion).
        # TODO(synk): RNG stream differs from torch.nn.Dropout (semantics match,
        # but the exact random mask cannot be reproduced bit-for-bit and depends
        # on the row-tile size via program_id).
        pltpu.prng_seed(seed_ref[0] + pl.program_id(0))
        bits = pltpu.bitcast(pltpu.prng_random_bits(y.shape), jnp.uint32)
        keep = bits >= jnp.uint32(_DROP_THRESHOLD)
        y = jnp.where(keep, y * jnp.float32(_KEEP_SCALE), jnp.float32(0.0))

    o_ref[...] = y.astype(o_ref.dtype)


def _choose_row_tile(m, tm_max):
    """Largest multiple-of-8 row tile <= tm_max that divides M and, when M
    allows, leaves >= 2 grid blocks so v7x's two TensorCores both get work."""
    cap = min(tm_max, m if m < 16 else m // 2)
    tm = 0
    t = 8
    while t <= cap:
        if m % t == 0:
            tm = t
        t += 8
    if tm == 0 or m % tm != 0:
        tm = m  # single full-extent block (always a legal block shape)
    return tm


def feed_forward(x, w1, b1, w2, b2, *, training=False, seed=0, tm=256):
    """Fused FFN forward.  x: (B, T, C) float32, returns (B, T, C).

    Weights are transposed relative to PyTorch: w1 (C, 4C), w2 (4C, C);
    biases are (1, 4C) / (1, C).  Default tm=256 suits v5e/v6e/v7x; v6e
    (128 MiB VMEM) can also use tm=512.
    """
    B, T, C = x.shape
    assert C == N_EMBD
    M = B * T
    x2 = x.reshape(M, C)

    tm = _choose_row_tile(M, tm)
    grid = (M // tm,)

    # Ship weights as bf16 (halves resident VMEM and HBM weight traffic);
    # biases stay f32 since they are added to the f32 accumulator.
    w1b = w1.astype(jnp.bfloat16)
    w2b = w2.astype(jnp.bfloat16)
    b1f = b1.astype(jnp.float32).reshape(1, HIDDEN)
    b2f = b2.astype(jnp.float32).reshape(1, C)

    kernel = functools.partial(_ffn_kernel, training=training)

    cost = pl.CostEstimate(
        flops=4 * M * C * HIDDEN,                         # two matmuls, 2*M*K*N each
        transcendentals=0,
        bytes_accessed=(2 * M * C * x.dtype.itemsize      # x in + y out
                        + 2 * C * HIDDEN * 2              # bf16 W1 + W2
                        + (HIDDEN + C) * 4),              # f32 biases
    )

    def _build(single_buffer_weights):
        def const_spec(shape):
            if single_buffer_weights:
                # Constant-index blocks don't need double buffering.
                return pl.BlockSpec(shape, lambda i, s: (0, 0),
                                    pipeline_mode=pl.Buffered(1))
            return pl.BlockSpec(shape, lambda i, s: (0, 0))

        grid_spec = pltpu.PrefetchScalarGridSpec(
            num_scalar_prefetch=1,                               # dropout seed in SMEM
            grid=grid,
            in_specs=[
                pl.BlockSpec((tm, C), lambda i, s: (i, 0)),      # x rows (pipelined)
                const_spec((C, HIDDEN)),                         # W1 (resident, bf16)
                const_spec((1, HIDDEN)),                         # b1
                const_spec((HIDDEN, C)),                         # W2 (resident, bf16)
                const_spec((1, C)),                              # b2
            ],
            out_specs=pl.BlockSpec((tm, C), lambda i, s: (i, 0)),
        )
        return pl.pallas_call(
            kernel,
            out_shape=jax.ShapeDtypeStruct((M, C), x.dtype),
            grid_spec=grid_spec,
            compiler_params=pltpu.CompilerParams(
                dimension_semantics=("parallel",),
            ),
            cost_estimate=cost,
        )

    seed_arr = jnp.array([seed], jnp.int32)
    try:
        out = _build(True)(seed_arr, x2, w1b, b1f, w2b, b2f)
    except Exception:
        # Fallback for JAX versions where BlockSpec pipeline_mode / Buffered(1)
        # is not supported by the TPU pipeline.
        out = _build(False)(seed_arr, x2, w1b, b1f, w2b, b2f)
    return out.reshape(B, T, C)


if __name__ == "__main__":
    key = jax.random.PRNGKey(0)
    k1, k2, k3, k4, kx = jax.random.split(key, 5)

    # Deterministic init matching nn.Linear's U(-1/sqrt(fan_in), 1/sqrt(fan_in)).
    bound1 = 1.0 / (N_EMBD ** 0.5)
    w1 = jax.random.uniform(k1, (N_EMBD, HIDDEN), jnp.float32, -bound1, bound1)
    b1 = jax.random.uniform(k2, (1, HIDDEN), jnp.float32, -bound1, bound1)
    bound2 = 1.0 / (HIDDEN ** 0.5)
    w2 = jax.random.uniform(k3, (HIDDEN, N_EMBD), jnp.float32, -bound2, bound2)
    b2 = jax.random.uniform(k4, (1, N_EMBD), jnp.float32, -bound2, bound2)

    B, T = 2, 8
    x = jax.random.normal(kx, (B, T, N_EMBD), jnp.float32)

    # Eval-mode forward (dropout is identity, matches module.eval()).
    y = feed_forward(x, w1, b1, w2, b2, training=False)
    y = jax.block_until_ready(y)

    # Pure-JAX reference using the same bf16-operand / f32-accumulation recipe.
    x2 = x.reshape(-1, N_EMBD)
    h_ref = jnp.maximum(
        jnp.dot(x2.astype(jnp.bfloat16), w1.astype(jnp.bfloat16),
                preferred_element_type=jnp.float32) + b1, 0.0)
    ref = jnp.dot(h_ref.astype(jnp.bfloat16), w2.astype(jnp.bfloat16),
                  preferred_element_type=jnp.float32) + b2

    assert y.shape == (B, T, N_EMBD)
    assert jnp.allclose(y.reshape(-1, N_EMBD), ref, atol=2e-2, rtol=2e-2)

    print("KERNEL_OK")
</pallas_src>

<mosaic_0001>
module attributes {stable_mosaic.version = 11 : i64} {
  func.func @_ffn_kernel(%arg0: i32, %arg1: memref<1xi32, #tpu.memory_space<smem>>, %arg2: memref<8x384xf32, #tpu.memory_space<vmem>>, %arg3: memref<384x1536xbf16, #tpu.memory_space<vmem>>, %arg4: memref<1x1536xf32, #tpu.memory_space<vmem>>, %arg5: memref<1536x384xbf16, #tpu.memory_space<vmem>>, %arg6: memref<1x384xf32, #tpu.memory_space<vmem>>, %arg7: memref<8x384xf32, #tpu.memory_space<vmem>>) attributes {dimension_semantics = [#tpu.dimension_semantics<parallel>], iteration_bounds = array<i64: 2>, scalar_prefetch = 1 : i64, scratch_operands = 0 : i64, tpu.core_type = #tpu.core_type<tc>, window_params = [{transform_indices = @transform_0, window_bounds = array<i64: 8, 384>}, {pipeline_mode = #tpu.pipeline_mode<synchronous>, transform_indices = @transform_1, window_bounds = array<i64: 384, 1536>}, {pipeline_mode = #tpu.pipeline_mode<synchronous>, transform_indices = @transform_2, window_bounds = array<i64: 1, 1536>}, {pipeline_mode = #tpu.pipeline_mode<synchronous>, transform_indices = @transform_3, window_bounds = array<i64: 1536, 384>}, {pipeline_mode = #tpu.pipeline_mode<synchronous>, transform_indices = @transform_4, window_bounds = array<i64: 1, 384>}, {transform_indices = @transform_5, window_bounds = array<i64: 8, 384>}]} {
    %c0 = arith.constant 0 : index
    %c0_0 = arith.constant 0 : index
    %0 = vector.load %arg2[%c0, %c0_0] : memref<8x384xf32, #tpu.memory_space<vmem>>, vector<8x384xf32>
    %1 = arith.truncf %0 : vector<8x384xf32> to vector<8x384xbf16>
    %c0_1 = arith.constant 0 : index
    %c0_2 = arith.constant 0 : index
    %2 = vector.load %arg3[%c0_1, %c0_2] : memref<384x1536xbf16, #tpu.memory_space<vmem>>, vector<384x1536xbf16>
    %cst = arith.constant dense<0.000000e+00> : vector<8x1536xf32>
    %3 = tpu.matmul %1, %2, %cst {dimension_numbers = #tpu.dot_dimension_numbers<[1], [0], [0], [1], [0, 0, 1, 1], [], []>} : vector<8x384xbf16>, vector<384x1536xbf16>, vector<8x1536xf32> -> vector<8x1536xf32>
    %c0_3 = arith.constant 0 : index
    %c0_4 = arith.constant 0 : index
    %4 = vector.load %arg4[%c0_3, %c0_4] : memref<1x1536xf32, #tpu.memory_space<vmem>>, vector<1x1536xf32>
    %5 = vector.broadcast %4 : vector<1x1536xf32> to vector<8x1536xf32>
    %6 = arith.addf %3, %5 : vector<8x1536xf32>
    %cst_5 = arith.constant 0.000000e+00 : f32
    %7 = vector.broadcast %cst_5 : f32 to vector<8x1536xf32>
    %8 = arith.maximumf %6, %7 : vector<8x1536xf32>
    %9 = arith.truncf %8 : vector<8x1536xf32> to vector<8x1536xbf16>
    %c0_6 = arith.constant 0 : index
    %c0_7 = arith.constant 0 : index
    %10 = vector.load %arg5[%c0_6, %c0_7] : memref<1536x384xbf16, #tpu.memory_space<vmem>>, vector<1536x384xbf16>
    %cst_8 = arith.constant dense<0.000000e+00> : vector<8x384xf32>
    %11 = tpu.matmul %9, %10, %cst_8 {dimension_numbers = #tpu.dot_dimension_numbers<[1], [0], [0], [1], [0, 0, 1, 1], [], []>} : vector<8x1536xbf16>, vector<1536x384xbf16>, vector<8x384xf32> -> vector<8x384xf32>
    %c0_9 = arith.constant 0 : index
    %c0_10 = arith.constant 0 : index
    %12 = vector.load %arg6[%c0_9, %c0_10] : memref<1x384xf32, #tpu.memory_space<vmem>>, vector<1x384xf32>
    %13 = vector.broadcast %12 : vector<1x384xf32> to vector<8x384xf32>
    %14 = arith.addf %11, %13 : vector<8x384xf32>
    %c0_11 = arith.constant 0 : index
    %c0_12 = arith.constant 0 : index
    %15 = vector.load %arg7[%c0_11, %c0_12] : memref<8x384xf32, #tpu.memory_space<vmem>>, vector<8x384xf32>
    tpu.vector_store %arg7[%c0_11, %c0_12], %14 {strides = array<i32>} : memref<8x384xf32, #tpu.memory_space<vmem>>, vector<8x384xf32>,
    return
  }
  func.func @transform_0(%arg0: i32, %arg1: memref<1xi32, #tpu.memory_space<smem>>) -> (i32, i32) {
    %c0_i32 = arith.constant 0 : i32
    %c0_i32_0 = arith.constant 0 : i32
    return %arg0, %c0_i32 : i32, i32
  }
  func.func @transform_1(%arg0: i32, %arg1: memref<1xi32, #tpu.memory_space<smem>>) -> (i32, i32) {
    %c0_i32 = arith.constant 0 : i32
    %c0_i32_0 = arith.constant 0 : i32
    %c0_i32_1 = arith.constant 0 : i32
    return %c0_i32, %c0_i32_0 : i32, i32
  }
  func.func @transform_2(%arg0: i32, %arg1: memref<1xi32, #tpu.memory_space<smem>>) -> (i32, i32) {
    %c0_i32 = arith.constant 0 : i32
    %c0_i32_0 = arith.constant 0 : i32
    %c0_i32_1 = arith.constant 0 : i32
    return %c0_i32, %c0_i32_0 : i32, i32
  }
  func.func @transform_3(%arg0: i32, %arg1: memref<1xi32, #tpu.memory_space<smem>>) -> (i32, i32) {
    %c0_i32 = arith.constant 0 : i32
    %c0_i32_0 = arith.constant 0 : i32
    %c0_i32_1 = arith.constant 0 : i32
    return %c0_i32, %c0_i32_0 : i32, i32
  }
  func.func @transform_4(%arg0: i32, %arg1: memref<1xi32, #tpu.memory_space<smem>>) -> (i32, i32) {
    %c0_i32 = arith.constant 0 : i32
    %c0_i32_0 = arith.constant 0 : i32
    %c0_i32_1 = arith.constant 0 : i32
    return %c0_i32, %c0_i32_0 : i32, i32
  }
  func.func @transform_5(%arg0: i32, %arg1: memref<1xi32, #tpu.memory_space<smem>>) -> (i32, i32) {
    %c0_i32 = arith.constant 0 : i32
    %c0_i32_0 = arith.constant 0 : i32
    return %arg0, %c0_i32 : i32, i32
  }
}

module attributes {stable_mosaic.version = 11 : i64} {
  func.func @_ffn_kernel(%arg0: i32, %arg1: memref<1xi32, #tpu.memory_space<smem>>, %arg2: memref<8x384xf32, #tpu.memory_space<vmem>>, %arg3: memref<384x1536xbf16, #tpu.memory_space<vmem>>, %arg4: memref<1x1536xf32, #tpu.memory_space<vmem>>, %arg5: memref<1536x384xbf16, #tpu.memory_space<vmem>>, %arg6: memref<1x384xf32, #tpu.memory_space<vmem>>, %arg7: memref<8x384xf32, #tpu.memory_space<vmem>>) attributes {dimension_semantics = [#tpu.dimension_semantics<parallel>], iteration_bounds = array<i64: 2>, scalar_prefetch = 1 : i64, scratch_operands = 0 : i64, tpu.core_type = #tpu.core_type<tc>, window_params = [{transform_indices = @transform_0, window_bounds = array<i64: 8, 384>}, {pipeline_mode = #tpu.pipeline_mode<synchronous>, transform_indices = @transform_1, window_bounds = array<i64: 384, 1536>}, {pipeline_mode = #tpu.pipeline_mode<synchronous>, transform_indices = @transform_2, window_bounds = array<i64: 1, 1536>}, {pipeline_mode = #tpu.pipeline_mode<synchronous>, transform_indices = @transform_3, window_bounds = array<i64: 1536, 384>}, {pipeline_mode = #tpu.pipeline_mode<synchronous>, transform_indices = @transform_4, window_bounds = array<i64: 1, 384>}, {transform_indices = @transform_5, window_bounds = array<i64: 8, 384>}]} {
    %c0 = arith.constant 0 : index
    %c0_0 = arith.constant 0 : index
    %0 = vector.load %arg2[%c0, %c0_0] : memref<8x384xf32, #tpu.memory_space<vmem>>, vector<8x384xf32>
    %1 = arith.truncf %0 : vector<8x384xf32> to vector<8x384xbf16>
    %c0_1 = arith.constant 0 : index
    %c0_2 = arith.constant 0 : index
    %2 = vector.load %arg3[%c0_1, %c0_2] : memref<384x1536xbf16, #tpu.memory_space<vmem>>, vector<384x1536xbf16>
    %cst = arith.constant dense<0.000000e+00> : vector<8x1536xf32>
    %3 = tpu.matmul %1, %2, %cst {dimension_numbers = #tpu.dot_dimension_numbers<[1], [0], [0], [1], [0, 0, 1, 1], [], []>} : vector<8x384xbf16>, vector<384x1536xbf16>, vector<8x1536xf32> -> vector<8x1536xf32>
    %c0_3 = arith.constant 0 : index
    %c0_4 = arith.constant 0 : index
    %4 = vector.load %arg4[%c0_3, %c0_4] : memref<1x1536xf32, #tpu.memory_space<vmem>>, vector<1x1536xf32>
    %5 = vector.broadcast %4 : vector<1x1536xf32> to vector<8x1536xf32>
    %6 = arith.addf %3, %5 : vector<8x1536xf32>
    %cst_5 = arith.constant 0.000000e+00 : f32
    %7 = vector.broadcast %cst_5 : f32 to vector<8x1536xf32>
    %8 = arith.maximumf %6, %7 : vector<8x1536xf32>
    %9 = arith.truncf %8 : vector<8x1536xf32> to vector<8x1536xbf16>
    %c0_6 = arith.constant 0 : index
    %c0_7 = arith.constant 0 : index
    %10 = vector.load %arg5[%c0_6, %c0_7] : memref<1536x384xbf16, #tpu.memory_space<vmem>>, vector<1536x384xbf16>
    %cst_8 = arith.constant dense<0.000000e+00> : vector<8x384xf32>
    %11 = tpu.matmul %9, %10, %cst_8 {dimension_numbers = #tpu.dot_dimension_numbers<[1], [0], [0], [1], [0, 0, 1, 1], [], []>} : vector<8x1536xbf16>, vector<1536x384xbf16>, vector<8x384xf32> -> vector<8x384xf32>
    %c0_9 = arith.constant 0 : index
    %c0_10 = arith.constant 0 : index
    %12 = vector.load %arg6[%c0_9, %c0_10] : memref<1x384xf32, #tpu.memory_space<vmem>>, vector<1x384xf32>
    %13 = vector.broadcast %12 : vector<1x384xf32> to vector<8x384xf32>
    %14 = arith.addf %11, %13 : vector<8x384xf32>
    %c0_11 = arith.constant 0 : index
    %c0_12 = arith.constant 0 : index
    %15 = vector.load %arg7[%c0_11, %c0_12] : memref<8x384xf32, #tpu.memory_space<vmem>>, vector<8x384xf32>
    tpu.vector_store %arg7[%c0_11, %c0_12], %14 {strides = array<i32>} : memref<8x384xf32, #tpu.memory_space<vmem>>, vector<8x384xf32>,
    return
  }
  func.func @transform_0(%arg0: i32, %arg1: memref<1xi32, #tpu.memory_space<smem>>) -> (i32, i32) {
    %c0_i32 = arith.constant 0 : i32
    %c0_i32_0 = arith.constant 0 : i32
    return %arg0, %c0_i32 : i32, i32
  }
  func.func @transform_1(%arg0: i32, %arg1: memref<1xi32, #tpu.memory_space<smem>>) -> (i32, i32) {
    %c0_i32 = arith.constant 0 : i32
    %c0_i32_0 = arith.constant 0 : i32
    %c0_i32_1 = arith.constant 0 : i32
    return %c0_i32, %c0_i32_0 : i32, i32
  }
  func.func @transform_2(%arg0: i32, %arg1: memref<1xi32, #tpu.memory_space<smem>>) -> (i32, i32) {
    %c0_i32 = arith.constant 0 : i32
    %c0_i32_0 = arith.constant 0 : i32
    %c0_i32_1 = arith.constant 0 : i32
    return %c0_i32, %c0_i32_0 : i32, i32
  }
  func.func @transform_3(%arg0: i32, %arg1: memref<1xi32, #tpu.memory_space<smem>>) -> (i32, i32) {
    %c0_i32 = arith.constant 0 : i32
    %c0_i32_0 = arith.constant 0 : i32
    %c0_i32_1 = arith.constant 0 : i32
    return %c0_i32, %c0_i32_0 : i32, i32
  }
  func.func @transform_4(%arg0: i32, %arg1: memref<1xi32, #tpu.memory_space<smem>>) -> (i32, i32) {
    %c0_i32 = arith.constant 0 : i32
    %c0_i32_0 = arith.constant 0 : i32
    %c0_i32_1 = arith.constant 0 : i32
    return %c0_i32, %c0_i32_0 : i32, i32
  }
  func.func @transform_5(%arg0: i32, %arg1: memref<1xi32, #tpu.memory_space<smem>>) -> (i32, i32) {
    %c0_i32 = arith.constant 0 : i32
    %c0_i32_0 = arith.constant 0 : i32
    return %arg0, %c0_i32 : i32, i32
  }
}

</mosaic_0001>

<bundles_post_ra>
// kernel: tpu_custom_call.1
= control target key start
LH: loop header
LB: loop body
LE: loop exit
PB: predicated region body
PF: predicated region fallthrough
CT: control target
= control target key end

     0   :  { %12 = vsyncpa [#allocation5], 0  ;;  %s7516_s0 = inlined_call_operand.<no memory space> [shape: s32[1], index: 0, kind: input, shape index: {}]   ;;  %s7517_s1 = inlined_call_operand.hbm [shape: f32[16,384], index: 1, kind: input, shape index: {}]   ;;  %s7518_s2 = inlined_call_operand.hbm [shape: bf16[384,1536], index: 2, kind: input, shape index: {}]   ;;  %s7519_s3 = inlined_call_operand.hbm [shape: f32[1,1536], index: 3, kind: input, shape index: {}]   ;;  %s7520_s4 = inlined_call_operand.hbm [shape: bf16[1536,384], index: 4, kind: input, shape index: {}]   ;;  %s7521_s5 = inlined_call_operand.hbm [shape: f32[1,384], index: 5, kind: input, shape index: {}]   ;;  %s7522_s6 = inlined_call_operand.hbm [shape: f32[16,384], index: 6, kind: output, shape index: {}]  }
   0x1   :  { %14 = vsyncpa [#allocation5 + $0x1], 0 }
   0x2   :  { %15 = vsyncpa [#allocation8], 0 }
   0x3   :  { %16 = vsyncpa [#allocation11], 0 }
   0x4   :  { %17 = vsyncpa [#allocation6], 0 }
   0x5   :  { %19 = vsyncpa [#allocation6 + $0x1], 0  ;;  %s7120_s0 = smov 0   ;;  %s7122_s21 = smov 0  }
   0x6   :  { %s7124_s22 = smov 0   ;;  %s7126_s23 = smov 0  }
   0x7 LB: > { %s7074_s24 = smov [#allocation7]   ;;  %s7141_s26 = sadd.s32 4294967295, %s7072_s23   ;;  %s7072_s23 = sphi %s7126_s23, %s7545_s23   ;;  %s7068_s22 = sphi %s7124_s22, %s7544_s22   ;;  %s7064_s21 = sphi %s7122_s21, %s7543_s21   ;;  %s7060_s0 = sphi %s7120_s0, %s7542_s0  }
   0x8   : > { %s178_s25 = sshll.u32 %s7074_s24, 4  ;;  %p5162_p0 = scmp.ge.s32.totalorder %s7072_s23, 1  ;;  %s7146_s25 = int_to_ptr.vmem [resolvable:$true] %s178_s25 }
   0x9   : > { %p7523_p1 = scmp.eq.s32.totalorder %s7141_s26, 0  ;;  %p166_p2 = scmp.lt.s32.totalorder %s7072_s23, 3 }
   0xa   : > { %s7075_s28 = smov [#allocation10]   ;;  %s7076_s7 = smov [#allocation9]  }
   0xb   : > { %p7148_p3 = pnand %p5162_p0, %p166_p2  ;;  %s202_s29 = sshll.u32 %s7075_s28, 4  ;;  %s7161_s29 = int_to_ptr.vmem [resolvable:$true] %s202_s29 }
   0xc   : > { %s7163_s8 = sshll.u32 %s7076_s7, 4  ;;  %s6856_s11 = scalar_lea.hbm %s7518_s2, 36864  ;;  %s193_s8 = int_to_ptr.vmem [resolvable:$true] %s7163_s8 }
   0xd   : > { %s7526_s27 = scalar_select %p7148_p3, 1, 0 }
   0xe   : > { %p5967_p5 = pneg %p7148_p3  ;;  %p6857_p7 = scmp.ne.s32.totalorder %s7518_s2, %s6856_s11 }
   0xf   : > { %p6863_p11 = scmp.lt.u32.totalorder %s6856_s11, %s7518_s2 }
  0x10   : > { %p7157_p6 = pnand %p5967_p5, %p7523_p1 }
  0x12   : > { %p7173_p8 = pneg %p7157_p6 }
  0x14   : > { %p6859_p9 = pnand %p7173_p8, %p6857_p7 }
  0x16   : > { %p6860_p10 = pneg %p6859_p9 }
  0x18   : > { %p6865_p12 = pnand %p6863_p11, %p6860_p10 }
  0x1a   : > { %6868 = shalt.err (!%p6865_p12)
}
  0x1b   : > { %s6869_s17 = scalar_lea.vmem %s7146_s25, 36864  ;;  %p6877_p5 = scmp.lt.s32.totalorder %s7146_s25, %s7146_s25 }
  0x1c   : > { %p6870_p13 = scmp.ne.s32.totalorder %s7146_s25, %s6869_s17  ;;  %p6878_p4 = scmp.lt.s32.totalorder %s6869_s17, %s6869_s17 }
  0x1e   : > { %p6872_p0 = pnand %p6870_p13, %p7173_p8  ;;  %p6879_p7 = por %p6878_p4, %p6877_p5 }
  0x20   : > { %p6873_p2 = pneg %p6872_p0 }
  0x22   : > { %p6880_p9 = pnand %p6879_p7, %p6873_p2 }
  0x24   : > { %6883 = shalt.err (!%p6880_p9)
}
  0x25   : > { %s7077_s18 = smov 768   ;;  %s7078_s19 = smov 48  }
  0x26   : > { %5970 = dma.hbm_to_vmem [thread:$0]  (!%p7157_p6), %s7518_s2, 36864, %s7146_s25, [#allocation8], %s7077_s18, %s7077_s18, %s7078_s19  }
  0x27   : > { %s6884_s9 = scalar_lea.hbm %s7520_s4, 36864 }
  0x28   : > { %p6885_p4 = scmp.ne.s32.totalorder %s7520_s4, %s6884_s9  ;;  %p6891_p12 = scmp.lt.u32.totalorder %s6884_s9, %s7520_s4 }
  0x2a   : > { %p6887_p10 = pnand %p6885_p4, %p7173_p8 }
  0x2c   : > { %p6888_p11 = pneg %p6887_p10 }
  0x2e   : > { %p6893_p13 = pnand %p6891_p12, %p6888_p11 }
  0x30   : > { %6896 = shalt.err (!%p6893_p13)
}
  0x31   : > { %s6897_s25 = scalar_lea.vmem %s7161_s29, 36864  ;;  %p6905_p7 = scmp.lt.s32.totalorder %s7161_s29, %s7161_s29 }
  0x32   : > { %p6898_p0 = scmp.ne.s32.totalorder %s7161_s29, %s6897_s25  ;;  %p6906_p9 = scmp.lt.s32.totalorder %s6897_s25, %s6897_s25 }
  0x34   : > { %p6900_p2 = pnand %p6898_p0, %p7173_p8  ;;  %p6907_p4 = por %p6906_p9, %p6905_p7 }
  0x36   : > { %p6901_p5 = pneg %p6900_p2 }
  0x38   : > { %p6908_p10 = pnand %p6907_p4, %p6901_p5 }
  0x3a   : > { %6911 = shalt.err (!%p6908_p10)
}
  0x3b   : > { %s7079_s15 = smov 192   ;;  %s7080_s16 = smov 12  }
  0x3c   : > { %5976 = dma.hbm_to_vmem [thread:$0]  (!%p7157_p6), %s7520_s4, 36864, %s7161_s29, [#allocation11], %s7079_s15, %s7079_s15, %s7080_s16  }
  0x3d   : > { %s6912_s24 = scalar_lea.hbm %s7519_s3, 192 }
  0x3e   : > { %p6913_p11 = scmp.ne.s32.totalorder %s7519_s3, %s6912_s24  ;;  %p6919_p0 = scmp.lt.u32.totalorder %s6912_s24, %s7519_s3 }
  0x40   : > { %p6915_p12 = pnand %p6913_p11, %p7173_p8 }
  0x42   : > { %p6916_p13 = pneg %p6915_p12 }
  0x44   : > { %p6921_p2 = pnand %p6919_p0, %p6916_p13 }
  0x46   : > { %6924 = shalt.err (!%p6921_p2)
}
  0x47   : > { %s6925_s11 = scalar_lea.vmem %s193_s8, 192  ;;  %p6933_p4 = scmp.lt.s32.totalorder %s193_s8, %s193_s8 }
  0x48   : > { %p6926_p5 = scmp.ne.s32.totalorder %s193_s8, %s6925_s11  ;;  %p6934_p10 = scmp.lt.s32.totalorder %s6925_s11, %s6925_s11 }
  0x4a   : > { %p6928_p7 = pnand %p6926_p5, %p7173_p8  ;;  %p6935_p1 = por %p6934_p10, %p6933_p4 }
  0x4c   : > { %p6929_p9 = pneg %p6928_p7 }
  0x4e   : > { %p6936_p3 = pnand %p6935_p1, %p6929_p9 }
  0x50   : > { %6939 = shalt.err (!%p6936_p3)
}
  0x51   : > { %5973 = dma.hbm_to_vmem [thread:$0]  (!%p7157_p6), %s7519_s3, 192, %s193_s8, [#allocation8]  }
  0x52   : > { %s7081_s13 = smov [#allocation12]   ;;  %s6940_s17 = scalar_lea.hbm %s7521_s5, 48 }
  0x53   : > { %s216_s25 = sshll.u32 %s7081_s13, 4  ;;  %p6941_p11 = scmp.ne.s32.totalorder %s7521_s5, %s6940_s17  ;;  %s217_s25 = int_to_ptr.vmem [resolvable:$true] %s216_s25 }
  0x54   : > { %p6947_p12 = scmp.lt.u32.totalorder %s6940_s17, %s7521_s5 }
  0x55   : > { %p6943_p1 = pnand %p6941_p11, %p7173_p8 }
  0x57   : > { %p6944_p3 = pneg %p6943_p1 }
  0x59   : > { %p6949_p13 = pnand %p6947_p12, %p6944_p3 }
  0x5b   : > { %6952 = shalt.err (!%p6949_p13)
}
  0x5c   : > { %s6953_s8 = scalar_lea.vmem %s217_s25, 48  ;;  %s6960_s28 = scalar_lea.vmem %s217_s25, 64 }
  0x5d   : > { %p6954_p0 = scmp.ne.s32.totalorder %s217_s25, %s6953_s8  ;;  %p6961_p7 = scmp.lt.s32.totalorder %s217_s25, %s217_s25 }
  0x5e   : > { %p6962_p9 = scmp.lt.s32.totalorder %s6960_s28, %s6953_s8 }
  0x5f   : > { %p6956_p2 = pnand %p6954_p0, %p7173_p8 }
  0x60   : > { %p6963_p4 = por %p6962_p9, %p6961_p7 }
  0x61   : > { %p6957_p5 = pneg %p6956_p2 }
  0x63   : > { %p6964_p10 = pnand %p6963_p4, %p6957_p5 }
  0x65   : > { %6967 = shalt.err (!%p6964_p10)
}
  0x66   : > { %5979 = dma.hbm_to_vmem [thread:$0]  (!%p7157_p6), %s7521_s5, 48, %s217_s25, [#allocation11]  }
  0x67   : > { %s5161_s14 = sadd.s32 4294967294, %s7072_s23   ;;  %s7256_s30 = sadd.s32 1, %s7072_s23  }
  0x68   : > { %s29_s10 = ssub.s32 %s7072_s23, %s7256_s30  ;;  %s32_s11 = sadd.s32 1, %s7068_s22 }
  0x69   : > { %p30_p8 = scmp.eq.s32.totalorder %s29_s10, 0  ;;  %p39_p11 = scmp.ne.s32.totalorder %s7068_s22, %s7064_s21 }
  0x6a   : > { %p40_p1 = scmp.eq.s32.totalorder %s7072_s23, 0  ;;  %p45_p3 = scmp.ne.s32.totalorder %s7064_s21, %s7060_s0 }
  0x6b   : > { %s7267_s29 = scalar_select %p30_p8, %s7068_s22, %s32_s11  }
  0x6c   : > { %p41_p12 = por %p40_p1, %p39_p11  ;;  %p7529_p13 = scmp.eq.s32.totalorder %s7141_s26, 0 }
  0x6d   : > { %p153_p6 = scmp.eq.s32.totalorder %s7141_s26, 1  ;;  %p159_p2 = scmp.eq.s32.totalorder %s5161_s14, 1 }
  0x6e   : > { %p7271_p0 = por %p7529_p13, %p45_p3  ;;  %p5992_p5 = scmp.lt.s32.totalorder %s7072_s23, 2 }
  0x6f   : > { %s227_s13 = sand.u32 1, %s7068_s22   ;;  %p7278_p7 = por %p153_p6, %p39_p11 }
  0x70   : > { %p7282_p9 = por %p159_p2, %p45_p3  ;;  %s5943_s16 = smul.u32 24, %s227_s13 }
  0x71   : > { %s7531_s25 = scalar_select %p7278_p7, 1, 0 }
  0x72   : > { %s7532_s15 = scalar_select %p7282_p9, 1, 0 }
  0x73   : > { %s5944_s17 = smul.u32 384, %s7072_s23  ;;  %p7287_p4 = pnand %p5992_p5, %p41_p12 }
  0x74   : > { %s231_s8 = scalar_lea.vmem [#allocation4], %s5943_s16  ;;  %s228_s7 = scalar_lea.sflag [#allocation5], %s227_s13 }
  0x75   : > { %s7294_s24 = scalar_lea.hbm %s7517_s1, %s5944_s17  ;;  %s239_s28 = sshll.u32 %s231_s8, 4  ;;  %s7296_s28 = int_to_ptr.vmem [resolvable:$true] %s239_s28 }
  0x76   : > { %s6968_s9 = scalar_lea.hbm %s7294_s24, 384  ;;  %p6970_p8 = pneg %p7287_p4 }
  0x77   : > { %p6969_p10 = scmp.ne.s32.totalorder %s7294_s24, %s6968_s9  ;;  %s6973_s11 = scalar_lea.hbm %s7517_s1, 768 }
  0x78   : > { %p6974_p3 = scmp.lt.u32.totalorder %s7294_s24, %s7517_s1  ;;  %p6975_p12 = scmp.lt.u32.totalorder %s6973_s11, %s6968_s9 }
  0x79   : > { %p6971_p11 = pnand %p6970_p8, %p6969_p10  ;;  %p6977_p6 = scmp.lt.u32.totalorder %s6968_s9, %s7294_s24 }
  0x7a   : > { %p6976_p13 = por %p6975_p12, %p6974_p3 }
  0x7b   : > { %p6972_p1 = pneg %p6971_p11 }
  0x7c   : > { %p6978_p2 = por %p6977_p6, %p6976_p13 }
  0x7e   : > { %p6979_p5 = pnand %p6978_p2, %p6972_p1 }
  0x80   : > { %6982 = shalt.err (!%p6979_p5)
}
  0x81   : > { %s6983_s13 = scalar_lea.vmem %s7296_s28, 384  ;;  %s7082_s16 = smov [#allocation4]  }
  0x82   : > { %p6984_p10 = scmp.ne.s32.totalorder %s7296_s28, %s6983_s13  ;;  %s6988_s20 = sshll.u32 %s7082_s16, 4  ;;  %s6989_s20 = int_to_ptr.vmem [resolvable:$false] %s6988_s20 }
  0x83   : > { %s6990_s8 = scalar_lea.vmem %s6989_s20, 768  ;;  %p6991_p7 = scmp.lt.s32.totalorder %s7296_s28, %s6989_s20 }
  0x84   : > { %p6986_p11 = pnand %p6984_p10, %p6970_p8  ;;  %p6992_p3 = scmp.lt.s32.totalorder %s6990_s8, %s6983_s13 }
  0x86   : > { %p6987_p9 = pneg %p6986_p11  ;;  %p6993_p12 = por %p6992_p3, %p6991_p7 }
  0x88   : > { %p6994_p13 = pnand %p6993_p12, %p6987_p9 }
  0x8a   : > { %6997 = shalt.err (!%p6994_p13)
}
  0x8b   : > { %5983 = dma.hbm_to_vmem [thread:$0]  (!%p7287_p4), %s7294_s24, 384, %s7296_s28, %s228_s7  }
  0x8c   : > { %p7534_p1 = scmp.ne.s32.totalorder %s7526_s27, 0 }
  0x8d   : > { %s7326_s9 = sand.u32 (!%p7534_p1), 1, %s7064_s21  }
  0x8e   : > { %248 = sbr.rel (%p7534_p1) target bundleno = 1054 (0x41e), region = 40  ;;  %s251_s10 = scalar_lea.sflag (!%p7534_p1), [#allocation5], %s7326_s9 }
  0x8f   : > { %s5945_s14 = smul.u32 (!%p7534_p1), 24, %s7326_s9 }
  0x91   : > { %s7332_s11 = scalar_lea.vmem (!%p7534_p1), [#allocation4], %s5945_s14 }
  0x95   : > { %7043 = dma.done.wait (%p7271_p0), %s251_s10, 384  }
  0x96   : > { %7045 = vsyncadd (%p7271_p0), %s251_s10, 4294966912  ;;  %p7535_p7 = scmp.eq.s32.totalorder %s7141_s26, 0 }
  0x98   : > { %7047 = dma.done.wait (%p7535_p7), [#allocation8], 37056   ;;  %p7536_p9 = pmov %p7535_p7 }
  0x99   : > { %p7537_p4 = pmov %p7535_p7 }
  0x9a   : > { %7049 = vsyncadd (%p7536_p9), [#allocation8], 4294930240 }
  0x9b   : > { %7051 = dma.done.wait (%p7537_p4), [#allocation11], 36912   ;;  %p7538_p8 = pmov %p7537_p4 }
  0x9c   : > { %v6039_v0 = vld [vmem:[#allocation7 + $0x4] ss:$48 sps:$4 sm:$0xff]   ;;  %v6041_v1 = vld [vmem:[#allocation7] ss:$48 sps:$4 sm:$0xff]   ;;  %s296_s27 = scalar_lea.vmem [#allocation13], %s5945_s14  ;;  %s5946_s12 = smul.u32 384, %s7141_s26 }
  0x9d   : > { %7053 = vsyncadd (%p7538_p8), [#allocation11], 4294930384  ;;  %2096 = vmatprep.subr.bf16.mxu1 %v6039_v0  ;;  %v6042_v2 = vld [vmem:[#allocation7 + $0x64] ss:$48 sps:$4 sm:$0xff]   ;;  %v6044_v3 = vld [vmem:[#allocation7 + $0x60] ss:$48 sps:$4 sm:$0xff]  }
  0x9e   : > { %2097 = vmatpush1.bf16.msra.mxu1 %v6041_v1  ;;  %v6045_v4 = vld [vmem:[#allocation7 + $0xc4] ss:$48 sps:$4 sm:$0xff]   ;;  %v6047_v5 = vld [vmem:[#allocation7 + $0xc0] ss:$48 sps:$4 sm:$0xff]   ;;  %v7083_v1 = vmov 0   ;;  %s5053_s18 = sshll.u32 %s296_s27, 4  ;;  %s7472_s7 = scalar_lea.hbm %s7522_s6, %s5946_s12  ;;  %s7474_s18 = int_to_ptr.vmem [resolvable:$true] %s5053_s18 }
  0x9f   : > { %2098 = vmatprep.subr.bf16.mxu1 %v6042_v2  ;;  %v6048_v6 = vld [vmem:[#allocation7 + $0x124] ss:$48 sps:$4 sm:$0xff]   ;;  %v6050_v7 = vld [vmem:[#allocation7 + $0x120] ss:$48 sps:$4 sm:$0xff]   ;;  %s5039_s26 = scalar_lea.sflag [#allocation6], %s7326_s9  ;;  %s6998_s17 = scalar_lea.vmem %s7474_s18, 384 }
  0xa0   : > { %v6051_v8 = vld [vmem:[#allocation7 + $0x184] ss:$48 sps:$4 sm:$0xff]   ;;  %v6053_v9 = vld [vmem:[#allocation7 + $0x180] ss:$48 sps:$4 sm:$0xff]   ;;  %p6999_p0 = scmp.ne.s32.totalorder %s7474_s18, %s6998_s17  ;;  %p7539_p6 = scmp.ne.s32.totalorder %s7531_s25, 0 }
  0xa1   : > { %v6054_v10 = vld [vmem:[#allocation7 + $0x1e4] ss:$48 sps:$4 sm:$0xff]   ;;  %v6056_v11 = vld [vmem:[#allocation7 + $0x1e0] ss:$48 sps:$4 sm:$0xff]   ;;  %s7084_s19 = smov [#allocation13]  }
  0xa2   : > { %2099 = vmatpush1.bf16.msra.mxu1 %v6044_v3  ;;  %v6057_v12 = vld [vmem:[#allocation7 + $0x244] ss:$48 sps:$4 sm:$0xff]   ;;  %v6086_v14 = vld [vmem:[#allocation7 + $0x10] ss:$48 sps:$4 sm:$0xff]   ;;  %p7000_p2 = pnand %p6999_p0, %p7539_p6  ;;  %s7002_s13 = sshll.u32 %s7084_s19, 4  ;;  %s7003_s13 = int_to_ptr.vmem [resolvable:$false] %s7002_s13 }
  0xa3   : > { %2100 = vmatprep.subr.bf16.mxu1 %v6045_v4  ;;  %v6084_v13 = vld [vmem:[#allocation7 + $0x14] ss:$48 sps:$4 sm:$0xff]   ;;  %v6059_v15 = vld [vmem:[#allocation7 + $0x240] ss:$48 sps:$4 sm:$0xff]   ;;  %s7004_s16 = scalar_lea.vmem %s7003_s13, 768  ;;  %p7005_p10 = scmp.lt.s32.totalorder %s7474_s18, %s7003_s13 }
  0xa4   : > { %v6060_v16 = vld [vmem:[#allocation7 + $0x2a4] ss:$48 sps:$4 sm:$0xff]   ;;  %2260 = vmatprep.subr.bf16.mxu0 %v6084_v13  ;;  %v6092_v18 = vld [vmem:[#allocation7 + $0x70] ss:$48 sps:$4 sm:$0xff]   ;;  %p7001_p5 = pneg %p7000_p2  ;;  %p7006_p11 = scmp.lt.s32.totalorder %s7004_s16, %s6998_s17 }
  0xa5   : > { %2261 = vmatpush1.bf16.msra.mxu0 %v6086_v14  ;;  %v6090_v17 = vld [vmem:[#allocation7 + $0x74] ss:$48 sps:$4 sm:$0xff]   ;;  %v6062_v20 = vld [vmem:[#allocation7 + $0x2a0] ss:$48 sps:$4 sm:$0xff]  }
  0xa6   : > { %2101 = vmatpush1.bf16.msra.mxu1 %v6047_v5  ;;  %v299_v19 = vld [vmem:[%s7332_s11 + $0x8] sm:$0xff]  ;;  %2262 = vmatprep.subr.bf16.mxu0 %v6090_v17  ;;  %v298_v55 = vld [vmem:[%s7332_s11] sm:$0xff]  ;;  %p7007_p3 = por %p7006_p11, %p7005_p10 }
  0xa7   : > { %2102 = vmatprep.subr.bf16.mxu1 %v6048_v6  ;;  %v7347_v21 = vpack.c.bf16 %v299_v19, %v299_v19  ;;  %v6096_v22 = vld [vmem:[#allocation7 + $0xd4] ss:$48 sps:$4 sm:$0xff]   ;;  %v6098_v23 = vld [vmem:[#allocation7 + $0xd0] ss:$48 sps:$4 sm:$0xff]   ;;  %v7352_v59 = vpack.c.bf16 %v298_v55, %v298_v55 }
  0xa8   : > { %v6063_v24 = vld [vmem:[#allocation7 + $0x304] ss:$48 sps:$4 sm:$0xff]   ;;  %v6065_v26 = vld [vmem:[#allocation7 + $0x300] ss:$48 sps:$4 sm:$0xff]   ;;  %p7008_p12 = pnand %p7007_p3, %p7001_p5 }
  0xa9   : > { %2263 = vmatpush1.bf16.msra.mxu0 %v6092_v18  ;;  %2128 = vmatprep.mubr.bf16.mxu1 %v7347_v21  ;;  %v6102_v25 = vld [vmem:[#allocation7 + $0x134] ss:$48 sps:$4 sm:$0xff]   ;;  %v6104_v27 = vld [vmem:[#allocation7 + $0x130] ss:$48 sps:$4 sm:$0xff]  }
  0xaa   : > { %2103 = vmatpush1.bf16.msra.mxu1 %v6050_v7  ;;  %2264 = vmatprep.subr.bf16.mxu0 %v6096_v22  ;;  %v6066_v28 = vld [vmem:[#allocation7 + $0x364] ss:$48 sps:$4 sm:$0xff]   ;;  %v6068_v30 = vld [vmem:[#allocation7 + $0x360] ss:$48 sps:$4 sm:$0xff]  }
  0xab   : > { %2104 = vmatprep.subr.bf16.mxu1 %v6051_v8  ;;  %2292 = vmatprep.mubr.bf16.mxu0 %v7347_v21  ;;  %v6108_v29 = vld [vmem:[#allocation7 + $0x194] ss:$48 sps:$4 sm:$0xff]   ;;  %v6110_v31 = vld [vmem:[#allocation7 + $0x190] ss:$48 sps:$4 sm:$0xff]  }
  0xac   : > { %v6069_v32 = vld [vmem:[#allocation7 + $0x3c4] ss:$48 sps:$4 sm:$0xff]   ;;  %v6071_v34 = vld [vmem:[#allocation7 + $0x3c0] ss:$48 sps:$4 sm:$0xff]  }
  0xad   : > { %2265 = vmatpush1.bf16.msra.mxu0 %v6098_v23  ;;  %v6114_v33 = vld [vmem:[#allocation7 + $0x1f4] ss:$48 sps:$4 sm:$0xff]   ;;  %v6116_v35 = vld [vmem:[#allocation7 + $0x1f0] ss:$48 sps:$4 sm:$0xff]  }
  0xae   : > { %2105 = vmatpush1.bf16.msra.mxu1 %v6053_v9  ;;  %2266 = vmatprep.subr.bf16.mxu0 %v6102_v25  ;;  %v6072_v36 = vld [vmem:[#allocation7 + $0x424] ss:$48 sps:$4 sm:$0xff]   ;;  %v6074_v38 = vld [vmem:[#allocation7 + $0x420] ss:$48 sps:$4 sm:$0xff]  }
  0xaf   : > { %2106 = vmatprep.subr.bf16.mxu1 %v6054_v10  ;;  %v6120_v37 = vld [vmem:[#allocation7 + $0x254] ss:$48 sps:$4 sm:$0xff]   ;;  %v6122_v39 = vld [vmem:[#allocation7 + $0x250] ss:$48 sps:$4 sm:$0xff]  }
  0xb0   : > { %v6075_v40 = vld [vmem:[#allocation7 + $0x484] ss:$48 sps:$4 sm:$0xff]   ;;  %v6077_v42 = vld [vmem:[#allocation7 + $0x480] ss:$48 sps:$4 sm:$0xff]  }
  0xb1   : > { %2267 = vmatpush1.bf16.msra.mxu0 %v6104_v27  ;;  %v6126_v41 = vld [vmem:[#allocation7 + $0x2b4] ss:$48 sps:$4 sm:$0xff]   ;;  %v6128_v43 = vld [vmem:[#allocation7 + $0x2b0] ss:$48 sps:$4 sm:$0xff]  }
  0xb2   : > { %2107 = vmatpush1.bf16.msra.mxu1 %v6056_v11  ;;  %2268 = vmatprep.subr.bf16.mxu0 %v6108_v29  ;;  %v6078_v44 = vld [vmem:[#allocation7 + $0x4e4] ss:$48 sps:$4 sm:$0xff]   ;;  %v6080_v46 = vld [vmem:[#allocation7 + $0x4e0] ss:$48 sps:$4 sm:$0xff]  }
  0xb3   : > { %2108 = vmatprep.subr.bf16.mxu1 %v6057_v12  ;;  %v6132_v45 = vld [vmem:[#allocation7 + $0x314] ss:$48 sps:$4 sm:$0xff]   ;;  %v6134_v47 = vld [vmem:[#allocation7 + $0x310] ss:$48 sps:$4 sm:$0xff]  }
  0xb4   : > { %v6081_v48 = vld [vmem:[#allocation7 + $0x544] ss:$48 sps:$4 sm:$0xff]   ;;  %v6083_v50 = vld [vmem:[#allocation7 + $0x540] ss:$48 sps:$4 sm:$0xff]  }
  0xb5   : > { %2269 = vmatpush1.bf16.msra.mxu0 %v6110_v31  ;;  %v6138_v49 = vld [vmem:[#allocation7 + $0x374] ss:$48 sps:$4 sm:$0xff]   ;;  %v6140_v51 = vld [vmem:[#allocation7 + $0x370] ss:$48 sps:$4 sm:$0xff]  }
  0xb6   : > { %2109 = vmatpush1.bf16.msra.mxu1 %v6059_v15  ;;  %2270 = vmatprep.subr.bf16.mxu0 %v6114_v33  ;;  %v6087_v52 = vld [vmem:[#allocation7 + $0x5a4] ss:$48 sps:$4 sm:$0xff]   ;;  %v6089_v54 = vld [vmem:[#allocation7 + $0x5a0] ss:$48 sps:$4 sm:$0xff]   ;;  %v6149_v33 = vld [vmem:[#allocation7 + $0x6c] ss:$48 sps:$4 sm:$0xff]  }
  0xb7   : > { %2110 = vmatprep.subr.bf16.mxu1 %v6060_v16  ;;  %v6144_v53 = vld [vmem:[#allocation7 + $0x3d4] ss:$48 sps:$4 sm:$0xff]   ;;  %v6146_v56 = vld [vmem:[#allocation7 + $0x3d0] ss:$48 sps:$4 sm:$0xff]  }
  0xb8   : > { %v6095_v57 = vld [vmem:[#allocation7 + $0x604] ss:$48 sps:$4 sm:$0xff]   ;;  %v6093_v60 = vld [vmem:[#allocation7 + $0x600] ss:$48 sps:$4 sm:$0xff]  }
  0xb9   : > { %2271 = vmatpush1.bf16.msra.mxu0 %v6116_v35  ;;  %v6150_v58 = vld [vmem:[#allocation7 + $0x434] ss:$48 sps:$4 sm:$0xff]   ;;  %v6152_v62 = vld [vmem:[#allocation7 + $0x430] ss:$48 sps:$4 sm:$0xff]  }
  0xba   : > { %2111 = vmatpush1.bf16.msra.mxu1 %v6062_v20  ;;  %2272 = vmatprep.subr.bf16.mxu0 %v6120_v37  ;;  %v6101_v61 = vld [vmem:[#allocation7 + $0x664] ss:$48 sps:$4 sm:$0xff]   ;;  %v6099_v0 = vld [vmem:[#allocation7 + $0x660] ss:$48 sps:$4 sm:$0xff]   ;;  %v6155_v37 = vld [vmem:[#allocation7 + $0xcc] ss:$48 sps:$4 sm:$0xff]  }
  0xbb   : > { %2112 = vmatprep.subr.bf16.mxu1 %v6063_v24  ;;  %v6156_v63 = vld [vmem:[#allocation7 + $0x494] ss:$48 sps:$4 sm:$0xff]   ;;  %v6158_v3 = vld [vmem:[#allocation7 + $0x490] ss:$48 sps:$4 sm:$0xff]  }
  0xbc   : > { %v6107_v2 = vld [vmem:[#allocation7 + $0x6c4] ss:$48 sps:$4 sm:$0xff]   ;;  %v6105_v5 = vld [vmem:[#allocation7 + $0x6c0] ss:$48 sps:$4 sm:$0xff]  }
  0xbd   : > { %2273 = vmatpush1.bf16.msra.mxu0 %v6122_v39  ;;  %v6162_v4 = vld [vmem:[#allocation7 + $0x4f4] ss:$48 sps:$4 sm:$0xff]   ;;  %v6164_v7 = vld [vmem:[#allocation7 + $0x4f0] ss:$48 sps:$4 sm:$0xff]  }
  0xbe   : > { %2113 = vmatpush1.bf16.msra.mxu1 %v6065_v26  ;;  %2274 = vmatprep.subr.bf16.mxu0 %v6126_v41  ;;  %v6113_v6 = vld [vmem:[#allocation7 + $0x724] ss:$48 sps:$4 sm:$0xff]   ;;  %v6111_v9 = vld [vmem:[#allocation7 + $0x720] ss:$48 sps:$4 sm:$0xff]   ;;  %v6161_v41 = vld [vmem:[#allocation7 + $0x12c] ss:$48 sps:$4 sm:$0xff]  }
  0xbf   : > { %2114 = vmatprep.subr.bf16.mxu1 %v6066_v28  ;;  %v6168_v8 = vld [vmem:[#allocation7 + $0x554] ss:$48 sps:$4 sm:$0xff]   ;;  %v6170_v11 = vld [vmem:[#allocation7 + $0x550] ss:$48 sps:$4 sm:$0xff]   ;;  %v6143_v28 = vld [vmem:[#allocation7 + $0xc] ss:$48 sps:$4 sm:$0xff]  }
  0xc0   : > { %v6119_v10 = vld [vmem:[#allocation7 + $0x784] ss:$48 sps:$4 sm:$0xff]   ;;  %v6117_v13 = vld [vmem:[#allocation7 + $0x780] ss:$48 sps:$4 sm:$0xff]  }
  0xc1   : > { %2275 = vmatpush1.bf16.msra.mxu0 %v6128_v43  ;;  %v6174_v12 = vld [vmem:[#allocation7 + $0x5b4] ss:$48 sps:$4 sm:$0xff]   ;;  %v6176_v15 = vld [vmem:[#allocation7 + $0x5b0] ss:$48 sps:$4 sm:$0xff]  }
  0xc2   : > { %2115 = vmatpush1.bf16.msra.mxu1 %v6068_v30  ;;  %2276 = vmatprep.subr.bf16.mxu0 %v6132_v45  ;;  %v6125_v14 = vld [vmem:[#allocation7 + $0x7e4] ss:$48 sps:$4 sm:$0xff]   ;;  %v6123_v17 = vld [vmem:[#allocation7 + $0x7e0] ss:$48 sps:$4 sm:$0xff]   ;;  %v6167_v45 = vld [vmem:[#allocation7 + $0x18c] ss:$48 sps:$4 sm:$0xff]  }
  0xc3   : > { %2116 = vmatprep.subr.bf16.mxu1 %v6069_v32  ;;  %v6182_v16 = vld [vmem:[#allocation7 + $0x614] ss:$48 sps:$4 sm:$0xff]   ;;  %v6180_v19 = vld [vmem:[#allocation7 + $0x610] ss:$48 sps:$4 sm:$0xff]   ;;  %v6141_v32 = vld [vmem:[#allocation7 + $0x8] ss:$48 sps:$4 sm:$0xff]  }
  0xc4   : > { %v6131_v18 = vld [vmem:[#allocation7 + $0x844] ss:$48 sps:$4 sm:$0xff]   ;;  %v6129_v22 = vld [vmem:[#allocation7 + $0x840] ss:$48 sps:$4 sm:$0xff]  }
  0xc5   : > { %2277 = vmatpush1.bf16.msra.mxu0 %v6134_v47  ;;  %v6188_v20 = vld [vmem:[#allocation7 + $0x674] ss:$48 sps:$4 sm:$0xff]   ;;  %v6186_v24 = vld [vmem:[#allocation7 + $0x670] ss:$48 sps:$4 sm:$0xff]  }
  0xc6   : > { %2117 = vmatpush1.bf16.msra.mxu1 %v6071_v34  ;;  %2278 = vmatprep.subr.bf16.mxu0 %v6138_v49  ;;  %v6137_v23 = vld [vmem:[#allocation7 + $0x8a4] ss:$48 sps:$4 sm:$0xff]   ;;  %v6135_v26 = vld [vmem:[#allocation7 + $0x8a0] ss:$48 sps:$4 sm:$0xff]   ;;  %v6173_v49 = vld [vmem:[#allocation7 + $0x1ec] ss:$48 sps:$4 sm:$0xff]  }
  0xc7   : > { %2118 = vmatprep.subr.bf16.mxu1 %v6072_v36  ;;  %v6194_v25 = vld [vmem:[#allocation7 + $0x6d4] ss:$48 sps:$4 sm:$0xff]   ;;  %v6192_v29 = vld [vmem:[#allocation7 + $0x6d0] ss:$48 sps:$4 sm:$0xff]   ;;  %v6147_v36 = vld [vmem:[#allocation7 + $0x68] ss:$48 sps:$4 sm:$0xff]  }
  0xc8   : > { %v300_v27 = vld [vmem:[%s7332_s11 + $0x10] sm:$0xff] }
  0xc9   : > { %2279 = vmatpush1.bf16.msra.mxu0 %v6140_v51  ;;  %v6200_v30 = vld [vmem:[#allocation7 + $0x734] ss:$48 sps:$4 sm:$0xff]   ;;  %v7359_v31 = vpack.c.bf16 %v300_v27, %v300_v27  ;;  %v6198_v34 = vld [vmem:[#allocation7 + $0x730] ss:$48 sps:$4 sm:$0xff]   ;;  %v6225_v27 = vld [vmem:[#allocation7 + $0x548] ss:$48 sps:$4 sm:$0xff]  }
  0xca   : > { %2119 = vmatpush1.bf16.msra.mxu1 %v6074_v38  ;;  %2280 = vmatprep.subr.bf16.mxu0 %v6144_v53  ;;  %v6206_v35 = vld [vmem:[#allocation7 + $0x794] ss:$48 sps:$4 sm:$0xff]   ;;  %v6204_v38 = vld [vmem:[#allocation7 + $0x790] ss:$48 sps:$4 sm:$0xff]   ;;  %v6179_v53 = vld [vmem:[#allocation7 + $0x24c] ss:$48 sps:$4 sm:$0xff]  }
  0xcb   : > { %2120 = vmatprep.subr.bf16.mxu1 %v6075_v40  ;;  %v6212_v39 = vld [vmem:[#allocation7 + $0x7f4] ss:$48 sps:$4 sm:$0xff]   ;;  %v6153_v40 = vld [vmem:[#allocation7 + $0xc8] ss:$48 sps:$4 sm:$0xff]  }
  0xcc   : > { %v6218_v43 = vld [vmem:[#allocation7 + $0x854] ss:$48 sps:$4 sm:$0xff]  }
  0xcd   : > { %2281 = vmatpush1.bf16.msra.mxu0 %v6146_v56  ;;  %v6224_v47 = vld [vmem:[#allocation7 + $0x8b4] ss:$48 sps:$4 sm:$0xff]   ;;  %v6177_v56 = vld [vmem:[#allocation7 + $0x248] ss:$48 sps:$4 sm:$0xff]  }
  0xce   : > { %2121 = vmatpush1.bf16.msra.mxu1 %v6077_v42  ;;  %2282 = vmatprep.subr.bf16.mxu0 %v6150_v58  ;;  %v6210_v42 = vld [vmem:[#allocation7 + $0x7f0] ss:$48 sps:$4 sm:$0xff]   ;;  %v6230_v51 = vld [vmem:[#allocation7 + $0x24] ss:$48 sps:$4 sm:$0xff]  }
  0xcf   : > { %2122 = vmatprep.subr.bf16.mxu1 %v6078_v44  ;;  %v6159_v44 = vld [vmem:[#allocation7 + $0x128] ss:$48 sps:$4 sm:$0xff]   ;;  %v6236_v55 = vld [vmem:[#allocation7 + $0x84] ss:$48 sps:$4 sm:$0xff]   ;;  %v6234_v58 = vld [vmem:[#allocation7 + $0x80] ss:$48 sps:$4 sm:$0xff]  }
  0xd1   : > { %2283 = vmatpush1.bf16.msra.mxu0 %v6152_v62  ;;  %v6191_v62 = vld [vmem:[#allocation7 + $0x30c] ss:$48 sps:$4 sm:$0xff]  }
  0xd2   : > { %2123 = vmatpush1.bf16.msra.mxu1 %v6080_v46  ;;  %2284 = vmatprep.subr.bf16.mxu0 %v6156_v63  ;;  %v6216_v46 = vld [vmem:[#allocation7 + $0x850] ss:$48 sps:$4 sm:$0xff]  }
  0xd3   : > { %2124 = vmatprep.subr.bf16.mxu1 %v6081_v48  ;;  %v6165_v48 = vld [vmem:[#allocation7 + $0x188] ss:$48 sps:$4 sm:$0xff]   ;;  %v6240_v63 = vld [vmem:[#allocation7 + $0xe0] ss:$48 sps:$4 sm:$0xff]  }
  0xd5   : > { %2285 = vmatpush1.bf16.msra.mxu0 %v6158_v3  ;;  %v6197_v3 = vld [vmem:[#allocation7 + $0x36c] ss:$48 sps:$4 sm:$0xff]  }
  0xd6   : > { %2125 = vmatpush1.bf16.msra.mxu1 %v6083_v50  ;;  %2286 = vmatprep.subr.bf16.mxu0 %v6162_v4  ;;  %v6222_v50 = vld [vmem:[#allocation7 + $0x8b0] ss:$48 sps:$4 sm:$0xff]  }
  0xd7   : > { %2126 = vmatprep.subr.bf16.mxu1 %v6087_v52  ;;  %v6171_v52 = vld [vmem:[#allocation7 + $0x1e8] ss:$48 sps:$4 sm:$0xff]   ;;  %v6246_v4 = vld [vmem:[#allocation7 + $0x140] ss:$48 sps:$4 sm:$0xff]  }
  0xd9   : > { %2287 = vmatpush1.bf16.msra.mxu0 %v6164_v7  ;;  %v6203_v7 = vld [vmem:[#allocation7 + $0x3cc] ss:$48 sps:$4 sm:$0xff]  }
  0xda   : > { %2127 = vmatpush1.bf16.msra.mxu1 %v6089_v54  ;;  %2288 = vmatprep.subr.bf16.mxu0 %v6168_v8  ;;  %v6228_v54 = vld [vmem:[#allocation7 + $0x20] ss:$48 sps:$4 sm:$0xff]  }
  0xdb   : > { %2137 = vmatprep.subr.bf16.mxu1 %v6095_v57  ;;  %v6185_v57 = vld [vmem:[#allocation7 + $0x2ac] ss:$48 sps:$4 sm:$0xff]   ;;  %v6252_v8 = vld [vmem:[#allocation7 + $0x1a0] ss:$48 sps:$4 sm:$0xff]  }
  0xdd   : > { %2129 = vmatmul.mubr.bf16.vlgmr.msra.gmra.mrb[0].mxu1 %v7352_v59  ;;  %2289 = vmatpush1.bf16.msra.mxu0 %v6170_v11  ;;  %v6209_v11 = vld [vmem:[#allocation7 + $0x42c] ss:$48 sps:$4 sm:$0xff]  }
  0xde   : > { %2138 = vmatpush1.bf16.msra.mxu1 %v6093_v60  ;;  %2169 = vmatprep.mubr.bf16.mxu1 %v7083_v1  ;;  %v6242_v60 = vld [vmem:[#allocation7 + $0xe4] ss:$48 sps:$4 sm:$0xff]  }
  0xdf   : > { %2139 = vmatprep.subr.bf16.mxu1 %v6101_v61  ;;  %2290 = vmatprep.subr.bf16.mxu0 %v6174_v12  ;;  %v6183_v61 = vld [vmem:[#allocation7 + $0x2a8] ss:$48 sps:$4 sm:$0xff]   ;;  %v6258_v12 = vld [vmem:[#allocation7 + $0x200] ss:$48 sps:$4 sm:$0xff]  }
  0xe1   : > { %2291 = vmatpush1.bf16.msra.mxu0 %v6176_v15  ;;  %v6215_v15 = vld [vmem:[#allocation7 + $0x48c] ss:$48 sps:$4 sm:$0xff]  }
  0xe2   : > { %2140 = vmatpush1.bf16.msra.mxu1 %v6099_v0  ;;  %2301 = vmatprep.subr.bf16.mxu0 %v6182_v16  ;;  %v6248_v0 = vld [vmem:[#allocation7 + $0x144] ss:$48 sps:$4 sm:$0xff]   ;;  %v6264_v16 = vld [vmem:[#allocation7 + $0x260] ss:$48 sps:$4 sm:$0xff]  }
  0xe3   : > { %2141 = vmatprep.subr.bf16.mxu1 %v6107_v2  ;;  %v6189_v2 = vld [vmem:[#allocation7 + $0x308] ss:$48 sps:$4 sm:$0xff]  }
  0xe4   : > { %2293 = vmatmul.mubr.bf16.vlgmr.msra.gmra.mrb[0].mxu0 %v7352_v59 }
  0xe5   : > { %2302 = vmatpush1.bf16.msra.mxu0 %v6180_v19  ;;  %2333 = vmatprep.mubr.bf16.mxu0 %v7083_v1  ;;  %v6221_v19 = vld [vmem:[#allocation7 + $0x4ec] ss:$48 sps:$4 sm:$0xff]  }
  0xe6   : > { %2142 = vmatpush1.bf16.msra.mxu1 %v6105_v5  ;;  %2303 = vmatprep.subr.bf16.mxu0 %v6188_v20  ;;  %v6254_v5 = vld [vmem:[#allocation7 + $0x1a4] ss:$48 sps:$4 sm:$0xff]   ;;  %v6270_v20 = vld [vmem:[#allocation7 + $0x2c0] ss:$48 sps:$4 sm:$0xff]  }
  0xe7   : > { %2143 = vmatprep.subr.bf16.mxu1 %v6113_v6  ;;  %v6195_v6 = vld [vmem:[#allocation7 + $0x368] ss:$48 sps:$4 sm:$0xff]  }
  0xe9   : > { %2304 = vmatpush1.bf16.msra.mxu0 %v6186_v24  ;;  %v6227_v24 = vld [vmem:[#allocation7 + $0x54c] ss:$48 sps:$4 sm:$0xff]  }
  0xea   : > { %2144 = vmatpush1.bf16.msra.mxu1 %v6111_v9  ;;  %2305 = vmatprep.subr.bf16.mxu0 %v6194_v25  ;;  %v6260_v9 = vld [vmem:[#allocation7 + $0x204] ss:$48 sps:$4 sm:$0xff]   ;;  %v6276_v25 = vld [vmem:[#allocation7 + $0x320] ss:$48 sps:$4 sm:$0xff]  }
  0xeb   : > { %2145 = vmatprep.subr.bf16.mxu1 %v6119_v10  ;;  %v6201_v10 = vld [vmem:[#allocation7 + $0x3c8] ss:$48 sps:$4 sm:$0xff]  }
  0xed   : > { %2306 = vmatpush1.bf16.msra.mxu0 %v6192_v29  ;;  %v6282_v29 = vld [vmem:[#allocation7 + $0x380] ss:$48 sps:$4 sm:$0xff]  }
  0xee   : > { %2146 = vmatpush1.bf16.msra.mxu1 %v6117_v13  ;;  %2307 = vmatprep.subr.bf16.mxu0 %v6200_v30  ;;  %v6266_v13 = vld [vmem:[#allocation7 + $0x264] ss:$48 sps:$4 sm:$0xff]  }
  0xef   : > { %2147 = vmatprep.subr.bf16.mxu1 %v6125_v14  ;;  %v6207_v14 = vld [vmem:[#allocation7 + $0x428] ss:$48 sps:$4 sm:$0xff]   ;;  %v6290_v30 = vld [vmem:[#allocation7 + $0x3e4] ss:$48 sps:$4 sm:$0xff]  }
  0xf1   : > { %2308 = vmatpush1.bf16.msra.mxu0 %v6198_v34  ;;  %v6288_v34 = vld [vmem:[#allocation7 + $0x3e0] ss:$48 sps:$4 sm:$0xff]  }
  0xf2   : > { %2148 = vmatpush1.bf16.msra.mxu1 %v6123_v17  ;;  %2309 = vmatprep.subr.bf16.mxu0 %v6206_v35  ;;  %v6272_v17 = vld [vmem:[#allocation7 + $0x2c4] ss:$48 sps:$4 sm:$0xff]  }
  0xf3   : > { %2149 = vmatprep.subr.bf16.mxu1 %v6131_v18  ;;  %v6213_v18 = vld [vmem:[#allocation7 + $0x488] ss:$48 sps:$4 sm:$0xff]   ;;  %v6296_v35 = vld [vmem:[#allocation7 + $0x444] ss:$48 sps:$4 sm:$0xff]  }
  0xf5   : > { %2310 = vmatpush1.bf16.msra.mxu0 %v6204_v38  ;;  %v6294_v38 = vld [vmem:[#allocation7 + $0x440] ss:$48 sps:$4 sm:$0xff]  }
  0xf6   : > { %2150 = vmatpush1.bf16.msra.mxu1 %v6129_v22  ;;  %2311 = vmatprep.subr.bf16.mxu0 %v6212_v39  ;;  %v6278_v22 = vld [vmem:[#allocation7 + $0x324] ss:$48 sps:$4 sm:$0xff]  }
  0xf7   : > { %2151 = vmatprep.subr.bf16.mxu1 %v6137_v23  ;;  %v6219_v23 = vld [vmem:[#allocation7 + $0x4e8] ss:$48 sps:$4 sm:$0xff]   ;;  %v6302_v39 = vld [vmem:[#allocation7 + $0x4a4] ss:$48 sps:$4 sm:$0xff]  }
  0xf9   : > { %2312 = vmatpush1.bf16.msra.mxu0 %v6210_v42  ;;  %v6300_v42 = vld [vmem:[#allocation7 + $0x4a0] ss:$48 sps:$4 sm:$0xff]  }
  0xfa   : > { %2152 = vmatpush1.bf16.msra.mxu1 %v6135_v26  ;;  %2313 = vmatprep.subr.bf16.mxu0 %v6218_v43  ;;  %v6284_v26 = vld [vmem:[#allocation7 + $0x384] ss:$48 sps:$4 sm:$0xff]  }
  0xfb   : > { %2178 = vmatprep.subr.bf16.mxu1 %v6143_v28  ;;  %v6233_v28 = vld [vmem:[#allocation7 + $0x5ac] ss:$48 sps:$4 sm:$0xff]   ;;  %v6308_v43 = vld [vmem:[#allocation7 + $0x504] ss:$48 sps:$4 sm:$0xff]  }
  0xfd   : > { %2170 = vmatmul.mubr.bf16.vlgmr.msra.gmra.mrb[0].mxu1 %v7359_v31  ;;  %2314 = vmatpush1.bf16.msra.mxu0 %v6216_v46  ;;  %v6306_v46 = vld [vmem:[#allocation7 + $0x500] ss:$48 sps:$4 sm:$0xff]  }
  0xfe   : > { %2179 = vmatpush1.bf16.msra.mxu1 %v6141_v32  ;;  %2210 = vmatprep.mubr.bf16.mxu1 %v7347_v21  ;;  %v6231_v32 = vld [vmem:[#allocation7 + $0x5a8] ss:$48 sps:$4 sm:$0xff]  }
  0xff   : > { %2180 = vmatprep.subr.bf16.mxu1 %v6149_v33  ;;  %2315 = vmatprep.subr.bf16.mxu0 %v6224_v47  ;;  %v6239_v33 = vld [vmem:[#allocation7 + $0x60c] ss:$48 sps:$4 sm:$0xff]   ;;  %v6314_v47 = vld [vmem:[#allocation7 + $0x564] ss:$48 sps:$4 sm:$0xff]  }
 0x101   : > { %2316 = vmatpush1.bf16.msra.mxu0 %v6222_v50  ;;  %v6312_v50 = vld [vmem:[#allocation7 + $0x560] ss:$48 sps:$4 sm:$0xff]  }
 0x102   : > { %2181 = vmatpush1.bf16.msra.mxu1 %v6147_v36  ;;  %2424 = vmatprep.subr.bf16.mxu0 %v6230_v51  ;;  %v6237_v36 = vld [vmem:[#allocation7 + $0x608] ss:$48 sps:$4 sm:$0xff]   ;;  %v6320_v51 = vld [vmem:[#allocation7 + $0x5c4] ss:$48 sps:$4 sm:$0xff]  }
 0x103   : > { %2182 = vmatprep.subr.bf16.mxu1 %v6155_v37  ;;  %v6245_v37 = vld [vmem:[#allocation7 + $0x66c] ss:$48 sps:$4 sm:$0xff]  }
 0x104   : > { %2334 = vmatmul.mubr.bf16.vlgmr.msra.gmra.mrb[0].mxu0 %v7359_v31 }
 0x105   : > { %2425 = vmatpush1.bf16.msra.mxu0 %v6228_v54  ;;  %2456 = vmatprep.mubr.bf16.mxu0 %v7347_v21  ;;  %v6318_v54 = vld [vmem:[#allocation7 + $0x5c0] ss:$48 sps:$4 sm:$0xff]  }
 0x106   : > { %2183 = vmatpush1.bf16.msra.mxu1 %v6153_v40  ;;  %2426 = vmatprep.subr.bf16.mxu0 %v6236_v55  ;;  %v6243_v40 = vld [vmem:[#allocation7 + $0x668] ss:$48 sps:$4 sm:$0xff]   ;;  %v6326_v55 = vld [vmem:[#allocation7 + $0x624] ss:$48 sps:$4 sm:$0xff]  }
 0x107   : > { %2184 = vmatprep.subr.bf16.mxu1 %v6161_v41  ;;  %v6251_v41 = vld [vmem:[#allocation7 + $0x6cc] ss:$48 sps:$4 sm:$0xff]  }
 0x109   : > { %2427 = vmatpush1.bf16.msra.mxu0 %v6234_v58  ;;  %v6324_v58 = vld [vmem:[#allocation7 + $0x620] ss:$48 sps:$4 sm:$0xff]  }
 0x10a   : > { %2185 = vmatpush1.bf16.msra.mxu1 %v6159_v44  ;;  %2428 = vmatprep.subr.bf16.mxu0 %v6242_v60  ;;  %v6249_v44 = vld [vmem:[#allocation7 + $0x6c8] ss:$48 sps:$4 sm:$0xff]   ;;  %v6332_v60 = vld [vmem:[#allocation7 + $0x684] ss:$48 sps:$4 sm:$0xff]  }
 0x10b   : > { %2186 = vmatprep.subr.bf16.mxu1 %v6167_v45  ;;  %v6257_v45 = vld [vmem:[#allocation7 + $0x72c] ss:$48 sps:$4 sm:$0xff]  }
 0x10d   : > { %2429 = vmatpush1.bf16.msra.mxu0 %v6240_v63  ;;  %v6330_v63 = vld [vmem:[#allocation7 + $0x680] ss:$48 sps:$4 sm:$0xff]  }
 0x10e   : > { %2187 = vmatpush1.bf16.msra.mxu1 %v6165_v48  ;;  %2430 = vmatprep.subr.bf16.mxu0 %v6248_v0  ;;  %v6255_v48 = vld [vmem:[#allocation7 + $0x728] ss:$48 sps:$4 sm:$0xff]   ;;  %v6338_v0 = vld [vmem:[#allocation7 + $0x6e4] ss:$48 sps:$4 sm:$0xff]  }
 0x10f   : > { %2188 = vmatprep.subr.bf16.mxu1 %v6173_v49  ;;  %v6263_v49 = vld [vmem:[#allocation7 + $0x78c] ss:$48 sps:$4 sm:$0xff]  }
 0x111   : > { %2431 = vmatpush1.bf16.msra.mxu0 %v6246_v4  ;;  %v6336_v4 = vld [vmem:[#allocation7 + $0x6e0] ss:$48 sps:$4 sm:$0xff]  }
 0x112   : > { %2189 = vmatpush1.bf16.msra.mxu1 %v6171_v52  ;;  %2432 = vmatprep.subr.bf16.mxu0 %v6254_v5  ;;  %v6261_v52 = vld [vmem:[#allocation7 + $0x788] ss:$48 sps:$4 sm:$0xff]   ;;  %v6344_v5 = vld [vmem:[#allocation7 + $0x744] ss:$48 sps:$4 sm:$0xff]  }
 0x113   : > { %2190 = vmatprep.subr.bf16.mxu1 %v6179_v53  ;;  %v6269_v53 = vld [vmem:[#allocation7 + $0x7ec] ss:$48 sps:$4 sm:$0xff]  }
 0x115   : > { %2433 = vmatpush1.bf16.msra.mxu0 %v6252_v8  ;;  %v6342_v8 = vld [vmem:[#allocation7 + $0x740] ss:$48 sps:$4 sm:$0xff]  }
 0x116   : > { %2191 = vmatpush1.bf16.msra.mxu1 %v6177_v56  ;;  %2434 = vmatprep.subr.bf16.mxu0 %v6260_v9  ;;  %v6267_v56 = vld [vmem:[#allocation7 + $0x7e8] ss:$48 sps:$4 sm:$0xff]   ;;  %v6350_v9 = vld [vmem:[#allocation7 + $0x7a4] ss:$48 sps:$4 sm:$0xff]  }
 0x117   : > { %2192 = vmatprep.subr.bf16.mxu1 %v6185_v57  ;;  %v6275_v57 = vld [vmem:[#allocation7 + $0x84c] ss:$48 sps:$4 sm:$0xff]  }
 0x119   : > { %2435 = vmatpush1.bf16.msra.mxu0 %v6258_v12  ;;  %v6348_v12 = vld [vmem:[#allocation7 + $0x7a0] ss:$48 sps:$4 sm:$0xff]  }
 0x11a   : > { %2193 = vmatpush1.bf16.msra.mxu1 %v6183_v61  ;;  %2436 = vmatprep.subr.bf16.mxu0 %v6266_v13  ;;  %v6273_v61 = vld [vmem:[#allocation7 + $0x848] ss:$48 sps:$4 sm:$0xff]   ;;  %v6356_v13 = vld [vmem:[#allocation7 + $0x804] ss:$48 sps:$4 sm:$0xff]  }
 0x11b   : > { %2194 = vmatprep.subr.bf16.mxu1 %v6191_v62  ;;  %v6281_v62 = vld [vmem:[#allocation7 + $0x8ac] ss:$48 sps:$4 sm:$0xff]  }
 0x11d   : > { %2437 = vmatpush1.bf16.msra.mxu0 %v6264_v16  ;;  %v6354_v16 = vld [vmem:[#allocation7 + $0x800] ss:$48 sps:$4 sm:$0xff]  }
 0x11e   : > { %2195 = vmatpush1.bf16.msra.mxu1 %v6189_v2  ;;  %2438 = vmatprep.subr.bf16.mxu0 %v6272_v17  ;;  %v6279_v2 = vld [vmem:[#allocation7 + $0x8a8] ss:$48 sps:$4 sm:$0xff]   ;;  %v6362_v17 = vld [vmem:[#allocation7 + $0x864] ss:$48 sps:$4 sm:$0xff]  }
 0x11f   : > { %2196 = vmatprep.subr.bf16.mxu1 %v6197_v3  ;;  %v6287_v3 = vld [vmem:[#allocation7 + $0x1c] ss:$48 sps:$4 sm:$0xff]  }
 0x121   : > { %2439 = vmatpush1.bf16.msra.mxu0 %v6270_v20  ;;  %v6360_v20 = vld [vmem:[#allocation7 + $0x860] ss:$48 sps:$4 sm:$0xff]  }
 0x122   : > { %2197 = vmatpush1.bf16.msra.mxu1 %v6195_v6  ;;  %2440 = vmatprep.subr.bf16.mxu0 %v6278_v22  ;;  %v6285_v6 = vld [vmem:[#allocation7 + $0x18] ss:$48 sps:$4 sm:$0xff]   ;;  %v6368_v22 = vld [vmem:[#allocation7 + $0x8c4] ss:$48 sps:$4 sm:$0xff]  }
 0x123   : > { %2198 = vmatprep.subr.bf16.mxu1 %v6203_v7  ;;  %v6293_v7 = vld [vmem:[#allocation7 + $0x7c] ss:$48 sps:$4 sm:$0xff]  }
 0x125   : > { %2441 = vmatpush1.bf16.msra.mxu0 %v6276_v25  ;;  %v6366_v25 = vld [vmem:[#allocation7 + $0x8c0] ss:$48 sps:$4 sm:$0xff]  }
 0x126   : > { %2199 = vmatpush1.bf16.msra.mxu1 %v6201_v10  ;;  %2442 = vmatprep.subr.bf16.mxu0 %v6284_v26  ;;  %v6291_v10 = vld [vmem:[#allocation7 + $0x78] ss:$48 sps:$4 sm:$0xff]   ;;  %v6377_v26 = vld [vmem:[#allocation10 + $0x4] ss:$12 sps:$4 sm:$0xff]  }
 0x127   : > { %2200 = vmatprep.subr.bf16.mxu1 %v6209_v11  ;;  %v6299_v11 = vld [vmem:[#allocation7 + $0xdc] ss:$48 sps:$4 sm:$0xff]  }
 0x129   : > { %2443 = vmatpush1.bf16.msra.mxu0 %v6282_v29  ;;  %v6375_v29 = vld [vmem:[#allocation10] ss:$12 sps:$4 sm:$0xff]  }
 0x12a   : > { %2201 = vmatpush1.bf16.msra.mxu1 %v6207_v14  ;;  %2444 = vmatprep.subr.bf16.mxu0 %v6290_v30  ;;  %v6297_v14 = vld [vmem:[#allocation7 + $0xd8] ss:$48 sps:$4 sm:$0xff]  }
 0x12b   : > { %2202 = vmatprep.subr.bf16.mxu1 %v6215_v15  ;;  %v6305_v15 = vld [vmem:[#allocation7 + $0x13c] ss:$48 sps:$4 sm:$0xff]   ;;  %v6383_v30 = vld [vmem:[#allocation10 + $0x1c] ss:$12 sps:$4 sm:$0xff]  }
 0x12d   : > { %2445 = vmatpush1.bf16.msra.mxu0 %v6288_v34  ;;  %v6381_v34 = vld [vmem:[#allocation10 + $0x18] ss:$12 sps:$4 sm:$0xff]  }
 0x12e   : > { %2203 = vmatpush1.bf16.msra.mxu1 %v6213_v18  ;;  %2446 = vmatprep.subr.bf16.mxu0 %v6296_v35  ;;  %v6303_v18 = vld [vmem:[#allocation7 + $0x138] ss:$48 sps:$4 sm:$0xff]   ;;  %v6389_v35 = vld [vmem:[#allocation10 + $0x34] ss:$12 sps:$4 sm:$0xff]  }
 0x12f   : > { %2204 = vmatprep.subr.bf16.mxu1 %v6221_v19  ;;  %v6311_v19 = vld [vmem:[#allocation7 + $0x19c] ss:$48 sps:$4 sm:$0xff]  }
 0x131   : > { %2447 = vmatpush1.bf16.msra.mxu0 %v6294_v38  ;;  %v6387_v38 = vld [vmem:[#allocation10 + $0x30] ss:$12 sps:$4 sm:$0xff]  }
 0x132   : > { %2205 = vmatpush1.bf16.msra.mxu1 %v6219_v23  ;;  %2448 = vmatprep.subr.bf16.mxu0 %v6302_v39  ;;  %v6309_v23 = vld [vmem:[#allocation7 + $0x198] ss:$48 sps:$4 sm:$0xff]  }
 0x133   : > { %2206 = vmatprep.subr.bf16.mxu1 %v6227_v24  ;;  %v6317_v24 = vld [vmem:[#allocation7 + $0x1fc] ss:$48 sps:$4 sm:$0xff]   ;;  %v6395_v39 = vld [vmem:[#allocation10 + $0x4c] ss:$12 sps:$4 sm:$0xff]  }
 0x135   : > { %2449 = vmatpush1.bf16.msra.mxu0 %v6300_v42  ;;  %v6393_v42 = vld [vmem:[#allocation10 + $0x48] ss:$12 sps:$4 sm:$0xff]  }
 0x136   : > { %2207 = vmatpush1.bf16.msra.mxu1 %v6225_v27  ;;  %2450 = vmatprep.subr.bf16.mxu0 %v6308_v43  ;;  %v6315_v27 = vld [vmem:[#allocation7 + $0x1f8] ss:$48 sps:$4 sm:$0xff]   ;;  %v6401_v43 = vld [vmem:[#allocation10 + $0x64] ss:$12 sps:$4 sm:$0xff]  }
 0x137   : > { %2208 = vmatprep.subr.bf16.mxu1 %v6233_v28  ;;  %v6323_v28 = vld [vmem:[#allocation7 + $0x25c] ss:$48 sps:$4 sm:$0xff]  }
 0x139   : > { %2451 = vmatpush1.bf16.msra.mxu0 %v6306_v46  ;;  %v6399_v46 = vld [vmem:[#allocation10 + $0x60] ss:$12 sps:$4 sm:$0xff]  }
 0x13a   : > { %2209 = vmatpush1.bf16.msra.mxu1 %v6231_v32  ;;  %2452 = vmatprep.subr.bf16.mxu0 %v6314_v47  ;;  %v6321_v32 = vld [vmem:[#allocation7 + $0x258] ss:$48 sps:$4 sm:$0xff]  }
 0x13b   : > { %2219 = vmatprep.subr.bf16.mxu1 %v6239_v33  ;;  %v6329_v33 = vld [vmem:[#allocation7 + $0x2bc] ss:$48 sps:$4 sm:$0xff]   ;;  %v6407_v47 = vld [vmem:[#allocation10 + $0x7c] ss:$12 sps:$4 sm:$0xff]  }
 0x13d   : > { %2211 = vmatmul.mubr.bf16.vlgmr.msra.gmra.mrb[4].mxu1 %v7352_v59  ;;  %2453 = vmatpush1.bf16.msra.mxu0 %v6312_v50  ;;  %v6405_v50 = vld [vmem:[#allocation10 + $0x78] ss:$12 sps:$4 sm:$0xff]  }
 0x13e   : > { %2220 = vmatpush1.bf16.msra.mxu1 %v6237_v36  ;;  %2251 = vmatprep.mubr.bf16.mxu1 %v7083_v1  ;;  %v6327_v36 = vld [vmem:[#allocation7 + $0x2b8] ss:$48 sps:$4 sm:$0xff]  }
 0x13f   : > { %2221 = vmatprep.subr.bf16.mxu1 %v6245_v37  ;;  %2454 = vmatprep.subr.bf16.mxu0 %v6320_v51  ;;  %v6335_v37 = vld [vmem:[#allocation7 + $0x31c] ss:$48 sps:$4 sm:$0xff]  }
 0x140   : > { %v6413_v51 = vld [vmem:[#allocation10 + $0x94] ss:$12 sps:$4 sm:$0xff]  }
 0x141   : > { %2455 = vmatpush1.bf16.msra.mxu0 %v6318_v54  ;;  %v6411_v54 = vld [vmem:[#allocation10 + $0x90] ss:$12 sps:$4 sm:$0xff]  }
 0x142   : > { %2222 = vmatpush1.bf16.msra.mxu1 %v6243_v40  ;;  %2465 = vmatprep.subr.bf16.mxu0 %v6326_v55  ;;  %v6333_v40 = vld [vmem:[#allocation7 + $0x318] ss:$48 sps:$4 sm:$0xff]  }
 0x143   : > { %2223 = vmatprep.subr.bf16.mxu1 %v6251_v41  ;;  %v6341_v41 = vld [vmem:[#allocation7 + $0x37c] ss:$48 sps:$4 sm:$0xff]   ;;  %v6419_v55 = vld [vmem:[#allocation10 + $0xac] ss:$12 sps:$4 sm:$0xff]  }
 0x144   : > { %2457 = vmatmul.mubr.bf16.vlgmr.msra.gmra.mrb[4].mxu0 %v7352_v59 }
 0x145   : > { %2466 = vmatpush1.bf16.msra.mxu0 %v6324_v58  ;;  %2497 = vmatprep.mubr.bf16.mxu0 %v7083_v1  ;;  %v6417_v58 = vld [vmem:[#allocation10 + $0xa8] ss:$12 sps:$4 sm:$0xff]  }
 0x146   : > { %2224 = vmatpush1.bf16.msra.mxu1 %v6249_v44  ;;  %2467 = vmatprep.subr.bf16.mxu0 %v6332_v60  ;;  %v6339_v44 = vld [vmem:[#allocation7 + $0x378] ss:$48 sps:$4 sm:$0xff]   ;;  %v6425_v60 = vld [vmem:[#allocation10 + $0xc4] ss:$12 sps:$4 sm:$0xff]  }
 0x147   : > { %2225 = vmatprep.subr.bf16.mxu1 %v6257_v45  ;;  %v6347_v45 = vld [vmem:[#allocation7 + $0x3dc] ss:$48 sps:$4 sm:$0xff]  }
 0x149   : > { %2468 = vmatpush1.bf16.msra.mxu0 %v6330_v63  ;;  %v6423_v63 = vld [vmem:[#allocation10 + $0xc0] ss:$12 sps:$4 sm:$0xff]  }
 0x14a   : > { %2226 = vmatpush1.bf16.msra.mxu1 %v6255_v48  ;;  %2469 = vmatprep.subr.bf16.mxu0 %v6338_v0  ;;  %v6345_v48 = vld [vmem:[#allocation7 + $0x3d8] ss:$48 sps:$4 sm:$0xff]  }
 0x14b   : > { %2227 = vmatprep.subr.bf16.mxu1 %v6263_v49  ;;  %v6353_v49 = vld [vmem:[#allocation7 + $0x43c] ss:$48 sps:$4 sm:$0xff]   ;;  %v6431_v0 = vld [vmem:[#allocation10 + $0xdc] ss:$12 sps:$4 sm:$0xff]  }
 0x14d   : > { %2470 = vmatpush1.bf16.msra.mxu0 %v6336_v4  ;;  %v6429_v4 = vld [vmem:[#allocation10 + $0xd8] ss:$12 sps:$4 sm:$0xff]  }
 0x14e   : > { %2228 = vmatpush1.bf16.msra.mxu1 %v6261_v52  ;;  %2471 = vmatprep.subr.bf16.mxu0 %v6344_v5  ;;  %v6351_v52 = vld [vmem:[#allocation7 + $0x438] ss:$48 sps:$4 sm:$0xff]   ;;  %v6437_v5 = vld [vmem:[#allocation10 + $0xf4] ss:$12 sps:$4 sm:$0xff]  }
 0x14f   : > { %2229 = vmatprep.subr.bf16.mxu1 %v6269_v53  ;;  %v6359_v53 = vld [vmem:[#allocation7 + $0x49c] ss:$48 sps:$4 sm:$0xff]  }
 0x151   : > { %2472 = vmatpush1.bf16.msra.mxu0 %v6342_v8  ;;  %v6435_v8 = vld [vmem:[#allocation10 + $0xf0] ss:$12 sps:$4 sm:$0xff]  }
 0x152   : > { %2230 = vmatpush1.bf16.msra.mxu1 %v6267_v56  ;;  %2473 = vmatprep.subr.bf16.mxu0 %v6350_v9  ;;  %v6357_v56 = vld [vmem:[#allocation7 + $0x498] ss:$48 sps:$4 sm:$0xff]  }
 0x153   : > { %2231 = vmatprep.subr.bf16.mxu1 %v6275_v57  ;;  %v6365_v57 = vld [vmem:[#allocation7 + $0x4fc] ss:$48 sps:$4 sm:$0xff]   ;;  %v6443_v9 = vld [vmem:[#allocation10 + $0x10c] ss:$12 sps:$4 sm:$0xff]  }
 0x155   : > { %2474 = vmatpush1.bf16.msra.mxu0 %v6348_v12  ;;  %v6441_v12 = vld [vmem:[#allocation10 + $0x108] ss:$12 sps:$4 sm:$0xff]  }
 0x156   : > { %2232 = vmatpush1.bf16.msra.mxu1 %v6273_v61  ;;  %2475 = vmatprep.subr.bf16.mxu0 %v6356_v13  ;;  %v6363_v61 = vld [vmem:[#allocation7 + $0x4f8] ss:$48 sps:$4 sm:$0xff]   ;;  %v6449_v13 = vld [vmem:[#allocation10 + $0x124] ss:$12 sps:$4 sm:$0xff]  }
 0x157   : > { %2233 = vmatprep.subr.bf16.mxu1 %v6281_v62  ;;  %v6371_v62 = vld [vmem:[#allocation7 + $0x55c] ss:$48 sps:$4 sm:$0xff]  }
 0x159   : > { %2476 = vmatpush1.bf16.msra.mxu0 %v6354_v16  ;;  %v6447_v16 = vld [vmem:[#allocation10 + $0x120] ss:$12 sps:$4 sm:$0xff]  }
 0x15a   : > { %2234 = vmatpush1.bf16.msra.mxu1 %v6279_v2  ;;  %2477 = vmatprep.subr.bf16.mxu0 %v6362_v17  ;;  %v6369_v2 = vld [vmem:[#allocation7 + $0x558] ss:$48 sps:$4 sm:$0xff]  }
 0x15b   : > { %2342 = vmatprep.subr.bf16.mxu1 %v6287_v3  ;;  %v6374_v3 = vld [vmem:[#allocation7 + $0x5bc] ss:$48 sps:$4 sm:$0xff]   ;;  %v6455_v17 = vld [vmem:[#allocation10 + $0x13c] ss:$12 sps:$4 sm:$0xff]  }
 0x15d   : > { %2252 = vmatmul.mubr.bf16.vlgmr.msra.gmra.mrb[4].mxu1 %v7359_v31  ;;  %2478 = vmatpush1.bf16.msra.mxu0 %v6360_v20  ;;  %v6453_v20 = vld [vmem:[#allocation10 + $0x138] ss:$12 sps:$4 sm:$0xff]  }
 0x15e   : > { %2343 = vmatpush1.bf16.msra.mxu1 %v6285_v6  ;;  %2374 = vmatprep.mubr.bf16.mxu1 %v7347_v21  ;;  %v6372_v6 = vld [vmem:[#allocation7 + $0x5b8] ss:$48 sps:$4 sm:$0xff]  }
 0x15f   : > { %2344 = vmatprep.subr.bf16.mxu1 %v6293_v7  ;;  %2479 = vmatprep.subr.bf16.mxu0 %v6368_v22  ;;  %v6380_v7 = vld [vmem:[#allocation7 + $0x61c] ss:$48 sps:$4 sm:$0xff]  }
 0x160   : > { %v6461_v22 = vld [vmem:[#allocation10 + $0x154] ss:$12 sps:$4 sm:$0xff]  }
 0x161   : > { %2480 = vmatpush1.bf16.msra.mxu0 %v6366_v25  ;;  %v6459_v25 = vld [vmem:[#allocation10 + $0x150] ss:$12 sps:$4 sm:$0xff]  }
 0x162   : > { %2345 = vmatpush1.bf16.msra.mxu1 %v6291_v10  ;;  %4549 = vmatprep.subr.bf16.mxu0 %v6377_v26  ;;  %v6378_v10 = vld [vmem:[#allocation7 + $0x618] ss:$48 sps:$4 sm:$0xff]  }
 0x163   : > { %2346 = vmatprep.subr.bf16.mxu1 %v6299_v11  ;;  %v6386_v11 = vld [vmem:[#allocation7 + $0x67c] ss:$48 sps:$4 sm:$0xff]   ;;  %v6467_v26 = vld [vmem:[#allocation10 + $0x16c] ss:$12 sps:$4 sm:$0xff]  }
 0x164   : > { %2498 = vmatmul.mubr.bf16.vlgmr.msra.gmra.mrb[4].mxu0 %v7359_v31 }
 0x165   : > { %4550 = vmatpush1.bf16.msra.mxu0 %v6375_v29  ;;  %v6465_v29 = vld [vmem:[#allocation10 + $0x168] ss:$12 sps:$4 sm:$0xff]  }
 0x166   : > { %2347 = vmatpush1.bf16.msra.mxu1 %v6297_v14  ;;  %4551 = vmatprep.subr.bf16.mxu0 %v6383_v30  ;;  %v6384_v14 = vld [vmem:[#allocation7 + $0x678] ss:$48 sps:$4 sm:$0xff]   ;;  %v6494_v30 = vld [vmem:[#allocation10 + $0x184] ss:$12 sps:$4 sm:$0xff]  }
 0x167   : > { %2348 = vmatprep.subr.bf16.mxu1 %v6305_v15  ;;  %v6392_v15 = vld [vmem:[#allocation7 + $0x6dc] ss:$48 sps:$4 sm:$0xff]  }
 0x169   : > { %4552 = vmatpush1.bf16.msra.mxu0 %v6381_v34  ;;  %v6414_v34 = vld [vmem:[#allocation7 + $0x858] ss:$48 sps:$4 sm:$0xff]  }
 0x16a   : > { %2349 = vmatpush1.bf16.msra.mxu1 %v6303_v18  ;;  %4553 = vmatprep.subr.bf16.mxu0 %v6389_v35  ;;  %v6390_v18 = vld [vmem:[#allocation7 + $0x6d8] ss:$48 sps:$4 sm:$0xff]   ;;  %v6422_v35 = vld [vmem:[#allocation7 + $0x8bc] ss:$48 sps:$4 sm:$0xff]  }
 0x16b   : > { %2350 = vmatprep.subr.bf16.mxu1 %v6311_v19  ;;  %v6398_v19 = vld [vmem:[#allocation7 + $0x73c] ss:$48 sps:$4 sm:$0xff]  }
 0x16d   : > { %4554 = vmatpush1.bf16.msra.mxu0 %v6387_v38  ;;  %v6426_v38 = vld [vmem:[#allocation7 + $0x28] ss:$48 sps:$4 sm:$0xff]  }
 0x16e   : > { %2351 = vmatpush1.bf16.msra.mxu1 %v6309_v23  ;;  %4555 = vmatprep.subr.bf16.mxu0 %v6395_v39  ;;  %v6396_v23 = vld [vmem:[#allocation7 + $0x738] ss:$48 sps:$4 sm:$0xff]   ;;  %v6434_v39 = vld [vmem:[#allocation7 + $0x8c] ss:$48 sps:$4 sm:$0xff]  }
 0x16f   : > { %2352 = vmatprep.subr.bf16.mxu1 %v6317_v24  ;;  %v6404_v24 = vld [vmem:[#allocation7 + $0x79c] ss:$48 sps:$4 sm:$0xff]  }
 0x171   : > { %4556 = vmatpush1.bf16.msra.mxu0 %v6393_v42  ;;  %v596_v42 = vlaneseq }
 0x172   : > { %2353 = vmatpush1.bf16.msra.mxu1 %v6315_v27  ;;  %4557 = vmatprep.subr.bf16.mxu0 %v6401_v43  ;;  %v6402_v27 = vld [vmem:[#allocation7 + $0x798] ss:$48 sps:$4 sm:$0xff]  }
 0x173   : > { %2354 = vmatprep.subr.bf16.mxu1 %v6323_v28  ;;  %v6410_v28 = vld [vmem:[#allocation7 + $0x7fc] ss:$48 sps:$4 sm:$0xff]   ;;  %v6438_v43 = vld [vmem:[#allocation7 + $0xe8] ss:$48 sps:$4 sm:$0xff]  }
 0x175   : > { %4558 = vmatpush1.bf16.msra.mxu0 %v6399_v46  ;;  %v6444_v46 = vld [vmem:[#allocation7 + $0x148] ss:$48 sps:$4 sm:$0xff]  }
 0x176   : > { %2355 = vmatpush1.bf16.msra.mxu1 %v6321_v32  ;;  %4559 = vmatprep.subr.bf16.mxu0 %v6407_v47  ;;  %v6408_v32 = vld [vmem:[#allocation7 + $0x7f8] ss:$48 sps:$4 sm:$0xff]   ;;  %v6452_v47 = vld [vmem:[#allocation7 + $0x1ac] ss:$48 sps:$4 sm:$0xff]  }
 0x177   : > { %2356 = vmatprep.subr.bf16.mxu1 %v6329_v33  ;;  %v6416_v33 = vld [vmem:[#allocation7 + $0x85c] ss:$48 sps:$4 sm:$0xff]  }
 0x179   : > { %4560 = vmatpush1.bf16.msra.mxu0 %v6405_v50 }
 0x17a   : > { %2357 = vmatpush1.bf16.msra.mxu1 %v6327_v36  ;;  %4561 = vmatprep.subr.bf16.mxu0 %v6413_v51  ;;  %v6420_v36 = vld [vmem:[#allocation7 + $0x8b8] ss:$48 sps:$4 sm:$0xff]   ;;  %v6458_v51 = vld [vmem:[#allocation7 + $0x20c] ss:$48 sps:$4 sm:$0xff]  }
 0x17b   : > { %2358 = vmatprep.subr.bf16.mxu1 %v6335_v37  ;;  %v6428_v37 = vld [vmem:[#allocation7 + $0x2c] ss:$48 sps:$4 sm:$0xff]  }
 0x17d   : > { %4562 = vmatpush1.bf16.msra.mxu0 %v6411_v54 }
 0x17e   : > { %2359 = vmatpush1.bf16.msra.mxu1 %v6333_v40  ;;  %4563 = vmatprep.subr.bf16.mxu0 %v6419_v55  ;;  %v6432_v40 = vld [vmem:[#allocation7 + $0x88] ss:$48 sps:$4 sm:$0xff]   ;;  %v6464_v55 = vld [vmem:[#allocation7 + $0x26c] ss:$48 sps:$4 sm:$0xff]  }
 0x17f   : > { %2360 = vmatprep.subr.bf16.mxu1 %v6341_v41  ;;  %v6440_v41 = vld [vmem:[#allocation7 + $0xec] ss:$48 sps:$4 sm:$0xff]  }
 0x181   : > { %4564 = vmatpush1.bf16.msra.mxu0 %v6417_v58 }
 0x182   : > { %2361 = vmatpush1.bf16.msra.mxu1 %v6339_v44  ;;  %4565 = vmatprep.subr.bf16.mxu0 %v6425_v60  ;;  %v6446_v44 = vld [vmem:[#allocation7 + $0x14c] ss:$48 sps:$4 sm:$0xff]   ;;  %v6462_v60 = vld [vmem:[#allocation7 + $0x268] ss:$48 sps:$4 sm:$0xff]  }
 0x183   : > { %2362 = vmatprep.subr.bf16.mxu1 %v6347_v45  ;;  %v7376_v45 = vshrl.u32 %v596_v42, 7  ;;  %v6497_v42 = vld [vmem:[#allocation7 + $0x5cc] ss:$48 sps:$4 sm:$0xff]  }
 0x185   : > { %4566 = vmatpush1.bf16.msra.mxu0 %v6423_v63  ;;  %v7381_v50 = vsub.s32 0, %v7376_v45 }
 0x186   : > { %2363 = vmatpush1.bf16.msra.mxu1 %v6345_v48  ;;  %4567 = vmatprep.subr.bf16.mxu0 %v6431_v0  ;;  %v6450_v48 = vld [vmem:[#allocation7 + $0x1a8] ss:$48 sps:$4 sm:$0xff]  }
 0x187   : > { %2364 = vmatprep.subr.bf16.mxu1 %v6353_v49  ;;  %v7378_v49 = vld [vmem:[#allocation9] sm:$0xff] }
 0x189   : > { %4568 = vmatpush1.bf16.msra.mxu0 %v6429_v4  ;;  %v6468_v4 = vld [vmem:[#allocation7 + $0x2c8] ss:$48 sps:$4 sm:$0xff]  }
 0x18a   : > { %2365 = vmatpush1.bf16.msra.mxu1 %v6351_v52  ;;  %4569 = vmatprep.subr.bf16.mxu0 %v6437_v5  ;;  %v599_v52 = vrot.slane %v7378_v49, %v7381_v50  ;;  %v6492_v5 = vld [vmem:[#allocation10 + $0x180] ss:$12 sps:$4 sm:$0xff]  }
 0x18b   : > { %2366 = vmatprep.subr.bf16.mxu1 %v6359_v53  ;;  %v6456_v53 = vld [vmem:[#allocation7 + $0x208] ss:$48 sps:$4 sm:$0xff]  }
 0x18d   : > { %4570 = vmatpush1.bf16.msra.mxu0 %v6435_v8  ;;  %v6473_v8 = vld [vmem:[#allocation7 + $0x32c] ss:$48 sps:$4 sm:$0xff]  }
 0x18e   : > { %2367 = vmatpush1.bf16.msra.mxu1 %v6357_v56  ;;  %4571 = vmatprep.subr.bf16.mxu0 %v6443_v9  ;;  %v6500_v9 = vld [vmem:[#allocation10 + $0x19c] ss:$12 sps:$4 sm:$0xff]  }
 0x18f   : > { %2368 = vmatprep.subr.bf16.mxu1 %v6365_v57 }
 0x191   : > { %4572 = vmatpush1.bf16.msra.mxu0 %v6441_v12  ;;  %v6476_v12 = vld [vmem:[#allocation7 + $0x38c] ss:$48 sps:$4 sm:$0xff]  }
 0x192   : > { %2369 = vmatpush1.bf16.msra.mxu1 %v6363_v61  ;;  %4573 = vmatprep.subr.bf16.mxu0 %v6449_v13  ;;  %v6506_v13 = vld [vmem:[#allocation10 + $0x1b4] ss:$12 sps:$4 sm:$0xff]  }
 0x193   : > { %2370 = vmatprep.subr.bf16.mxu1 %v6371_v62 }
 0x195   : > { %4574 = vmatpush1.bf16.msra.mxu0 %v6447_v16  ;;  %v6479_v16 = vld [vmem:[#allocation7 + $0x3ec] ss:$48 sps:$4 sm:$0xff]  }
 0x196   : > { %2371 = vmatpush1.bf16.msra.mxu1 %v6369_v2  ;;  %4575 = vmatprep.subr.bf16.mxu0 %v6455_v17  ;;  %v6470_v2 = vld [vmem:[#allocation7 + $0x2cc] ss:$48 sps:$4 sm:$0xff]   ;;  %v6512_v17 = vld [vmem:[#allocation10 + $0x1cc] ss:$12 sps:$4 sm:$0xff]  }
 0x197   : > { %2372 = vmatprep.subr.bf16.mxu1 %v6374_v3 }
 0x199   : > { %4576 = vmatpush1.bf16.msra.mxu0 %v6453_v20  ;;  %v6482_v20 = vld [vmem:[#allocation7 + $0x44c] ss:$48 sps:$4 sm:$0xff]  }
 0x19a   : > { %2373 = vmatpush1.bf16.msra.mxu1 %v6372_v6  ;;  %4577 = vmatprep.subr.bf16.mxu0 %v6461_v22  ;;  %v6518_v22 = vld [vmem:[#allocation10 + $0x1e4] ss:$12 sps:$4 sm:$0xff]  }
 0x19b   : > { %2383 = vmatprep.subr.bf16.mxu1 %v6380_v7 }
 0x19d   : > { %2375 = vmatmul.mubr.bf16.vlgmr.msra.gmra.mrb[8].mxu1 %v7352_v59  ;;  %4578 = vmatpush1.bf16.msra.mxu0 %v6459_v25 }
 0x19e   : > { %2384 = vmatpush1.bf16.msra.mxu1 %v6378_v10  ;;  %2415 = vmatprep.mubr.bf16.mxu1 %v7083_v1  ;;  %v6471_v10 = vld [vmem:[#allocation7 + $0x328] ss:$48 sps:$4 sm:$0xff]  }
 0x19f   : > { %2385 = vmatprep.subr.bf16.mxu1 %v6386_v11  ;;  %4579 = vmatprep.subr.bf16.mxu0 %v6467_v26  ;;  %v6498_v11 = vld [vmem:[#allocation10 + $0x198] ss:$12 sps:$4 sm:$0xff]  }
 0x1a1   : > { %4580 = vmatpush1.bf16.msra.mxu0 %v6465_v29  ;;  %v6524_v29 = vld [vmem:[#allocation10 + $0x1fc] ss:$12 sps:$4 sm:$0xff]  }
 0x1a2   : > { %2386 = vmatpush1.bf16.msra.mxu1 %v6384_v14  ;;  %4590 = vmatprep.subr.bf16.mxu0 %v6494_v30  ;;  %v6474_v14 = vld [vmem:[#allocation7 + $0x388] ss:$48 sps:$4 sm:$0xff]  }
 0x1a3   : > { %2387 = vmatprep.subr.bf16.mxu1 %v6392_v15  ;;  %v6504_v15 = vld [vmem:[#allocation10 + $0x1b0] ss:$12 sps:$4 sm:$0xff]  }
 0x1a4   : > { %v6483_v30 = vld [vmem:[#allocation7 + $0x4a8] ss:$48 sps:$4 sm:$0xff]  }
 0x1a6   : > { %2388 = vmatpush1.bf16.msra.mxu1 %v6390_v18  ;;  %v6477_v18 = vld [vmem:[#allocation7 + $0x3e8] ss:$48 sps:$4 sm:$0xff]  }
 0x1a7   : > { %2389 = vmatprep.subr.bf16.mxu1 %v6398_v19  ;;  %v6510_v19 = vld [vmem:[#allocation10 + $0x1c8] ss:$12 sps:$4 sm:$0xff]  }
 0x1aa   : > { %2390 = vmatpush1.bf16.msra.mxu1 %v6396_v23  ;;  %v6480_v23 = vld [vmem:[#allocation7 + $0x448] ss:$48 sps:$4 sm:$0xff]  }
 0x1ab   : > { %2391 = vmatprep.subr.bf16.mxu1 %v6404_v24  ;;  %v6516_v24 = vld [vmem:[#allocation10 + $0x1e0] ss:$12 sps:$4 sm:$0xff]  }
 0x1ae   : > { %2392 = vmatpush1.bf16.msra.mxu1 %v6402_v27  ;;  %v6485_v27 = vld [vmem:[#allocation7 + $0x4ac] ss:$48 sps:$4 sm:$0xff]  }
 0x1af   : > { %2393 = vmatprep.subr.bf16.mxu1 %v6410_v28 }
 0x1b2   : > { %2394 = vmatpush1.bf16.msra.mxu1 %v6408_v32 }
 0x1b3   : > { %2395 = vmatprep.subr.bf16.mxu1 %v6416_v33  ;;  %v6522_v33 = vld [vmem:[#allocation10 + $0x1f8] ss:$12 sps:$4 sm:$0xff]  }
 0x1b6   : > { %2396 = vmatpush1.bf16.msra.mxu1 %v6414_v34  ;;  %v6488_v34 = vld [vmem:[#allocation7 + $0x50c] ss:$48 sps:$4 sm:$0xff]  }
 0x1b7   : > { %2397 = vmatprep.subr.bf16.mxu1 %v6422_v35  ;;  %v6530_v35 = vld [vmem:[#allocation10 + $0x214] ss:$12 sps:$4 sm:$0xff]  }
 0x1ba   : > { %2398 = vmatpush1.bf16.msra.mxu1 %v6420_v36  ;;  %v6486_v36 = vld [vmem:[#allocation7 + $0x508] ss:$48 sps:$4 sm:$0xff]  }
 0x1bb   : > { %2506 = vmatprep.subr.bf16.mxu1 %v6428_v37  ;;  %v6528_v37 = vld [vmem:[#allocation10 + $0x210] ss:$12 sps:$4 sm:$0xff]  }
 0x1bd   : > { %2416 = vmatmul.mubr.bf16.vlgmr.msra.gmra.mrb[8].mxu1 %v7359_v31 }
 0x1be   : > { %2507 = vmatpush1.bf16.msra.mxu1 %v6426_v38  ;;  %2538 = vmatprep.mubr.bf16.mxu1 %v7347_v21  ;;  %v7384_v21 = vsub.s32 1, %v7376_v45  ;;  %v6491_v38 = vld [vmem:[#allocation7 + $0x56c] ss:$48 sps:$4 sm:$0xff]  }
 0x1bf   : > { %2508 = vmatprep.subr.bf16.mxu1 %v6434_v39  ;;  %v6536_v39 = vld [vmem:[#allocation10 + $0x22c] ss:$12 sps:$4 sm:$0xff]  }
 0x1c0   : > { %v603_v54 = vrot.slane %v7378_v49, %v7384_v21 }
 0x1c2   : > { %2509 = vmatpush1.bf16.msra.mxu1 %v6432_v40  ;;  %v6489_v40 = vld [vmem:[#allocation7 + $0x568] ss:$48 sps:$4 sm:$0xff]  }
 0x1c3   : > { %2510 = vmatprep.subr.bf16.mxu1 %v6440_v41  ;;  %v6534_v41 = vld [vmem:[#allocation10 + $0x228] ss:$12 sps:$4 sm:$0xff]  }
 0x1c6   : > { %2511 = vmatpush1.bf16.msra.mxu1 %v6438_v43  ;;  %v6542_v43 = vld [vmem:[#allocation10 + $0x244] ss:$12 sps:$4 sm:$0xff]  }
 0x1c7   : > { %2512 = vmatprep.subr.bf16.mxu1 %v6446_v44  ;;  %v6495_v44 = vld [vmem:[#allocation7 + $0x5c8] ss:$48 sps:$4 sm:$0xff]  }
 0x1ca   : > { %2513 = vmatpush1.bf16.msra.mxu1 %v6444_v46  ;;  %v6503_v46 = vld [vmem:[#allocation7 + $0x62c] ss:$48 sps:$4 sm:$0xff]  }
 0x1cb   : > { %2514 = vmatprep.subr.bf16.mxu1 %v6452_v47  ;;  %v6540_v47 = vld [vmem:[#allocation10 + $0x240] ss:$12 sps:$4 sm:$0xff]  }
 0x1ce   : > { %2515 = vmatpush1.bf16.msra.mxu1 %v6450_v48  ;;  %v6548_v48 = vld [vmem:[#allocation10 + $0x25c] ss:$12 sps:$4 sm:$0xff]  }
 0x1cf   : > { %2516 = vmatprep.subr.bf16.mxu1 %v6458_v51  ;;  %v6501_v51 = vld [vmem:[#allocation7 + $0x628] ss:$48 sps:$4 sm:$0xff]  }
 0x1d0   : > { %v2171_v56 = vpop.f32.mrb[0].mxu1 }
 0x1d1   : > { %v5885_v57 = vadd.f32 %v2171_v56, %v599_v52  ;;  %v2173_v58 = vpop.f32.mrb[1].mxu1  ;;  %v6509_v52 = vld [vmem:[#allocation7 + $0x68c] ss:$48 sps:$4 sm:$0xff]  }
 0x1d2   : > { %v5886_v61 = vadd.f32 %v2173_v58, %v603_v54  ;;  %v2175_v62 = vpop.f32.mrb[2].mxu1  ;;  %2517 = vmatpush1.bf16.msra.mxu1 %v6456_v53  ;;  %v6546_v53 = vld [vmem:[#allocation10 + $0x258] ss:$12 sps:$4 sm:$0xff]   ;;  %v6553_v54 = vld [vmem:[#allocation10 + $0x274] ss:$12 sps:$4 sm:$0xff]  }
 0x1d3   : > { %v2588_v63 = vmax.f32 %v5885_v57, 0.0  ;;  %v2176_v0 = vpop.f32.mrb[3].mxu1  ;;  %2518 = vmatprep.subr.bf16.mxu1 %v6464_v55  ;;  %v6507_v55 = vld [vmem:[#allocation7 + $0x688] ss:$48 sps:$4 sm:$0xff]   ;;  %v6515_v56 = vld [vmem:[#allocation7 + $0x6ec] ss:$48 sps:$4 sm:$0xff]  }
 0x1d4   : > { %v2589_v3 = vmax.f32 %v5886_v61, 0.0  ;;  %v6551_v57 = vld [vmem:[#allocation10 + $0x270] ss:$12 sps:$4 sm:$0xff]   ;;  %v6558_v58 = vld [vmem:[#allocation10 + $0x28c] ss:$12 sps:$4 sm:$0xff]  }
 0x1d5   : > { %v7392_v7 = vpack.c.bf16 %v2588_v63, %v2588_v63  ;;  %v6521_v61 = vld [vmem:[#allocation7 + $0x74c] ss:$48 sps:$4 sm:$0xff]   ;;  %v6556_v62 = vld [vmem:[#allocation10 + $0x288] ss:$12 sps:$4 sm:$0xff]   ;;  %v6519_v0 = vld [vmem:[#allocation7 + $0x748] ss:$48 sps:$4 sm:$0xff]  }
 0x1d6   : > { %v7390_v6 = vpack.c.bf16 %v2589_v3, %v2589_v3  ;;  %2519 = vmatpush1.bf16.msra.mxu1 %v6462_v60  ;;  %v6513_v60 = vld [vmem:[#allocation7 + $0x6e8] ss:$48 sps:$4 sm:$0xff]   ;;  %v6563_v63 = vld [vmem:[#allocation10 + $0x2a4] ss:$12 sps:$4 sm:$0xff]  }
 0x1d7   : > { %2520 = vmatprep.subr.bf16.mxu1 %v6470_v2  ;;  %v7396_v25 = vpop.f32.mrb[0].mxu0  ;;  %v6568_v2 = vld [vmem:[#allocation10 + $0x2bc] ss:$12 sps:$4 sm:$0xff]  }
 0x1d8   : > { %4581 = vmatprep.mubr.bf16.mxu0 %v7390_v6  ;;  %v7398_v26 = vpop.f32.mrb[1].mxu0  ;;  %v6525_v3 = vld [vmem:[#allocation7 + $0x7a8] ss:$48 sps:$4 sm:$0xff]  }
 0x1d9   : > { %4582 = vmatmul.mubr.bf16.vlgmr.msra.gmra.mrb[8].mxu0 %v7392_v7  ;;  %v2339_v28 = vpop.f32.mrb[2].mxu0 }
 0x1da   : > { %2521 = vmatpush1.bf16.msra.mxu1 %v6468_v4  ;;  %4591 = vmatpush1.bf16.msra.mxu0 %v6492_v5  ;;  %v2340_v32 = vpop.f32.mrb[3].mxu0  ;;  %v6533_v4 = vld [vmem:[#allocation7 + $0x80c] ss:$48 sps:$4 sm:$0xff]   ;;  %v6566_v5 = vld [vmem:[#allocation10 + $0x2b8] ss:$12 sps:$4 sm:$0xff]  }
 0x1db   : > { %2522 = vmatprep.subr.bf16.mxu1 %v6473_v8  ;;  %4592 = vmatprep.subr.bf16.mxu0 %v6500_v9  ;;  %v6531_v8 = vld [vmem:[#allocation7 + $0x808] ss:$48 sps:$4 sm:$0xff]   ;;  %v6573_v9 = vld [vmem:[#allocation10 + $0x2d4] ss:$12 sps:$4 sm:$0xff]   ;;  %v7406_v32 = vsub.s32 2, %v7376_v45 }
 0x1dc   : > { %v6565_v28 = vld [vmem:[#allocation10 + $0x50] ss:$12 sps:$4 sm:$0xff]  }
 0x1de   : > { %2523 = vmatpush1.bf16.msra.mxu1 %v6471_v10  ;;  %4593 = vmatpush1.bf16.msra.mxu0 %v6498_v11  ;;  %v6539_v10 = vld [vmem:[#allocation7 + $0x86c] ss:$48 sps:$4 sm:$0xff]  }
 0x1df   : > { %2524 = vmatprep.subr.bf16.mxu1 %v6476_v12  ;;  %4594 = vmatprep.subr.bf16.mxu0 %v6506_v13  ;;  %v6571_v11 = vld [vmem:[#allocation10 + $0x2d0] ss:$12 sps:$4 sm:$0xff]   ;;  %v6578_v13 = vld [vmem:[#allocation10 + $0x2ec] ss:$12 sps:$4 sm:$0xff]  }
 0x1e0   : > { %v6537_v12 = vld [vmem:[#allocation7 + $0x868] ss:$48 sps:$4 sm:$0xff]  }
 0x1e2   : > { %2525 = vmatpush1.bf16.msra.mxu1 %v6474_v14  ;;  %4595 = vmatpush1.bf16.msra.mxu0 %v6504_v15  ;;  %v6545_v14 = vld [vmem:[#allocation7 + $0x8cc] ss:$48 sps:$4 sm:$0xff]   ;;  %v6576_v15 = vld [vmem:[#allocation10 + $0x2e8] ss:$12 sps:$4 sm:$0xff]  }
 0x1e3   : > { %2526 = vmatprep.subr.bf16.mxu1 %v6479_v16  ;;  %4596 = vmatprep.subr.bf16.mxu0 %v6512_v17  ;;  %v6583_v16 = vld [vmem:[#allocation10 + $0x304] ss:$12 sps:$4 sm:$0xff]   ;;  %v6543_v17 = vld [vmem:[#allocation7 + $0x8c8] ss:$48 sps:$4 sm:$0xff]  }
 0x1e6   : > { %2527 = vmatpush1.bf16.msra.mxu1 %v6477_v18  ;;  %4597 = vmatpush1.bf16.msra.mxu0 %v6510_v19  ;;  %v6549_v18 = vld [vmem:[#allocation10 + $0xc8] ss:$12 sps:$4 sm:$0xff]  }
 0x1e7   : > { %2528 = vmatprep.subr.bf16.mxu1 %v6482_v20  ;;  %4598 = vmatprep.subr.bf16.mxu0 %v6518_v22  ;;  %v6550_v19 = vld [vmem:[#allocation10 + $0x8] ss:$12 sps:$4 sm:$0xff]   ;;  %v6554_v20 = vld [vmem:[#allocation10 + $0xe0] ss:$12 sps:$4 sm:$0xff]  }
 0x1e8   : > { %v6555_v22 = vld [vmem:[#allocation10 + $0x20] ss:$12 sps:$4 sm:$0xff]  }
 0x1ea   : > { %2529 = vmatpush1.bf16.msra.mxu1 %v6480_v23  ;;  %4599 = vmatpush1.bf16.msra.mxu0 %v6516_v24  ;;  %v6559_v23 = vld [vmem:[#allocation10 + $0xf8] ss:$12 sps:$4 sm:$0xff]  }
 0x1eb   : > { %2530 = vmatprep.subr.bf16.mxu1 %v6485_v27  ;;  %4600 = vmatprep.subr.bf16.mxu0 %v6524_v29  ;;  %v6560_v24 = vld [vmem:[#allocation10 + $0x38] ss:$12 sps:$4 sm:$0xff]   ;;  %v6564_v27 = vld [vmem:[#allocation10 + $0x110] ss:$12 sps:$4 sm:$0xff]   ;;  %v6569_v29 = vld [vmem:[#allocation10 + $0x128] ss:$12 sps:$4 sm:$0xff]  }
 0x1ee   : > { %2531 = vmatpush1.bf16.msra.mxu1 %v6483_v30  ;;  %4601 = vmatpush1.bf16.msra.mxu0 %v6522_v33  ;;  %v618_v30 = vsub.s32 5, %v7376_v45  ;;  %v6574_v33 = vld [vmem:[#allocation10 + $0x140] ss:$12 sps:$4 sm:$0xff]  }
 0x1ef   : > { %2532 = vmatprep.subr.bf16.mxu1 %v6488_v34  ;;  %4602 = vmatprep.subr.bf16.mxu0 %v6530_v35  ;;  %v607_v35 = vrot.slane %v7378_v49, %v7406_v32 }
 0x1f0   : > { %v619_v34 = vrot.slane %v7378_v49, %v618_v30  ;;  %v6623_v30 = vld [vmem:[#allocation10 + $0x3c4] ss:$12 sps:$4 sm:$0xff]  }
 0x1f2   : > { %2533 = vmatpush1.bf16.msra.mxu1 %v6486_v36  ;;  %4603 = vmatpush1.bf16.msra.mxu0 %v6528_v37  ;;  %v6575_v37 = vld [vmem:[#allocation10 + $0x80] ss:$12 sps:$4 sm:$0xff]  }
 0x1f3   : > { %2534 = vmatprep.subr.bf16.mxu1 %v6491_v38  ;;  %4604 = vmatprep.subr.bf16.mxu0 %v6536_v39  ;;  %v6579_v38 = vld [vmem:[#allocation10 + $0x158] ss:$12 sps:$4 sm:$0xff]   ;;  %v5890_v39 = vadd.f32 %v7398_v26, %v619_v34  ;;  %v6585_v26 = vld [vmem:[#allocation10 + $0xb0] ss:$12 sps:$4 sm:$0xff]  }
 0x1f4   : > { %v6625_v34 = vld [vmem:[#allocation10 + $0x230] ss:$12 sps:$4 sm:$0xff]  }
 0x1f6   : > { %2535 = vmatpush1.bf16.msra.mxu1 %v6489_v40  ;;  %4605 = vmatpush1.bf16.msra.mxu0 %v6534_v41 }
 0x1f7   : > { %2536 = vmatprep.subr.bf16.mxu1 %v6497_v42  ;;  %4606 = vmatprep.subr.bf16.mxu0 %v6542_v43 }
 0x1fa   : > { %2537 = vmatpush1.bf16.msra.mxu1 %v6495_v44  ;;  %4607 = vmatpush1.bf16.msra.mxu0 %v6540_v47 }
 0x1fb   : > { %2547 = vmatprep.subr.bf16.mxu1 %v6503_v46  ;;  %4608 = vmatprep.subr.bf16.mxu0 %v6548_v48  ;;  %v6580_v46 = vld [vmem:[#allocation10 + $0x98] ss:$12 sps:$4 sm:$0xff]  }
 0x1fd   : > { %2539 = vmatmul.mubr.bf16.vlgmr.msra.gmra.mrb[12].mxu1 %v7352_v59  ;;  %v6527_v59 = vld [vmem:[#allocation7 + $0x7ac] ss:$48 sps:$4 sm:$0xff]  }
 0x1fe   : > { %2548 = vmatpush1.bf16.msra.mxu1 %v6501_v51  ;;  %2579 = vmatprep.mubr.bf16.mxu1 %v7083_v1  ;;  %v6561_v1 = vld [vmem:[#allocation10 + $0x2a0] ss:$12 sps:$4 sm:$0xff]   ;;  %v6584_v51 = vld [vmem:[#allocation10 + $0x170] ss:$12 sps:$4 sm:$0xff]  }
 0x1ff   : > { %2549 = vmatprep.subr.bf16.mxu1 %v6509_v52  ;;  %4609 = vmatpush1.bf16.msra.mxu0 %v6546_v53  ;;  %v2593_v52 = vmax.f32 %v5890_v39, 0.0  ;;  %v6633_v39 = vld [vmem:[#allocation10 + $0x3f4] ss:$12 sps:$4 sm:$0xff]  }
 0x200   : > { %4610 = vmatprep.subr.bf16.mxu0 %v6553_v54 }
 0x202   : > { %2550 = vmatpush1.bf16.msra.mxu1 %v6507_v55  ;;  %v6581_v55 = vld [vmem:[#allocation10 + $0x300] ss:$12 sps:$4 sm:$0xff]  }
 0x203   : > { %2551 = vmatprep.subr.bf16.mxu1 %v6515_v56  ;;  %4611 = vmatpush1.bf16.msra.mxu0 %v6551_v57  ;;  %v6588_v57 = vld [vmem:[#allocation10 + $0x31c] ss:$12 sps:$4 sm:$0xff]  }
 0x204   : > { %4612 = vmatprep.subr.bf16.mxu0 %v6558_v58  ;;  %v7418_v58 = vpack.c.bf16 %v2593_v52, %v2593_v52  ;;  %v6641_v52 = vld [vmem:[#allocation10 + $0x420] ss:$12 sps:$4 sm:$0xff]  }
 0x206   : > { %2552 = vmatpush1.bf16.msra.mxu1 %v6513_v60  ;;  %v6589_v60 = vld [vmem:[#allocation10 + $0x248] ss:$12 sps:$4 sm:$0xff]  }
 0x207   : > { %2553 = vmatprep.subr.bf16.mxu1 %v6521_v61  ;;  %4613 = vmatpush1.bf16.msra.mxu0 %v6556_v62  ;;  %v6586_v61 = vld [vmem:[#allocation10 + $0x318] ss:$12 sps:$4 sm:$0xff]   ;;  %v6590_v62 = vld [vmem:[#allocation10 + $0x188] ss:$12 sps:$4 sm:$0xff]  }
 0x208   : > { %4614 = vmatprep.subr.bf16.mxu0 %v6563_v63  ;;  %v6593_v63 = vld [vmem:[#allocation10 + $0x334] ss:$12 sps:$4 sm:$0xff]  }
 0x20a   : > { %2554 = vmatpush1.bf16.msra.mxu1 %v6519_v0  ;;  %v6594_v0 = vld [vmem:[#allocation10 + $0x260] ss:$12 sps:$4 sm:$0xff]  }
 0x20b   : > { %2555 = vmatprep.subr.bf16.mxu1 %v6527_v59  ;;  %4615 = vmatpush1.bf16.msra.mxu0 %v6561_v1  ;;  %v6591_v59 = vld [vmem:[#allocation10 + $0x330] ss:$12 sps:$4 sm:$0xff]   ;;  %v6595_v1 = vld [vmem:[#allocation10 + $0x1a0] ss:$12 sps:$4 sm:$0xff]  }
 0x20c   : > { %4616 = vmatprep.subr.bf16.mxu0 %v6568_v2  ;;  %v6598_v2 = vld [vmem:[#allocation10 + $0x34c] ss:$12 sps:$4 sm:$0xff]  }
 0x20e   : > { %2556 = vmatpush1.bf16.msra.mxu1 %v6525_v3  ;;  %v6599_v3 = vld [vmem:[#allocation10 + $0x278] ss:$12 sps:$4 sm:$0xff]  }
 0x20f   : > { %2557 = vmatprep.subr.bf16.mxu1 %v6533_v4  ;;  %4617 = vmatpush1.bf16.msra.mxu0 %v6566_v5  ;;  %v6596_v4 = vld [vmem:[#allocation10 + $0x348] ss:$12 sps:$4 sm:$0xff]   ;;  %v6600_v5 = vld [vmem:[#allocation10 + $0x1b8] ss:$12 sps:$4 sm:$0xff]  }
 0x210   : > { %4618 = vmatprep.subr.bf16.mxu0 %v6573_v9  ;;  %v6604_v9 = vld [vmem:[#allocation10 + $0x290] ss:$12 sps:$4 sm:$0xff]  }
 0x212   : > { %2558 = vmatpush1.bf16.msra.mxu1 %v6531_v8  ;;  %v6603_v8 = vld [vmem:[#allocation10 + $0x364] ss:$12 sps:$4 sm:$0xff]  }
 0x213   : > { %2559 = vmatprep.subr.bf16.mxu1 %v6539_v10  ;;  %4619 = vmatpush1.bf16.msra.mxu0 %v6571_v11 }
 0x214   : > { %4620 = vmatprep.subr.bf16.mxu0 %v6578_v13  ;;  %v6608_v13 = vld [vmem:[#allocation10 + $0x37c] ss:$12 sps:$4 sm:$0xff]  }
 0x216   : > { %2560 = vmatpush1.bf16.msra.mxu1 %v6537_v12  ;;  %v6605_v12 = vld [vmem:[#allocation10 + $0x1d0] ss:$12 sps:$4 sm:$0xff]  }
 0x217   : > { %2561 = vmatprep.subr.bf16.mxu1 %v6545_v14  ;;  %4621 = vmatpush1.bf16.msra.mxu0 %v6576_v15  ;;  %v6609_v15 = vld [vmem:[#allocation10 + $0x2a8] ss:$12 sps:$4 sm:$0xff]  }
 0x218   : > { %4631 = vmatprep.subr.bf16.mxu0 %v6583_v16 }
 0x21a   : > { %2562 = vmatpush1.bf16.msra.mxu1 %v6543_v17  ;;  %v6606_v17 = vld [vmem:[#allocation10 + $0x378] ss:$12 sps:$4 sm:$0xff]  }
 0x21b   : > { %5753 = vmatprep.subr.bf16.mxu1 %v6549_v18  ;;  %v6610_v18 = vld [vmem:[#allocation10 + $0x1e8] ss:$12 sps:$4 sm:$0xff]  }
 0x21d   : > { %2580 = vmatmul.mubr.bf16.vlgmr.msra.gmra.mrb[12].mxu1 %v7359_v31  ;;  %v6570_v31 = vld [vmem:[#allocation10 + $0x68] ss:$12 sps:$4 sm:$0xff]  }
 0x21e   : > { %5754 = vmatpush3.bf16.msra.mxu1 %v6550_v19  ;;  %4827 = vmatprep.mubr.bf16.mxu1 %v7390_v6  ;;  %v610_v6 = vsub.s32 3, %v7376_v45  ;;  %v6613_v19 = vld [vmem:[#allocation10 + $0x394] ss:$12 sps:$4 sm:$0xff]  }
 0x21f   : > { %5755 = vmatprep.subr.bf16.mxu1 %v6554_v20  ;;  %v6614_v20 = vld [vmem:[#allocation10 + $0x2c0] ss:$12 sps:$4 sm:$0xff]  }
 0x220   : > { %v611_v36 = vrot.slane %v7378_v49, %v610_v6 }
 0x222   : > { %5756 = vmatpush3.bf16.msra.mxu1 %v6555_v22  ;;  %v6611_v22 = vld [vmem:[#allocation10 + $0x390] ss:$12 sps:$4 sm:$0xff]  }
 0x223   : > { %5757 = vmatprep.subr.bf16.mxu1 %v6559_v23  ;;  %v6615_v23 = vld [vmem:[#allocation10 + $0x200] ss:$12 sps:$4 sm:$0xff]  }
 0x226   : > { %5758 = vmatpush3.bf16.msra.mxu1 %v6560_v24  ;;  %v6618_v24 = vld [vmem:[#allocation10 + $0x3ac] ss:$12 sps:$4 sm:$0xff]  }
 0x227   : > { %5759 = vmatprep.subr.bf16.mxu1 %v6564_v27  ;;  %v6619_v27 = vld [vmem:[#allocation10 + $0x2d8] ss:$12 sps:$4 sm:$0xff]  }
 0x22a   : > { %5760 = vmatpush3.bf16.msra.mxu1 %v6565_v28  ;;  %v6616_v28 = vld [vmem:[#allocation10 + $0x3a8] ss:$12 sps:$4 sm:$0xff]  }
 0x22b   : > { %5761 = vmatprep.subr.bf16.mxu1 %v6569_v29  ;;  %v6620_v29 = vld [vmem:[#allocation10 + $0x218] ss:$12 sps:$4 sm:$0xff]  }
 0x22e   : > { %5762 = vmatpush3.bf16.msra.mxu1 %v6570_v31  ;;  %v6624_v31 = vld [vmem:[#allocation10 + $0x2f0] ss:$12 sps:$4 sm:$0xff]  }
 0x22f   : > { %5763 = vmatprep.subr.bf16.mxu1 %v6574_v33  ;;  %v6621_v33 = vld [vmem:[#allocation10 + $0x3c0] ss:$12 sps:$4 sm:$0xff]  }
 0x230   : > { %v2253_v40 = vpop.f32.mrb[4].mxu1 }
 0x231   : > { %v5887_v41 = vadd.f32 %v2253_v40, %v607_v35  ;;  %v2255_v42 = vpop.f32.mrb[5].mxu1  ;;  %v6628_v35 = vld [vmem:[#allocation10 + $0x3dc] ss:$12 sps:$4 sm:$0xff]   ;;  %v6634_v40 = vld [vmem:[#allocation10 + $0x3e0] ss:$12 sps:$4 sm:$0xff]  }
 0x232   : > { %v5888_v43 = vadd.f32 %v2255_v42, %v611_v36  ;;  %v2257_v44 = vpop.f32.mrb[6].mxu1  ;;  %5764 = vmatpush3.bf16.msra.mxu1 %v6575_v37  ;;  %v6629_v36 = vld [vmem:[#allocation10 + $0x3c8] ss:$12 sps:$4 sm:$0xff]   ;;  %v6626_v37 = vld [vmem:[#allocation10 + $0x3d8] ss:$12 sps:$4 sm:$0xff]  }
 0x233   : > { %v2590_v47 = vmax.f32 %v5887_v41, 0.0  ;;  %v2258_v48 = vpop.f32.mrb[7].mxu1  ;;  %5765 = vmatprep.subr.bf16.mxu1 %v6579_v38  ;;  %v6630_v38 = vld [vmem:[#allocation10 + $0x308] ss:$12 sps:$4 sm:$0xff]   ;;  %v6631_v41 = vld [vmem:[#allocation10 + $0x3f0] ss:$12 sps:$4 sm:$0xff]  }
 0x234   : > { %v2591_v53 = vmax.f32 %v5888_v43, 0.0  ;;  %v6635_v42 = vld [vmem:[#allocation10 + $0x320] ss:$12 sps:$4 sm:$0xff]   ;;  %v6639_v44 = vld [vmem:[#allocation10 + $0x3f8] ss:$12 sps:$4 sm:$0xff]  }
 0x235   : > { %v7416_v56 = vpack.c.bf16 %v2590_v47, %v2590_v47  ;;  %v6638_v43 = vld [vmem:[#allocation10 + $0x40c] ss:$12 sps:$4 sm:$0xff]   ;;  %v6643_v48 = vld [vmem:[#allocation10 + $0x424] ss:$12 sps:$4 sm:$0xff]  }
 0x236   : > { %v2603_v54 = vpack.c.bf16 %v2591_v53, %v2591_v53  ;;  %5766 = vmatpush3.bf16.msra.mxu1 %v6580_v46  ;;  %v6636_v46 = vld [vmem:[#allocation10 + $0x408] ss:$12 sps:$4 sm:$0xff]   ;;  %v6640_v47 = vld [vmem:[#allocation10 + $0x338] ss:$12 sps:$4 sm:$0xff]   ;;  %v614_v53 = vsub.s32 4, %v7376_v45 }
 0x237   : > { %5767 = vmatprep.subr.bf16.mxu1 %v6584_v51  ;;  %v7423_v10 = vpop.f32.mrb[4].mxu0  ;;  %v6644_v51 = vld [vmem:[#allocation10 + $0x410] ss:$12 sps:$4 sm:$0xff]  }
 0x238   : > { %4622 = vmatprep.mubr.bf16.mxu0 %v2603_v54  ;;  %v7425_v11 = vpop.f32.mrb[5].mxu0 }
 0x239   : > { %4623 = vmatmul.mubr.bf16.vlgmr.msra.gmra.mrb[8].mxu0 %v7416_v56  ;;  %v2503_v14 = vpop.f32.mrb[6].mxu0 }
 0x23a   : > { %4632 = vmatpush1.bf16.msra.mxu0 %v6581_v55  ;;  %4663 = vmatprep.mubr.bf16.mxu0 %v7418_v58  ;;  %v2504_v16 = vpop.f32.mrb[7].mxu0  ;;  %v6648_v55 = vld [vmem:[#allocation10 + $0x43c] ss:$12 sps:$4 sm:$0xff]  }
 0x23b   : > { %5768 = vmatpush3.bf16.msra.mxu1 %v6585_v26  ;;  %4633 = vmatprep.subr.bf16.mxu0 %v6588_v57  ;;  %v6646_v26 = vld [vmem:[#allocation10 + $0x438] ss:$12 sps:$4 sm:$0xff]   ;;  %v615_v57 = vrot.slane %v7378_v49, %v614_v53  ;;  %v6670_v14 = vld [vmem:[#allocation10 + $0x488] ss:$12 sps:$4 sm:$0xff]   ;;  %v6674_v16 = vld [vmem:[#allocation10 + $0x560] ss:$12 sps:$4 sm:$0xff]  }
 0x23c   : > { %5775 = vmatprep.subr.bf16.mxu1 %v6589_v60  ;;  %v6653_v60 = vld [vmem:[#allocation10 + $0x454] ss:$12 sps:$4 sm:$0xff]   ;;  %v6660_v49 = vld [vmem:[#allocation10 + $0x398] ss:$12 sps:$4 sm:$0xff]  }
 0x23e   : > { %4634 = vmatpush1.bf16.msra.mxu0 %v6586_v61  ;;  %4828 = vmatmul.mubr.bf16.vlgmr.msra.gmra.mrb[16].mxu1 %v7392_v7  ;;  %v6601_v7 = vld [vmem:[#allocation10 + $0x360] ss:$12 sps:$4 sm:$0xff]  }
 0x23f   : > { %5776 = vmatpush3.bf16.msra.mxu1 %v6590_v62  ;;  %4867 = vmatprep.mubr.bf16.mxu1 %v2603_v54  ;;  %v6645_v54 = vld [vmem:[#allocation10 + $0x350] ss:$12 sps:$4 sm:$0xff]   ;;  %v6654_v61 = vld [vmem:[#allocation10 + $0x440] ss:$12 sps:$4 sm:$0xff]  }
 0x240   : > { %4635 = vmatprep.subr.bf16.mxu0 %v6593_v63  ;;  %5777 = vmatprep.subr.bf16.mxu1 %v6594_v0  ;;  %v6651_v62 = vld [vmem:[#allocation10 + $0x450] ss:$12 sps:$4 sm:$0xff]   ;;  %v5889_v63 = vadd.f32 %v7396_v25, %v615_v57  ;;  %v6655_v0 = vld [vmem:[#allocation10 + $0x380] ss:$12 sps:$4 sm:$0xff]  }
 0x241   : > { %v6665_v25 = vld [vmem:[#allocation10 + $0x3b0] ss:$12 sps:$4 sm:$0xff]  }
 0x242   : > { %4636 = vmatpush1.bf16.msra.mxu0 %v6591_v59  ;;  %v6658_v59 = vld [vmem:[#allocation10 + $0x46c] ss:$12 sps:$4 sm:$0xff]   ;;  %v6703_v57 = vld [vmem:[#allocation10 + $0x544] ss:$12 sps:$4 sm:$0xff]  }
 0x243   : > { %5778 = vmatpush3.bf16.msra.mxu1 %v6595_v1  ;;  %4637 = vmatprep.subr.bf16.mxu0 %v6598_v2  ;;  %v6659_v1 = vld [vmem:[#allocation10 + $0x458] ss:$12 sps:$4 sm:$0xff]   ;;  %v6656_v2 = vld [vmem:[#allocation10 + $0x468] ss:$12 sps:$4 sm:$0xff]  }
 0x244   : > { %5779 = vmatprep.subr.bf16.mxu1 %v6599_v3  ;;  %v2592_v3 = vmax.f32 %v5889_v63, 0.0 }
 0x246   : > { %4638 = vmatpush1.bf16.msra.mxu0 %v6596_v4  ;;  %v6663_v4 = vld [vmem:[#allocation10 + $0x484] ss:$12 sps:$4 sm:$0xff]  }
 0x247   : > { %5780 = vmatpush3.bf16.msra.mxu1 %v6600_v5  ;;  %4639 = vmatprep.subr.bf16.mxu0 %v6603_v8  ;;  %v6664_v5 = vld [vmem:[#allocation10 + $0x470] ss:$12 sps:$4 sm:$0xff]   ;;  %v6661_v8 = vld [vmem:[#allocation10 + $0x480] ss:$12 sps:$4 sm:$0xff]  }
 0x248   : > { %5781 = vmatprep.subr.bf16.mxu1 %v6604_v9  ;;  %v2604_v9 = vpack.c.bf16 %v2592_v3, %v2592_v3  ;;  %v6709_v3 = vld [vmem:[#allocation10 + $0x6c8] ss:$12 sps:$4 sm:$0xff]  }
 0x24a   : > { %4640 = vmatpush1.bf16.msra.mxu0 %v6601_v7  ;;  %v6668_v7 = vld [vmem:[#allocation10 + $0x49c] ss:$12 sps:$4 sm:$0xff]  }
 0x24b   : > { %5782 = vmatpush3.bf16.msra.mxu1 %v6605_v12  ;;  %4641 = vmatprep.subr.bf16.mxu0 %v6608_v13  ;;  %v6669_v12 = vld [vmem:[#allocation10 + $0x548] ss:$12 sps:$4 sm:$0xff]   ;;  %v6666_v13 = vld [vmem:[#allocation10 + $0x498] ss:$12 sps:$4 sm:$0xff]  }
 0x24c   : > { %5783 = vmatprep.subr.bf16.mxu1 %v6609_v15  ;;  %v6673_v15 = vld [vmem:[#allocation10 + $0x4b4] ss:$12 sps:$4 sm:$0xff]  }
 0x24e   : > { %4642 = vmatpush1.bf16.msra.mxu0 %v6606_v17  ;;  %v6671_v17 = vld [vmem:[#allocation10 + $0x4b0] ss:$12 sps:$4 sm:$0xff]  }
 0x24f   : > { %5784 = vmatpush3.bf16.msra.mxu1 %v6610_v18  ;;  %4643 = vmatprep.subr.bf16.mxu0 %v6613_v19  ;;  %v6675_v18 = vld [vmem:[#allocation10 + $0x4a0] ss:$12 sps:$4 sm:$0xff]  }
 0x250   : > { %5785 = vmatprep.subr.bf16.mxu1 %v6614_v20  ;;  %v6678_v19 = vld [vmem:[#allocation10 + $0x4cc] ss:$12 sps:$4 sm:$0xff]  }
 0x251   : > { %v6679_v20 = vld [vmem:[#allocation10 + $0x578] ss:$12 sps:$4 sm:$0xff]  }
 0x252   : > { %4644 = vmatpush1.bf16.msra.mxu0 %v6611_v22  ;;  %v6676_v22 = vld [vmem:[#allocation10 + $0x4c8] ss:$12 sps:$4 sm:$0xff]  }
 0x253   : > { %5786 = vmatpush3.bf16.msra.mxu1 %v6615_v23  ;;  %4645 = vmatprep.subr.bf16.mxu0 %v6618_v24  ;;  %v6680_v23 = vld [vmem:[#allocation10 + $0x4b8] ss:$12 sps:$4 sm:$0xff]  }
 0x254   : > { %5787 = vmatprep.subr.bf16.mxu1 %v6619_v27  ;;  %v6683_v24 = vld [vmem:[#allocation10 + $0x4e4] ss:$12 sps:$4 sm:$0xff]  }
 0x255   : > { %v6684_v27 = vld [vmem:[#allocation10 + $0x590] ss:$12 sps:$4 sm:$0xff]  }
 0x256   : > { %4646 = vmatpush1.bf16.msra.mxu0 %v6616_v28  ;;  %v6681_v28 = vld [vmem:[#allocation10 + $0x4e0] ss:$12 sps:$4 sm:$0xff]  }
 0x257   : > { %5788 = vmatpush3.bf16.msra.mxu1 %v6620_v29  ;;  %4647 = vmatprep.subr.bf16.mxu0 %v6623_v30  ;;  %v6685_v29 = vld [vmem:[#allocation10 + $0x4d0] ss:$12 sps:$4 sm:$0xff]  }
 0x258   : > { %5789 = vmatprep.subr.bf16.mxu1 %v6624_v31  ;;  %v6688_v30 = vld [vmem:[#allocation10 + $0x4fc] ss:$12 sps:$4 sm:$0xff]  }
 0x259   : > { %v6689_v31 = vld [vmem:[#allocation10 + $0x5a8] ss:$12 sps:$4 sm:$0xff]  }
 0x25a   : > { %4648 = vmatpush1.bf16.msra.mxu0 %v6621_v33  ;;  %v6686_v33 = vld [vmem:[#allocation10 + $0x4f8] ss:$12 sps:$4 sm:$0xff]  }
 0x25b   : > { %5790 = vmatpush3.bf16.msra.mxu1 %v6625_v34  ;;  %4649 = vmatprep.subr.bf16.mxu0 %v6628_v35  ;;  %v626_v34 = vsub.s32 7, %v7376_v45  ;;  %v6690_v35 = vld [vmem:[#allocation10 + $0x4e8] ss:$12 sps:$4 sm:$0xff]  }
 0x25c   : > { %5797 = vmatprep.subr.bf16.mxu1 %v6629_v36  ;;  %v6693_v36 = vld [vmem:[#allocation10 + $0x514] ss:$12 sps:$4 sm:$0xff]  }
 0x25e   : > { %4650 = vmatpush1.bf16.msra.mxu0 %v6626_v37  ;;  %4868 = vmatmul.mubr.bf16.vlgmr.msra.gmra.mrb[20].mxu1 %v7416_v56  ;;  %v6649_v56 = vld [vmem:[#allocation10 + $0x428] ss:$12 sps:$4 sm:$0xff]   ;;  %v622_v37 = vsub.s32 6, %v7376_v45  ;;  %v6807_v45 = vld [vmem:[#allocation10 + $0x780] ss:$12 sps:$4 sm:$0xff]  }
 0x25f   : > { %5798 = vmatpush3.bf16.msra.mxu1 %v6630_v38  ;;  %4907 = vmatprep.mubr.bf16.mxu1 %v7418_v58  ;;  %v6650_v58 = vld [vmem:[#allocation10 + $0x368] ss:$12 sps:$4 sm:$0xff]   ;;  %v6694_v38 = vld [vmem:[#allocation10 + $0x5c0] ss:$12 sps:$4 sm:$0xff]  }
 0x260   : > { %4651 = vmatprep.subr.bf16.mxu0 %v6633_v39  ;;  %5799 = vmatprep.subr.bf16.mxu1 %v6634_v40  ;;  %v7434_v39 = vld [vmem:[#allocation9 + $0x8] sm:$0xf] }
 0x261   : > { %v6691_v40 = vld [vmem:[#allocation10 + $0x510] ss:$12 sps:$4 sm:$0xff]  }
 0x262   : > { %4652 = vmatpush1.bf16.msra.mxu0 %v6631_v41  ;;  %v6855_v41 = vld [vmem:[#allocation9] sm:$0xff] }
 0x263   : > { %5800 = vmatpush3.bf16.msra.mxu1 %v6635_v42  ;;  %4653 = vmatprep.subr.bf16.mxu0 %v6638_v43  ;;  %v627_v42 = vrot.slane %v6855_v41, %v626_v34  ;;  %v6695_v43 = vld [vmem:[#allocation10 + $0x500] ss:$12 sps:$4 sm:$0xff]   ;;  %v631_v34 = vrot.slane %v7434_v39, %v7381_v50 }
 0x264   : > { %5801 = vmatprep.subr.bf16.mxu1 %v6639_v44  ;;  %v6698_v44 = vld [vmem:[#allocation10 + $0x52c] ss:$12 sps:$4 sm:$0xff]  }
 0x266   : > { %4654 = vmatpush1.bf16.msra.mxu0 %v6636_v46  ;;  %v623_v46 = vrot.slane %v6855_v41, %v622_v37  ;;  %v6740_v37 = vld [vmem:[#allocation10 + $0x698] ss:$12 sps:$4 sm:$0xff]   ;;  %v6744_v41 = vld [vmem:[#allocation10 + $0x770] ss:$12 sps:$4 sm:$0xff]  }
 0x267   : > { %5802 = vmatpush3.bf16.msra.mxu1 %v6640_v47  ;;  %4655 = vmatprep.subr.bf16.mxu0 %v6643_v48  ;;  %v6699_v48 = vld [vmem:[#allocation10 + $0x5d8] ss:$12 sps:$4 sm:$0xff]  }
 0x268   : > { %5803 = vmatprep.subr.bf16.mxu1 %v6644_v51  ;;  %v635_v51 = vrot.slane %v7434_v39, %v7384_v21 }
 0x26a   : > { %4656 = vmatpush1.bf16.msra.mxu0 %v6641_v52 }
 0x26b   : > { %5804 = vmatpush3.bf16.msra.mxu1 %v6645_v54  ;;  %4657 = vmatprep.subr.bf16.mxu0 %v6648_v55  ;;  %v6696_v55 = vld [vmem:[#allocation10 + $0x528] ss:$12 sps:$4 sm:$0xff]  }
 0x26c   : > { %5805 = vmatprep.subr.bf16.mxu1 %v6649_v56 }
 0x26e   : > { %4658 = vmatpush1.bf16.msra.mxu0 %v6646_v26  ;;  %v6700_v26 = vld [vmem:[#allocation10 + $0x518] ss:$12 sps:$4 sm:$0xff]  }
 0x26f   : > { %5806 = vmatpush3.bf16.msra.mxu1 %v6650_v58  ;;  %4659 = vmatprep.subr.bf16.mxu0 %v6653_v60 }
 0x270   : > { %5807 = vmatprep.subr.bf16.mxu1 %v6654_v61  ;;  %v5894_v61 = vadd.f32 %v7425_v11, %v635_v51  ;;  %v6771_v51 = vld [vmem:[#allocation10 + $0x788] ss:$12 sps:$4 sm:$0xff]  }
 0x272   : > { %4660 = vmatpush1.bf16.msra.mxu0 %v6651_v62  ;;  %v6704_v62 = vld [vmem:[#allocation10 + $0x5f0] ss:$12 sps:$4 sm:$0xff]  }
 0x273   : > { %5808 = vmatpush3.bf16.msra.mxu1 %v6655_v0  ;;  %4661 = vmatprep.subr.bf16.mxu0 %v6658_v59  ;;  %v6701_v0 = vld [vmem:[#allocation10 + $0x540] ss:$12 sps:$4 sm:$0xff]   ;;  %v6705_v59 = vld [vmem:[#allocation10 + $0x530] ss:$12 sps:$4 sm:$0xff]  }
 0x274   : > { %5809 = vmatprep.subr.bf16.mxu1 %v6659_v1  ;;  %v6708_v1 = vld [vmem:[#allocation10 + $0x55c] ss:$12 sps:$4 sm:$0xff]  }
 0x276   : > { %4662 = vmatpush1.bf16.msra.mxu0 %v6656_v2 }
 0x277   : > { %5810 = vmatpush3.bf16.msra.mxu1 %v6660_v49  ;;  %4672 = vmatprep.subr.bf16.mxu0 %v6663_v4  ;;  %v2597_v49 = vmax.f32 %v5894_v61, 0.0  ;;  %v6706_v4 = vld [vmem:[#allocation10 + $0x558] ss:$12 sps:$4 sm:$0xff]   ;;  %v6785_v61 = vld [vmem:[#allocation10 + $0x890] ss:$12 sps:$4 sm:$0xff]  }
 0x278   : > { %5811 = vmatprep.subr.bf16.mxu1 %v6664_v5  ;;  %v6710_v5 = vld [vmem:[#allocation10 + $0x608] ss:$12 sps:$4 sm:$0xff]  }
 0x279   : > { %4664 = vmatmul.mubr.bf16.vlgmr.msra.gmra.mrb[8].mxu0 %v2604_v9 }
 0x27a   : > { %4673 = vmatpush1.bf16.msra.mxu0 %v6661_v8  ;;  %v6713_v8 = vld [vmem:[#allocation10 + $0x574] ss:$12 sps:$4 sm:$0xff]  }
 0x27b   : > { %5812 = vmatpush3.bf16.msra.mxu1 %v6665_v25  ;;  %4674 = vmatprep.subr.bf16.mxu0 %v6668_v7  ;;  %v7441_v25 = vpack.c.bf16 %v2597_v49, %v2597_v49  ;;  %v6711_v7 = vld [vmem:[#allocation10 + $0x570] ss:$12 sps:$4 sm:$0xff]   ;;  %v6795_v49 = vld [vmem:[#allocation10 + $0x8c0] ss:$12 sps:$4 sm:$0xff]  }
 0x27c   : > { %5819 = vmatprep.subr.bf16.mxu1 %v6669_v12  ;;  %v6715_v12 = vld [vmem:[#allocation10 + $0x620] ss:$12 sps:$4 sm:$0xff]  }
 0x27e   : > { %4675 = vmatpush1.bf16.msra.mxu0 %v6666_v13  ;;  %4908 = vmatmul.mubr.bf16.vlgmr.msra.gmra.mrb[24].mxu1 %v2604_v9  ;;  %v6714_v9 = vld [vmem:[#allocation10 + $0x6e0] ss:$12 sps:$4 sm:$0xff]  }
 0x27f   : > { %5820 = vmatpush3.bf16.msra.mxu1 %v6670_v14  ;;  %4676 = vmatprep.subr.bf16.mxu0 %v6673_v15  ;;  %v6718_v13 = vld [vmem:[#allocation10 + $0x58c] ss:$12 sps:$4 sm:$0xff]   ;;  %v6716_v15 = vld [vmem:[#allocation10 + $0x588] ss:$12 sps:$4 sm:$0xff]  }
 0x280   : > { %5821 = vmatprep.subr.bf16.mxu1 %v6674_v16  ;;  %v6719_v14 = vld [vmem:[#allocation10 + $0x6f8] ss:$12 sps:$4 sm:$0xff]  }
 0x281   : > { %v6720_v16 = vld [vmem:[#allocation10 + $0x638] ss:$12 sps:$4 sm:$0xff]  }
 0x282   : > { %4677 = vmatpush1.bf16.msra.mxu0 %v6671_v17  ;;  %v6723_v17 = vld [vmem:[#allocation10 + $0x5a4] ss:$12 sps:$4 sm:$0xff]  }
 0x283   : > { %5822 = vmatpush3.bf16.msra.mxu1 %v6675_v18  ;;  %4678 = vmatprep.subr.bf16.mxu0 %v6678_v19  ;;  %v6724_v18 = vld [vmem:[#allocation10 + $0x710] ss:$12 sps:$4 sm:$0xff]   ;;  %v6721_v19 = vld [vmem:[#allocation10 + $0x5a0] ss:$12 sps:$4 sm:$0xff]  }
 0x284   : > { %5823 = vmatprep.subr.bf16.mxu1 %v6679_v20  ;;  %v6725_v20 = vld [vmem:[#allocation10 + $0x650] ss:$12 sps:$4 sm:$0xff]  }
 0x286   : > { %4679 = vmatpush1.bf16.msra.mxu0 %v6676_v22  ;;  %v6728_v22 = vld [vmem:[#allocation10 + $0x5bc] ss:$12 sps:$4 sm:$0xff]  }
 0x287   : > { %5824 = vmatpush3.bf16.msra.mxu1 %v6680_v23  ;;  %4680 = vmatprep.subr.bf16.mxu0 %v6683_v24  ;;  %v6729_v23 = vld [vmem:[#allocation10 + $0x728] ss:$12 sps:$4 sm:$0xff]   ;;  %v6726_v24 = vld [vmem:[#allocation10 + $0x5b8] ss:$12 sps:$4 sm:$0xff]  }
 0x288   : > { %5825 = vmatprep.subr.bf16.mxu1 %v6684_v27  ;;  %v6730_v27 = vld [vmem:[#allocation10 + $0x668] ss:$12 sps:$4 sm:$0xff]  }
 0x28a   : > { %4681 = vmatpush1.bf16.msra.mxu0 %v6681_v28  ;;  %v6733_v28 = vld [vmem:[#allocation10 + $0x5d4] ss:$12 sps:$4 sm:$0xff]  }
 0x28b   : > { %5826 = vmatpush3.bf16.msra.mxu1 %v6685_v29  ;;  %4682 = vmatprep.subr.bf16.mxu0 %v6688_v30  ;;  %v6734_v29 = vld [vmem:[#allocation10 + $0x740] ss:$12 sps:$4 sm:$0xff]   ;;  %v6731_v30 = vld [vmem:[#allocation10 + $0x5d0] ss:$12 sps:$4 sm:$0xff]  }
 0x28c   : > { %5827 = vmatprep.subr.bf16.mxu1 %v6689_v31  ;;  %v6735_v31 = vld [vmem:[#allocation10 + $0x680] ss:$12 sps:$4 sm:$0xff]  }
 0x28e   : > { %4683 = vmatpush1.bf16.msra.mxu0 %v6686_v33  ;;  %v6738_v33 = vld [vmem:[#allocation10 + $0x5ec] ss:$12 sps:$4 sm:$0xff]  }
 0x28f   : > { %5828 = vmatpush3.bf16.msra.mxu1 %v6690_v35  ;;  %4684 = vmatprep.subr.bf16.mxu0 %v6693_v36  ;;  %v6739_v35 = vld [vmem:[#allocation10 + $0x758] ss:$12 sps:$4 sm:$0xff]   ;;  %v6736_v36 = vld [vmem:[#allocation10 + $0x5e8] ss:$12 sps:$4 sm:$0xff]  }
 0x290   : > { %v2417_v47 = vpop.f32.mrb[8].mxu1  ;;  %5829 = vmatprep.subr.bf16.mxu1 %v6694_v38  ;;  %v6743_v38 = vld [vmem:[#allocation10 + $0x604] ss:$12 sps:$4 sm:$0xff]  }
 0x291   : > { %v2419_v52 = vpop.f32.mrb[9].mxu1  ;;  %v5891_v58 = vadd.f32 %v2417_v47, %v623_v46  ;;  %v6770_v47 = vld [vmem:[#allocation10 + $0x848] ss:$12 sps:$4 sm:$0xff]  }
 0x292   : > { %v5892_v53 = vadd.f32 %v2419_v52, %v627_v42  ;;  %4685 = vmatpush1.bf16.msra.mxu0 %v6691_v40  ;;  %v2421_v54 = vpop.f32.mrb[10].mxu1  ;;  %v5893_v40 = vadd.f32 %v7423_v10, %v631_v34  ;;  %v6741_v42 = vld [vmem:[#allocation10 + $0x600] ss:$12 sps:$4 sm:$0xff]  }
 0x293   : > { %5830 = vmatpush3.bf16.msra.mxu1 %v6695_v43  ;;  %v2422_v56 = vpop.f32.mrb[11].mxu1  ;;  %4686 = vmatprep.subr.bf16.mxu0 %v6698_v44  ;;  %v2594_v2 = vmax.f32 %v5891_v58, 0.0  ;;  %v6745_v43 = vld [vmem:[#allocation10 + $0x6b0] ss:$12 sps:$4 sm:$0xff]   ;;  %v6751_v10 = vld [vmem:[#allocation10 + $0x634] ss:$12 sps:$4 sm:$0xff]  }
 0x294   : > { %v2595_v60 = vmax.f32 %v5892_v53, 0.0  ;;  %5831 = vmatprep.subr.bf16.mxu1 %v6699_v48  ;;  %v6748_v44 = vld [vmem:[#allocation10 + $0x61c] ss:$12 sps:$4 sm:$0xff]   ;;  %v2596_v46 = vmax.f32 %v5893_v40, 0.0  ;;  %v6746_v48 = vld [vmem:[#allocation10 + $0x618] ss:$12 sps:$4 sm:$0xff]  }
 0x295   : > { %v7439_v11 = vpack.c.bf16 %v2594_v2, %v2594_v2  ;;  %v6775_v53 = vld [vmem:[#allocation10 + $0x860] ss:$12 sps:$4 sm:$0xff]   ;;  %v6749_v54 = vld [vmem:[#allocation10 + $0x630] ss:$12 sps:$4 sm:$0xff]  }
 0x296   : > { %v2607_v63 = vpack.c.bf16 %v2595_v60, %v2595_v60  ;;  %4687 = vmatpush1.bf16.msra.mxu0 %v6696_v55  ;;  %v7450_v52 = vpack.c.bf16 %v2596_v46, %v2596_v46  ;;  %v6754_v55 = vld [vmem:[#allocation10 + $0x64c] ss:$12 sps:$4 sm:$0xff]   ;;  %v6757_v58 = vld [vmem:[#allocation10 + $0x664] ss:$12 sps:$4 sm:$0xff]   ;;  %v6763_v2 = vld [vmem:[#allocation10 + $0x694] ss:$12 sps:$4 sm:$0xff]  }
 0x297   : > { %5832 = vmatpush3.bf16.msra.mxu1 %v6700_v26  ;;  %4688 = vmatprep.subr.bf16.mxu0 %v6703_v57  ;;  %v6776_v56 = vld [vmem:[#allocation10 + $0x7a0] ss:$12 sps:$4 sm:$0xff]   ;;  %v6780_v26 = vld [vmem:[#allocation10 + $0x878] ss:$12 sps:$4 sm:$0xff]   ;;  %v6752_v57 = vld [vmem:[#allocation10 + $0x648] ss:$12 sps:$4 sm:$0xff]  }
 0x298   : > { %4704 = vmatprep.mubr.bf16.mxu0 %v2607_v63  ;;  %4947 = vmatprep.mubr.bf16.mxu1 %v2607_v63  ;;  %v6781_v60 = vld [vmem:[#allocation10 + $0x7b8] ss:$12 sps:$4 sm:$0xff]   ;;  %v6760_v63 = vld [vmem:[#allocation10 + $0x67c] ss:$12 sps:$4 sm:$0xff]  }
 0x299   : > { %5833 = vmatprep.subr.bf16.mxu1 %v6704_v62  ;;  %v6755_v62 = vld [vmem:[#allocation10 + $0x660] ss:$12 sps:$4 sm:$0xff]  }
 0x29a   : > { %4689 = vmatpush1.bf16.msra.mxu0 %v6701_v0  ;;  %v6786_v0 = vld [vmem:[#allocation10 + $0x7d0] ss:$12 sps:$4 sm:$0xff]  }
 0x29b   : > { %5834 = vmatpush3.bf16.msra.mxu1 %v6705_v59  ;;  %4690 = vmatprep.subr.bf16.mxu0 %v6708_v1  ;;  %v6790_v59 = vld [vmem:[#allocation10 + $0x8a8] ss:$12 sps:$4 sm:$0xff]   ;;  %v6758_v1 = vld [vmem:[#allocation10 + $0x678] ss:$12 sps:$4 sm:$0xff]  }
 0x29c   : > { %5841 = vmatprep.subr.bf16.mxu1 %v6709_v3  ;;  %v6791_v3 = vld [vmem:[#allocation10 + $0x7e8] ss:$12 sps:$4 sm:$0xff]  }
 0x29e   : > { %4691 = vmatpush1.bf16.msra.mxu0 %v6706_v4  ;;  %4948 = vmatmul.mubr.bf16.vlgmr.msra.gmra.mrb[28].mxu1 %v7439_v11  ;;  %v6761_v4 = vld [vmem:[#allocation10 + $0x690] ss:$12 sps:$4 sm:$0xff]  }
 0x29f   : > { %5842 = vmatpush3.bf16.msra.mxu1 %v6710_v5  ;;  %4987 = vmatprep.mubr.bf16.mxu1 %v7441_v25  ;;  %v6766_v5 = vld [vmem:[#allocation10 + $0x6ac] ss:$12 sps:$4 sm:$0xff]  }
 0x2a0   : > { %4692 = vmatprep.subr.bf16.mxu0 %v6713_v8  ;;  %5843 = vmatprep.subr.bf16.mxu1 %v6714_v9  ;;  %v6800_v8 = vld [vmem:[#allocation10 + $0x8d8] ss:$12 sps:$4 sm:$0xff]   ;;  %v6764_v9 = vld [vmem:[#allocation10 + $0x6a8] ss:$12 sps:$4 sm:$0xff]  }
 0x2a2   : > { %4693 = vmatpush1.bf16.msra.mxu0 %v6711_v7  ;;  %v6801_v7 = vld [vmem:[#allocation10 + $0x818] ss:$12 sps:$4 sm:$0xff]  }
 0x2a3   : > { %5844 = vmatpush3.bf16.msra.mxu1 %v6715_v12  ;;  %4694 = vmatprep.subr.bf16.mxu0 %v6718_v13  ;;  %v6805_v12 = vld [vmem:[#allocation10 + $0x8f0] ss:$12 sps:$4 sm:$0xff]   ;;  %v6767_v13 = vld [vmem:[#allocation10 + $0x6c0] ss:$12 sps:$4 sm:$0xff]  }
 0x2a4   : > { %5845 = vmatprep.subr.bf16.mxu1 %v6719_v14  ;;  %v6774_v14 = vld [vmem:[#allocation10 + $0x6dc] ss:$12 sps:$4 sm:$0xff]  }
 0x2a6   : > { %4695 = vmatpush1.bf16.msra.mxu0 %v6716_v15  ;;  %v6806_v15 = vld [vmem:[#allocation10 + $0x830] ss:$12 sps:$4 sm:$0xff]  }
 0x2a7   : > { %5846 = vmatpush3.bf16.msra.mxu1 %v6720_v16  ;;  %4696 = vmatprep.subr.bf16.mxu0 %v6723_v17  ;;  %v6772_v16 = vld [vmem:[#allocation10 + $0x6d8] ss:$12 sps:$4 sm:$0xff]   ;;  %v6779_v17 = vld [vmem:[#allocation10 + $0x6f4] ss:$12 sps:$4 sm:$0xff]  }
 0x2a8   : > { %5847 = vmatprep.subr.bf16.mxu1 %v6724_v18  ;;  %v6777_v18 = vld [vmem:[#allocation10 + $0x6f0] ss:$12 sps:$4 sm:$0xff]  }
 0x2aa   : > { %4697 = vmatpush1.bf16.msra.mxu0 %v6721_v19  ;;  %v6784_v19 = vld [vmem:[#allocation10 + $0x70c] ss:$12 sps:$4 sm:$0xff]  }
 0x2ab   : > { %5848 = vmatpush3.bf16.msra.mxu1 %v6725_v20  ;;  %4698 = vmatprep.subr.bf16.mxu0 %v6728_v22  ;;  %v6782_v20 = vld [vmem:[#allocation10 + $0x708] ss:$12 sps:$4 sm:$0xff]   ;;  %v6789_v22 = vld [vmem:[#allocation10 + $0x724] ss:$12 sps:$4 sm:$0xff]  }
 0x2ac   : > { %5849 = vmatprep.subr.bf16.mxu1 %v6729_v23  ;;  %v6787_v23 = vld [vmem:[#allocation10 + $0x720] ss:$12 sps:$4 sm:$0xff]  }
 0x2ae   : > { %4699 = vmatpush1.bf16.msra.mxu0 %v6726_v24  ;;  %v6794_v24 = vld [vmem:[#allocation10 + $0x73c] ss:$12 sps:$4 sm:$0xff]  }
 0x2af   : > { %5850 = vmatpush3.bf16.msra.mxu1 %v6730_v27  ;;  %4700 = vmatprep.subr.bf16.mxu0 %v6733_v28  ;;  %v6792_v27 = vld [vmem:[#allocation10 + $0x738] ss:$12 sps:$4 sm:$0xff]   ;;  %v6799_v28 = vld [vmem:[#allocation10 + $0x754] ss:$12 sps:$4 sm:$0xff]  }
 0x2b0   : > { %5851 = vmatprep.subr.bf16.mxu1 %v6734_v29  ;;  %v639_v29 = vrot.slane %v7434_v39, %v7406_v32 }
 0x2b2   : > { %4701 = vmatpush1.bf16.msra.mxu0 %v6731_v30  ;;  %v6797_v30 = vld [vmem:[#allocation10 + $0x750] ss:$12 sps:$4 sm:$0xff]  }
 0x2b3   : > { %5852 = vmatpush3.bf16.msra.mxu1 %v6735_v31  ;;  %4702 = vmatprep.subr.bf16.mxu0 %v6738_v33  ;;  %v643_v31 = vrot.slane %v7434_v39, %v610_v6  ;;  %v6804_v33 = vld [vmem:[#allocation10 + $0x76c] ss:$12 sps:$4 sm:$0xff]   ;;  %v6812_v6 = vld [vmem:[#allocation10 + $0x79c] ss:$12 sps:$4 sm:$0xff]  }
 0x2b4   : > { %5853 = vmatprep.subr.bf16.mxu1 %v6739_v35  ;;  %v6810_v39 = vld [vmem:[#allocation10 + $0x798] ss:$12 sps:$4 sm:$0xff]  }
 0x2b6   : > { %4703 = vmatpush1.bf16.msra.mxu0 %v6736_v36 }
 0x2b7   : > { %5854 = vmatpush3.bf16.msra.mxu1 %v6740_v37  ;;  %4713 = vmatprep.subr.bf16.mxu0 %v6743_v38  ;;  %v6802_v38 = vld [vmem:[#allocation10 + $0x768] ss:$12 sps:$4 sm:$0xff]  }
 0x2b8   : > { %5855 = vmatprep.subr.bf16.mxu1 %v6744_v41 }
 0x2b9   : > { %4705 = vmatmul.mubr.bf16.vlgmr.msra.gmra.mrb[8].mxu0 %v7439_v11  ;;  %v6796_v11 = vld [vmem:[#allocation10 + $0x800] ss:$12 sps:$4 sm:$0xff]  }
 0x2ba   : > { %4714 = vmatpush1.bf16.msra.mxu0 %v6741_v42  ;;  %4745 = vmatprep.mubr.bf16.mxu0 %v7441_v25  ;;  %v6769_v25 = vld [vmem:[#allocation10 + $0x6c4] ss:$12 sps:$4 sm:$0xff]  }
 0x2bb   : > { %5856 = vmatpush3.bf16.msra.mxu1 %v6745_v43  ;;  %4715 = vmatprep.subr.bf16.mxu0 %v6748_v44  ;;  %v6809_v42 = vld [vmem:[#allocation10 + $0x784] ss:$12 sps:$4 sm:$0xff]  }
 0x2bc   : > { %5863 = vmatprep.subr.bf16.mxu1 %v6770_v47 }
 0x2be   : > { %4716 = vmatpush1.bf16.msra.mxu0 %v6746_v48  ;;  %4988 = vmatmul.mubr.bf16.vlgmr.msra.gmra.mrb[32].mxu1 %v7450_v52  ;;  %v6815_v48 = vld [vmem:[#allocation10 + $0x7b4] ss:$12 sps:$4 sm:$0xff]  }
 0x2bf   : > { %4717 = vmatprep.subr.bf16.mxu0 %v6751_v10  ;;  %5864 = vmatpush3.bf16.msra.mxu1 %v6771_v51  ;;  %v6813_v10 = vld [vmem:[#allocation10 + $0x7b0] ss:$12 sps:$4 sm:$0xff]   ;;  %v6818_v51 = vld [vmem:[#allocation10 + $0x7cc] ss:$12 sps:$4 sm:$0xff]  }
 0x2c0   : > { %5865 = vmatprep.subr.bf16.mxu1 %v6775_v53  ;;  %v6816_v53 = vld [vmem:[#allocation10 + $0x7c8] ss:$12 sps:$4 sm:$0xff]  }
 0x2c2   : > { %4718 = vmatpush1.bf16.msra.mxu0 %v6749_v54  ;;  %v6821_v54 = vld [vmem:[#allocation10 + $0x7e4] ss:$12 sps:$4 sm:$0xff]  }
 0x2c3   : > { %4719 = vmatprep.subr.bf16.mxu0 %v6754_v55  ;;  %5866 = vmatpush3.bf16.msra.mxu1 %v6776_v56  ;;  %v6819_v55 = vld [vmem:[#allocation10 + $0x7e0] ss:$12 sps:$4 sm:$0xff]   ;;  %v6824_v56 = vld [vmem:[#allocation10 + $0x7fc] ss:$12 sps:$4 sm:$0xff]  }
 0x2c4   : > { %5867 = vmatprep.subr.bf16.mxu1 %v6780_v26  ;;  %v6827_v26 = vld [vmem:[#allocation10 + $0x814] ss:$12 sps:$4 sm:$0xff]  }
 0x2c6   : > { %4720 = vmatpush1.bf16.msra.mxu0 %v6752_v57  ;;  %v6825_v57 = vld [vmem:[#allocation10 + $0x810] ss:$12 sps:$4 sm:$0xff]  }
 0x2c7   : > { %4721 = vmatprep.subr.bf16.mxu0 %v6757_v58  ;;  %5868 = vmatpush3.bf16.msra.mxu1 %v6781_v60  ;;  %v6830_v58 = vld [vmem:[#allocation10 + $0x82c] ss:$12 sps:$4 sm:$0xff]  }
 0x2c8   : > { %5869 = vmatprep.subr.bf16.mxu1 %v6785_v61 }
 0x2ca   : > { %4722 = vmatpush1.bf16.msra.mxu0 %v6755_v62  ;;  %v6828_v62 = vld [vmem:[#allocation10 + $0x828] ss:$12 sps:$4 sm:$0xff]  }
 0x2cb   : > { %4723 = vmatprep.subr.bf16.mxu0 %v6760_v63  ;;  %5870 = vmatpush3.bf16.msra.mxu1 %v6786_v0 }
 0x2cc   : > { %5871 = vmatprep.subr.bf16.mxu1 %v6790_v59  ;;  %v6833_v59 = vld [vmem:[#allocation10 + $0x844] ss:$12 sps:$4 sm:$0xff]  }
 0x2ce   : > { %4724 = vmatpush1.bf16.msra.mxu0 %v6758_v1 }
 0x2cf   : > { %4725 = vmatprep.subr.bf16.mxu0 %v6763_v2  ;;  %5872 = vmatpush3.bf16.msra.mxu1 %v6791_v3  ;;  %v6831_v2 = vld [vmem:[#allocation10 + $0x840] ss:$12 sps:$4 sm:$0xff]   ;;  %v6836_v3 = vld [vmem:[#allocation10 + $0x85c] ss:$12 sps:$4 sm:$0xff]  }
 0x2d0   : > { %5873 = vmatprep.subr.bf16.mxu1 %v6795_v49  ;;  %v6834_v49 = vld [vmem:[#allocation10 + $0x858] ss:$12 sps:$4 sm:$0xff]  }
 0x2d2   : > { %4726 = vmatpush1.bf16.msra.mxu0 %v6761_v4  ;;  %v6839_v4 = vld [vmem:[#allocation10 + $0x874] ss:$12 sps:$4 sm:$0xff]  }
 0x2d3   : > { %4727 = vmatprep.subr.bf16.mxu0 %v6766_v5  ;;  %5874 = vmatpush3.bf16.msra.mxu1 %v6796_v11  ;;  %v6837_v5 = vld [vmem:[#allocation10 + $0x870] ss:$12 sps:$4 sm:$0xff]   ;;  %v6842_v11 = vld [vmem:[#allocation10 + $0x88c] ss:$12 sps:$4 sm:$0xff]  }
 0x2d4   : > { %5875 = vmatprep.subr.bf16.mxu1 %v6800_v8  ;;  %v6840_v8 = vld [vmem:[#allocation10 + $0x888] ss:$12 sps:$4 sm:$0xff]  }
 0x2d6   : > { %4728 = vmatpush1.bf16.msra.mxu0 %v6764_v9  ;;  %v6845_v9 = vld [vmem:[#allocation10 + $0x8a4] ss:$12 sps:$4 sm:$0xff]  }
 0x2d7   : > { %4729 = vmatprep.subr.bf16.mxu0 %v6769_v25  ;;  %5876 = vmatpush3.bf16.msra.mxu1 %v6801_v7  ;;  %v6843_v25 = vld [vmem:[#allocation10 + $0x8a0] ss:$12 sps:$4 sm:$0xff]   ;;  %v6848_v7 = vld [vmem:[#allocation10 + $0x8bc] ss:$12 sps:$4 sm:$0xff]  }
 0x2d8   : > { %5877 = vmatprep.subr.bf16.mxu1 %v6805_v12  ;;  %v6846_v12 = vld [vmem:[#allocation10 + $0x8b8] ss:$12 sps:$4 sm:$0xff]  }
 0x2da   : > { %4730 = vmatpush1.bf16.msra.mxu0 %v6767_v13  ;;  %v6851_v13 = vld [vmem:[#allocation10 + $0x8d4] ss:$12 sps:$4 sm:$0xff]  }
 0x2db   : > { %4731 = vmatprep.subr.bf16.mxu0 %v6774_v14  ;;  %5878 = vmatpush3.bf16.msra.mxu1 %v6806_v15  ;;  %v2996_v14 = vld [vmem:[#allocation12] sm:$0x7]  ;;  %v6849_v15 = vld [vmem:[#allocation10 + $0x8d0] ss:$12 sps:$4 sm:$0xff]  }
 0x2de   : > { %4732 = vmatpush1.bf16.msra.mxu0 %v6772_v16  ;;  %v3009_v16 = vrot.slane %v2996_v14, %v7406_v32 }
 0x2df   : > { %4733 = vmatprep.subr.bf16.mxu0 %v6779_v17  ;;  %v6854_v17 = vld [vmem:[#allocation10 + $0x8ec] ss:$12 sps:$4 sm:$0xff]  }
 0x2e2   : > { %4734 = vmatpush1.bf16.msra.mxu0 %v6777_v18 }
 0x2e3   : > { %4735 = vmatprep.subr.bf16.mxu0 %v6784_v19 }
 0x2e6   : > { %4736 = vmatpush1.bf16.msra.mxu0 %v6782_v20  ;;  %v6852_v20 = vld [vmem:[#allocation10 + $0x8e8] ss:$12 sps:$4 sm:$0xff]  }
 0x2e7   : > { %4737 = vmatprep.subr.bf16.mxu0 %v6789_v22 }
 0x2ea   : > { %4738 = vmatpush1.bf16.msra.mxu0 %v6787_v23 }
 0x2eb   : > { %4739 = vmatprep.subr.bf16.mxu0 %v6794_v24 }
 0x2ee   : > { %4740 = vmatpush1.bf16.msra.mxu0 %v6792_v27 }
 0x2ef   : > { %4741 = vmatprep.subr.bf16.mxu0 %v6799_v28 }
 0x2f0   : > { %v2581_v34 = vpop.f32.mrb[12].mxu1 }
 0x2f1   : > { %v5895_v35 = vadd.f32 %v2581_v34, %v639_v29  ;;  %v2583_v36 = vpop.f32.mrb[13].mxu1 }
 0x2f2   : > { %v5896_v37 = vadd.f32 %v2583_v36, %v643_v31  ;;  %4742 = vmatpush1.bf16.msra.mxu0 %v6797_v30  ;;  %v2585_v40 = vpop.f32.mrb[14].mxu1 }
 0x2f3   : > { %v2598_v41 = vmax.f32 %v5895_v35, 0.0  ;;  %4743 = vmatprep.subr.bf16.mxu0 %v6804_v33  ;;  %v2586_v43 = vpop.f32.mrb[15].mxu1 }
 0x2f4   : > { %v2599_v44 = vmax.f32 %v5896_v37, 0.0 }
 0x2f5   : > { %v7458_v46 = vpack.c.bf16 %v2598_v41, %v2598_v41 }
 0x2f6   : > { %v2611_v47 = vpack.c.bf16 %v2599_v44, %v2599_v44  ;;  %4744 = vmatpush1.bf16.msra.mxu0 %v6802_v38 }
 0x2f7   : > { %4754 = vmatprep.subr.bf16.mxu0 %v6809_v42 }
 0x2f8   : > { %5027 = vmatprep.mubr.bf16.mxu1 %v2611_v47 }
 0x2f9   : > { %4746 = vmatmul.mubr.bf16.vlgmr.msra.gmra.mrb[8].mxu0 %v7450_v52  ;;  %5028 = vmatmul.mubr.bf16.vlgmr.msra.gmra.mrb[36].mxu1 %v7458_v46  ;;  %v6822_v52 = vld [vmem:[#allocation10 + $0x7f8] ss:$12 sps:$4 sm:$0xff]  }
 0x2fa   : > { %4755 = vmatpush1.bf16.msra.mxu0 %v6807_v45  ;;  %4786 = vmatprep.mubr.bf16.mxu0 %v2611_v47 }
 0x2fb   : > { %4756 = vmatprep.subr.bf16.mxu0 %v6812_v6 }
 0x2fe   : > { %4757 = vmatpush1.bf16.msra.mxu0 %v6810_v39 }
 0x2ff   : > { %4758 = vmatprep.subr.bf16.mxu0 %v6815_v48 }
 0x302   : > { %4759 = vmatpush1.bf16.msra.mxu0 %v6813_v10 }
 0x303   : > { %4760 = vmatprep.subr.bf16.mxu0 %v6818_v51 }
 0x306   : > { %4761 = vmatpush1.bf16.msra.mxu0 %v6816_v53 }
 0x307   : > { %4762 = vmatprep.subr.bf16.mxu0 %v6821_v54  ;;  %v3001_v54 = vrot.slane %v2996_v14, %v7381_v50 }
 0x30a   : > { %4763 = vmatpush1.bf16.msra.mxu0 %v6819_v55  ;;  %v3005_v55 = vrot.slane %v2996_v14, %v7384_v21 }
 0x30b   : > { %4764 = vmatprep.subr.bf16.mxu0 %v6824_v56 }
 0x30e   : > { %4765 = vmatpush1.bf16.msra.mxu0 %v6822_v52 }
 0x30f   : > { %4766 = vmatprep.subr.bf16.mxu0 %v6827_v26 }
 0x311   : > { %v5769_v60 = vpop.f32.mrb[16].mxu1 }
 0x312   : > { %4767 = vmatpush1.bf16.msra.mxu0 %v6825_v57  ;;  %v5770_v61 = vpop.f32.mrb[17].mxu1 }
 0x313   : > { %v5771_v63 = vadd.f32 %v5770_v61, %v5769_v60  ;;  %v5772_v0 = vpop.f32.mrb[18].mxu1  ;;  %4768 = vmatprep.subr.bf16.mxu0 %v6830_v58 }
 0x314   : > { %v5773_v1 = vpop.f32.mrb[19].mxu1 }
 0x315   : > { %v4830_v22 = vadd.f32 %v5771_v63, %v3009_v16 }
 0x316   : > { %4769 = vmatpush1.bf16.msra.mxu0 %v6828_v62 }
 0x317   : > { %4770 = vmatprep.subr.bf16.mxu0 %v6833_v59 }
 0x31a   : > { %4771 = vmatpush1.bf16.msra.mxu0 %v6831_v2 }
 0x31b   : > { %4772 = vmatprep.subr.bf16.mxu0 %v6836_v3 }
 0x31e   : > { %4773 = vmatpush1.bf16.msra.mxu0 %v6834_v49 }
 0x31f   : > { %4774 = vmatprep.subr.bf16.mxu0 %v6839_v4 }
 0x322   : > { %4775 = vmatpush1.bf16.msra.mxu0 %v6837_v5 }
 0x323   : > { %4776 = vmatprep.subr.bf16.mxu0 %v6842_v11 }
 0x326   : > { %4777 = vmatpush1.bf16.msra.mxu0 %v6840_v8 }
 0x327   : > { %4778 = vmatprep.subr.bf16.mxu0 %v6845_v9 }
 0x32a   : > { %4779 = vmatpush1.bf16.msra.mxu0 %v6843_v25 }
 0x32b   : > { %4780 = vmatprep.subr.bf16.mxu0 %v6848_v7 }
 0x32e   : > { %4781 = vmatpush1.bf16.msra.mxu0 %v6846_v12 }
 0x32f   : > { %4782 = vmatprep.subr.bf16.mxu0 %v6851_v13 }
 0x331   : > { %v5791_v18 = vpop.f32.mrb[20].mxu1 }
 0x332   : > { %4783 = vmatpush1.bf16.msra.mxu0 %v6849_v15  ;;  %v5792_v19 = vpop.f32.mrb[21].mxu1 }
 0x333   : > { %v5793_v23 = vadd.f32 %v5792_v19, %v5791_v18  ;;  %v5794_v24 = vpop.f32.mrb[22].mxu1  ;;  %4784 = vmatprep.subr.bf16.mxu0 %v6854_v17 }
 0x334   : > { %v5795_v27 = vpop.f32.mrb[23].mxu1 }
 0x335   : > { %v4870_v28 = vadd.f32 %v5793_v23, %v4830_v22 }
 0x336   : > { %4785 = vmatpush1.bf16.msra.mxu0 %v6852_v20 }
 0x339   : > { %4787 = vmatmul.mubr.bf16.vlgmr.msra.gmra.mrb[8].mxu0 %v7458_v46 }
 0x351   : > { %v5813_v29 = vpop.f32.mrb[24].mxu1 }
 0x352   : > { %v5814_v30 = vpop.f32.mrb[25].mxu1 }
 0x353   : > { %v5815_v31 = vadd.f32 %v5814_v30, %v5813_v29  ;;  %v5816_v33 = vpop.f32.mrb[26].mxu1 }
 0x354   : > { %v5817_v32 = vpop.f32.mrb[27].mxu1 }
 0x355   : > { %v4910_v34 = vadd.f32 %v5815_v31, %v4870_v28 }
 0x371   : > { %v5835_v35 = vpop.f32.mrb[28].mxu1 }
 0x372   : > { %v5836_v36 = vpop.f32.mrb[29].mxu1 }
 0x373   : > { %v5837_v37 = vadd.f32 %v5836_v36, %v5835_v35  ;;  %v5838_v38 = vpop.f32.mrb[30].mxu1 }
 0x374   : > { %v5839_v40 = vpop.f32.mrb[31].mxu1 }
 0x375   : > { %v4950_v41 = vadd.f32 %v5837_v37, %v4910_v34 }
 0x391   : > { %v5857_v42 = vpop.f32.mrb[32].mxu1 }
 0x392   : > { %v5858_v43 = vpop.f32.mrb[33].mxu1 }
 0x393   : > { %v5859_v44 = vadd.f32 %v5858_v43, %v5857_v42  ;;  %v5860_v47 = vpop.f32.mrb[34].mxu1 }
 0x394   : > { %v5861_v45 = vpop.f32.mrb[35].mxu1 }
 0x395   : > { %v4990_v46 = vadd.f32 %v5859_v44, %v4950_v41 }
 0x3cc   : > { %v5879_v6 = vpop.f32.mrb[36].mxu1 }
 0x3cd   : > { %v5880_v39 = vpop.f32.mrb[37].mxu1 }
 0x3ce   : > { %v5881_v48 = vadd.f32 %v5880_v39, %v5879_v6  ;;  %v5882_v10 = vpop.f32.mrb[38].mxu1 }
 0x3cf   : > { %v5883_v51 = vpop.f32.mrb[39].mxu1 }
 0x3d0   : > { %v5030_v53 = vadd.f32 %v5881_v48, %v4990_v46 }
 0x3d2   : > { %5037 = vst [vmem:[%s296_s27 + $0x10] sm:$0xff] %v5030_v53 }
 0x40c   : > { %v4788_v56 = vpop.f32.mrb[8].mxu0 }
 0x40d   : > { %v5897_v52 = vadd.f32 %v4788_v56, %v3001_v54  ;;  %v4790_v26 = vpop.f32.mrb[9].mxu0 }
 0x40e   : > { %v5898_v57 = vadd.f32 %v4790_v26, %v3005_v55  ;;  %v4792_v58 = vpop.f32.mrb[10].mxu0 }
 0x40f   : > { %5035 = vst [vmem:[%s296_s27] sm:$0xff] %v5897_v52  ;;  %v4793_v50 = vpop.f32.mrb[11].mxu0 }
 0x410   : > { %5036 = vst [vmem:[%s296_s27 + $0x8] sm:$0xff] %v5898_v57 }
 0x411   : > { %7011 = shalt.err (!%p7008_p12)
}
 0x412   : > { %s7012_s20 = scalar_lea.hbm %s7472_s7, 384  ;;  %s7016_s14 = scalar_lea.hbm %s7522_s6, 768 }
 0x413   : > { %p7013_p13 = scmp.ne.s32.totalorder %s7472_s7, %s7012_s20  ;;  %p7017_p9 = scmp.lt.u32.totalorder %s7472_s7, %s7522_s6 }
 0x414   : > { %p7018_p4 = scmp.lt.u32.totalorder %s7016_s14, %s7012_s20  ;;  %p7020_p0 = scmp.lt.u32.totalorder %s7012_s20, %s7472_s7 }
 0x415   : > { %p7014_p1 = pnand %p7013_p13, %p7539_p6 }
 0x416   : > { %p7019_p8 = por %p7018_p4, %p7017_p9 }
 0x417   : > { %p7015_p7 = pneg %p7014_p1 }
 0x418   : > { %p7021_p2 = por %p7020_p0, %p7019_p8 }
 0x41a   : > { %p7022_p5 = pnand %p7021_p2, %p7015_p7 }
 0x41c   : > { %7025 = shalt.err (!%p7022_p5)
}
 0x41d   : > { %5965 = dma.vmem_to_hbm [thread:$0]  (%p7539_p6), %s7474_s18, 384, %s7472_s7, %s5039_s26  }
 0x41e PF: > { %s5065_s27 = sand.u32 1, %s7060_s0   ;;  %p7540_p10 = scmp.ne.s32.totalorder %s7532_s15, 0 }
 0x41f   : > { %p7541_p11 = scmp.ge.s32.totalorder %s7072_s23, 2  ;;  %s5066_s12 = scalar_lea.sflag [#allocation6], %s5065_s27 }
 0x421   : > { %p5985_p3 = pnand %p7541_p11, %p7540_p10 }
 0x423   : > { %7055 = dma.done.wait (!%p5985_p3), %s5066_s12, 384  }
 0x424   : > { %7057 = vsyncadd (!%p5985_p3), %s5066_s12, 4294966912  ;;  %p22_p12 = scmp.ge.s32.totalorder %s7256_s30, 4   ;;  %s7542_s0 = smov %s7064_s21 }
 0x425   : > { %s7543_s21 = smov %s7068_s22  ;;  %s7544_s22 = smov %s7267_s29 }
 0x426   : > { %s7545_s23 = smov %s7256_s30  ;;  %24 = sbr.rel (!%p22_p12) target bundleno = 7 (0x7), region = 101 }
 0x42d   :  { %5071 = vsyncpa [#allocation5], 1 }
 0x42e   :  { %5073 = vsyncpa [#allocation5 + $0x1], 1 }
 0x42f   :  { %5074 = vsyncpa [#allocation8], 1 }
 0x430   :  { %5075 = vsyncpa [#allocation11], 1 }
 0x431   :  { %5076 = vsyncpa [#allocation6], 1 }
 0x432   :  { %5078 = vsyncpa [#allocation6 + $0x1], 1 }

// kernel: tpu_custom_call.1
= control target key start
LH: loop header
LB: loop body
LE: loop exit
PB: predicated region body
PF: predicated region fallthrough
CT: control target
= control target key end

     0   :  { %12 = vsyncpa [#allocation5], 0  ;;  %s7516_s0 = inlined_call_operand.<no memory space> [shape: s32[1], index: 0, kind: input, shape index: {}]   ;;  %s7517_s1 = inlined_call_operand.hbm [shape: f32[16,384], index: 1, kind: input, shape index: {}]   ;;  %s7518_s2 = inlined_call_operand.hbm [shape: bf16[384,1536], index: 2, kind: input, shape index: {}]   ;;  %s7519_s3 = inlined_call_operand.hbm [shape: f32[1,1536], index: 3, kind: input, shape index: {}]   ;;  %s7520_s4 = inlined_call_operand.hbm [shape: bf16[1536,384], index: 4, kind: input, shape index: {}]   ;;  %s7521_s5 = inlined_call_operand.hbm [shape: f32[1,384], index: 5, kind: input, shape index: {}]   ;;  %s7522_s6 = inlined_call_operand.hbm [shape: f32[16,384], index: 6, kind: output, shape index: {}]  }
   0x1   :  { %14 = vsyncpa [#allocation5 + $0x1], 0 }
   0x2   :  { %15 = vsyncpa [#allocation8], 0 }
   0x3   :  { %16 = vsyncpa [#allocation11], 0 }
   0x4   :  { %17 = vsyncpa [#allocation6], 0 }
   0x5   :  { %19 = vsyncpa [#allocation6 + $0x1], 0  ;;  %s7120_s0 = smov 0   ;;  %s7122_s21 = smov 0  }
   0x6   :  { %s7124_s22 = smov 0   ;;  %s7126_s23 = smov 0  }
   0x7 LB: > { %s7074_s24 = smov [#allocation7]   ;;  %s7141_s26 = sadd.s32 4294967295, %s7072_s23   ;;  %s7072_s23 = sphi %s7126_s23, %s7545_s23   ;;  %s7068_s22 = sphi %s7124_s22, %s7544_s22   ;;  %s7064_s21 = sphi %s7122_s21, %s7543_s21   ;;  %s7060_s0 = sphi %s7120_s0, %s7542_s0  }
   0x8   : > { %s178_s25 = sshll.u32 %s7074_s24, 4  ;;  %p5162_p0 = scmp.ge.s32.totalorder %s7072_s23, 1  ;;  %s7146_s25 = int_to_ptr.vmem [resolvable:$true] %s178_s25 }
   0x9   : > { %p7523_p1 = scmp.eq.s32.totalorder %s7141_s26, 0  ;;  %p166_p2 = scmp.lt.s32.totalorder %s7072_s23, 3 }
   0xa   : > { %s7075_s28 = smov [#allocation10]   ;;  %s7076_s7 = smov [#allocation9]  }
   0xb   : > { %p7148_p3 = pnand %p5162_p0, %p166_p2  ;;  %s202_s29 = sshll.u32 %s7075_s28, 4  ;;  %s7161_s29 = int_to_ptr.vmem [resolvable:$true] %s202_s29 }
   0xc   : > { %s7163_s8 = sshll.u32 %s7076_s7, 4  ;;  %s6856_s11 = scalar_lea.hbm %s7518_s2, 36864  ;;  %s193_s8 = int_to_ptr.vmem [resolvable:$true] %s7163_s8 }
   0xd   : > { %s7526_s27 = scalar_select %p7148_p3, 1, 0 }
   0xe   : > { %p5967_p5 = pneg %p7148_p3  ;;  %p6857_p7 = scmp.ne.s32.totalorder %s7518_s2, %s6856_s11 }
   0xf   : > { %p6863_p11 = scmp.lt.u32.totalorder %s6856_s11, %s7518_s2 }
  0x10   : > { %p7157_p6 = pnand %p5967_p5, %p7523_p1 }
  0x12   : > { %p7173_p8 = pneg %p7157_p6 }
  0x14   : > { %p6859_p9 = pnand %p7173_p8, %p6857_p7 }
  0x16   : > { %p6860_p10 = pneg %p6859_p9 }
  0x18   : > { %p6865_p12 = pnand %p6863_p11, %p6860_p10 }
  0x1a   : > { %6868 = shalt.err (!%p6865_p12)
}
  0x1b   : > { %s6869_s17 = scalar_lea.vmem %s7146_s25, 36864  ;;  %p6877_p5 = scmp.lt.s32.totalorder %s7146_s25, %s7146_s25 }
  0x1c   : > { %p6870_p13 = scmp.ne.s32.totalorder %s7146_s25, %s6869_s17  ;;  %p6878_p4 = scmp.lt.s32.totalorder %s6869_s17, %s6869_s17 }
  0x1e   : > { %p6872_p0 = pnand %p6870_p13, %p7173_p8  ;;  %p6879_p7 = por %p6878_p4, %p6877_p5 }
  0x20   : > { %p6873_p2 = pneg %p6872_p0 }
  0x22   : > { %p6880_p9 = pnand %p6879_p7, %p6873_p2 }
  0x24   : > { %6883 = shalt.err (!%p6880_p9)
}
  0x25   : > { %s7077_s18 = smov 768   ;;  %s7078_s19 = smov 48  }
  0x26   : > { %5970 = dma.hbm_to_vmem [thread:$0]  (!%p7157_p6), %s7518_s2, 36864, %s7146_s25, [#allocation8], %s7077_s18, %s7077_s18, %s7078_s19  }
  0x27   : > { %s6884_s9 = scalar_lea.hbm %s7520_s4, 36864 }
  0x28   : > { %p6885_p4 = scmp.ne.s32.totalorder %s7520_s4, %s6884_s9  ;;  %p6891_p12 = scmp.lt.u32.totalorder %s6884_s9, %s7520_s4 }
  0x2a   : > { %p6887_p10 = pnand %p6885_p4, %p7173_p8 }
  0x2c   : > { %p6888_p11 = pneg %p6887_p10 }
  0x2e   : > { %p6893_p13 = pnand %p6891_p12, %p6888_p11 }
  0x30   : > { %6896 = shalt.err (!%p6893_p13)
}
  0x31   : > { %s6897_s25 = scalar_lea.vmem %s7161_s29, 36864  ;;  %p6905_p7 = scmp.lt.s32.totalorder %s7161_s29, %s7161_s29 }
  0x32   : > { %p6898_p0 = scmp.ne.s32.totalorder %s7161_s29, %s6897_s25  ;;  %p6906_p9 = scmp.lt.s32.totalorder %s6897_s25, %s6897_s25 }
  0x34   : > { %p6900_p2 = pnand %p6898_p0, %p7173_p8  ;;  %p6907_p4 = por %p6906_p9, %p6905_p7 }
  0x36   : > { %p6901_p5 = pneg %p6900_p2 }
  0x38   : > { %p6908_p10 = pnand %p6907_p4, %p6901_p5 }
  0x3a   : > { %6911 = shalt.err (!%p6908_p10)
}
  0x3b   : > { %s7079_s15 = smov 192   ;;  %s7080_s16 = smov 12  }
  0x3c   : > { %5976 = dma.hbm_to_vmem [thread:$0]  (!%p7157_p6), %s7520_s4, 36864, %s7161_s29, [#allocation11], %s7079_s15, %s7079_s15, %s7080_s16  }
  0x3d   : > { %s6912_s24 = scalar_lea.hbm %s7519_s3, 192 }
  0x3e   : > { %p6913_p11 = scmp.ne.s32.totalorder %s7519_s3, %s6912_s24  ;;  %p6919_p0 = scmp.lt.u32.totalorder %s6912_s24, %s7519_s3 }
  0x40   : > { %p6915_p12 = pnand %p6913_p11, %p7173_p8 }
  0x42   : > { %p6916_p13 = pneg %p6915_p12 }
  0x44   : > { %p6921_p2 = pnand %p6919_p0, %p6916_p13 }
  0x46   : > { %6924 = shalt.err (!%p6921_p2)
}
  0x47   : > { %s6925_s11 = scalar_lea.vmem %s193_s8, 192  ;;  %p6933_p4 = scmp.lt.s32.totalorder %s193_s8, %s193_s8 }
  0x48   : > { %p6926_p5 = scmp.ne.s32.totalorder %s193_s8, %s6925_s11  ;;  %p6934_p10 = scmp.lt.s32.totalorder %s6925_s11, %s6925_s11 }
  0x4a   : > { %p6928_p7 = pnand %p6926_p5, %p7173_p8  ;;  %p6935_p1 = por %p6934_p10, %p6933_p4 }
  0x4c   : > { %p6929_p9 = pneg %p6928_p7 }
  0x4e   : > { %p6936_p3 = pnand %p6935_p1, %p6929_p9 }
  0x50   : > { %6939 = shalt.err (!%p6936_p3)
}
  0x51   : > { %5973 = dma.hbm_to_vmem [thread:$0]  (!%p7157_p6), %s7519_s3, 192, %s193_s8, [#allocation8]  }
  0x52   : > { %s7081_s13 = smov [#allocation12]   ;;  %s6940_s17 = scalar_lea.hbm %s7521_s5, 48 }
  0x53   : > { %s216_s25 = sshll.u32 %s7081_s13, 4  ;;  %p6941_p11 = scmp.ne.s32.totalorder %s7521_s5, %s6940_s17  ;;  %s217_s25 = int_to_ptr.vmem [resolvable:$true] %s216_s25 }
  0x54   : > { %p6947_p12 = scmp.lt.u32.totalorder %s6940_s17, %s7521_s5 }
  0x55   : > { %p6943_p1 = pnand %p6941_p11, %p7173_p8 }
  0x57   : > { %p6944_p3 = pneg %p6943_p1 }
  0x59   : > { %p6949_p13 = pnand %p6947_p12, %p6944_p3 }
  0x5b   : > { %6952 = shalt.err (!%p6949_p13)
}
  0x5c   : > { %s6953_s8 = scalar_lea.vmem %s217_s25, 48  ;;  %s6960_s28 = scalar_lea.vmem %s217_s25, 64 }
  0x5d   : > { %p6954_p0 = scmp.ne.s32.totalorder %s217_s25, %s6953_s8  ;;  %p6961_p7 = scmp.lt.s32.totalorder %s217_s25, %s217_s25 }
  0x5e   : > { %p6962_p9 = scmp.lt.s32.totalorder %s6960_s28, %s6953_s8 }
  0x5f   : > { %p6956_p2 = pnand %p6954_p0, %p7173_p8 }
  0x60   : > { %p6963_p4 = por %p6962_p9, %p6961_p7 }
  0x61   : > { %p6957_p5 = pneg %p6956_p2 }
  0x63   : > { %p6964_p10 = pnand %p6963_p4, %p6957_p5 }
  0x65   : > { %6967 = shalt.err (!%p6964_p10)
}
  0x66   : > { %5979 = dma.hbm_to_vmem [thread:$0]  (!%p7157_p6), %s7521_s5, 48, %s217_s25, [#allocation11]  }
  0x67   : > { %s5161_s14 = sadd.s32 4294967294, %s7072_s23   ;;  %s7256_s30 = sadd.s32 1, %s7072_s23  }
  0x68   : > { %s29_s10 = ssub.s32 %s7072_s23, %s7256_s30  ;;  %s32_s11 = sadd.s32 1, %s7068_s22 }
  0x69   : > { %p30_p8 = scmp.eq.s32.totalorder %s29_s10, 0  ;;  %p39_p11 = scmp.ne.s32.totalorder %s7068_s22, %s7064_s21 }
  0x6a   : > { %p40_p1 = scmp.eq.s32.totalorder %s7072_s23, 0  ;;  %p45_p3 = scmp.ne.s32.totalorder %s7064_s21, %s7060_s0 }
  0x6b   : > { %s7267_s29 = scalar_select %p30_p8, %s7068_s22, %s32_s11  }
  0x6c   : > { %p41_p12 = por %p40_p1, %p39_p11  ;;  %p7529_p13 = scmp.eq.s32.totalorder %s7141_s26, 0 }
  0x6d   : > { %p153_p6 = scmp.eq.s32.totalorder %s7141_s26, 1  ;;  %p159_p2 = scmp.eq.s32.totalorder %s5161_s14, 1 }
  0x6e   : > { %p7271_p0 = por %p7529_p13, %p45_p3  ;;  %p5992_p5 = scmp.lt.s32.totalorder %s7072_s23, 2 }
  0x6f   : > { %s227_s13 = sand.u32 1, %s7068_s22   ;;  %p7278_p7 = por %p153_p6, %p39_p11 }
  0x70   : > { %p7282_p9 = por %p159_p2, %p45_p3  ;;  %s5943_s16 = smul.u32 24, %s227_s13 }
  0x71   : > { %s7531_s25 = scalar_select %p7278_p7, 1, 0 }
  0x72   : > { %s7532_s15 = scalar_select %p7282_p9, 1, 0 }
  0x73   : > { %s5944_s17 = smul.u32 384, %s7072_s23  ;;  %p7287_p4 = pnand %p5992_p5, %p41_p12 }
  0x74   : > { %s231_s8 = scalar_lea.vmem [#allocation4], %s5943_s16  ;;  %s228_s7 = scalar_lea.sflag [#allocation5], %s227_s13 }
  0x75   : > { %s7294_s24 = scalar_lea.hbm %s7517_s1, %s5944_s17  ;;  %s239_s28 = sshll.u32 %s231_s8, 4  ;;  %s7296_s28 = int_to_ptr.vmem [resolvable:$true] %s239_s28 }
  0x76   : > { %s6968_s9 = scalar_lea.hbm %s7294_s24, 384  ;;  %p6970_p8 = pneg %p7287_p4 }
  0x77   : > { %p6969_p10 = scmp.ne.s32.totalorder %s7294_s24, %s6968_s9  ;;  %s6973_s11 = scalar_lea.hbm %s7517_s1, 768 }
  0x78   : > { %p6974_p3 = scmp.lt.u32.totalorder %s7294_s24, %s7517_s1  ;;  %p6975_p12 = scmp.lt.u32.totalorder %s6973_s11, %s6968_s9 }
  0x79   : > { %p6971_p11 = pnand %p6970_p8, %p6969_p10  ;;  %p6977_p6 = scmp.lt.u32.totalorder %s6968_s9, %s7294_s24 }
  0x7a   : > { %p6976_p13 = por %p6975_p12, %p6974_p3 }
  0x7b   : > { %p6972_p1 = pneg %p6971_p11 }
  0x7c   : > { %p6978_p2 = por %p6977_p6, %p6976_p13 }
  0x7e   : > { %p6979_p5 = pnand %p6978_p2, %p6972_p1 }
  0x80   : > { %6982 = shalt.err (!%p6979_p5)
}
  0x81   : > { %s6983_s13 = scalar_lea.vmem %s7296_s28, 384  ;;  %s7082_s16 = smov [#allocation4]  }
  0x82   : > { %p6984_p10 = scmp.ne.s32.totalorder %s7296_s28, %s6983_s13  ;;  %s6988_s20 = sshll.u32 %s7082_s16, 4  ;;  %s6989_s20 = int_to_ptr.vmem [resolvable:$false] %s6988_s20 }
  0x83   : > { %s6990_s8 = scalar_lea.vmem %s6989_s20, 768  ;;  %p6991_p7 = scmp.lt.s32.totalorder %s7296_s28, %s6989_s20 }
  0x84   : > { %p6986_p11 = pnand %p6984_p10, %p6970_p8  ;;  %p6992_p3 = scmp.lt.s32.totalorder %s6990_s8, %s6983_s13 }
  0x86   : > { %p6987_p9 = pneg %p6986_p11  ;;  %p6993_p12 = por %p6992_p3, %p6991_p7 }
  0x88   : > { %p6994_p13 = pnand %p6993_p12, %p6987_p9 }
  0x8a   : > { %6997 = shalt.err (!%p6994_p13)
}
  0x8b   : > { %5983 = dma.hbm_to_vmem [thread:$0]  (!%p7287_p4), %s7294_s24, 384, %s7296_s28, %s228_s7  }
  0x8c   : > { %p7534_p1 = scmp.ne.s32.totalorder %s7526_s27, 0 }
  0x8d   : > { %s7326_s9 = sand.u32 (!%p7534_p1), 1, %s7064_s21  }
  0x8e   : > { %248 = sbr.rel (%p7534_p1) target bundleno = 1054 (0x41e), region = 40  ;;  %s251_s10 = scalar_lea.sflag (!%p7534_p1), [#allocation5], %s7326_s9 }
  0x8f   : > { %s5945_s14 = smul.u32 (!%p7534_p1), 24, %s7326_s9 }
  0x91   : > { %s7332_s11 = scalar_lea.vmem (!%p7534_p1), [#allocation4], %s5945_s14 }
  0x95   : > { %7043 = dma.done.wait (%p7271_p0), %s251_s10, 384  }
  0x96   : > { %7045 = vsyncadd (%p7271_p0), %s251_s10, 4294966912  ;;  %p7535_p7 = scmp.eq.s32.totalorder %s7141_s26, 0 }
  0x98   : > { %7047 = dma.done.wait (%p7535_p7), [#allocation8], 37056   ;;  %p7536_p9 = pmov %p7535_p7 }
  0x99   : > { %p7537_p4 = pmov %p7535_p7 }
  0x9a   : > { %7049 = vsyncadd (%p7536_p9), [#allocation8], 4294930240 }
  0x9b   : > { %7051 = dma.done.wait (%p7537_p4), [#allocation11], 36912   ;;  %p7538_p8 = pmov %p7537_p4 }
  0x9c   : > { %v6039_v0 = vld [vmem:[#allocation7 + $0x4] ss:$48 sps:$4 sm:$0xff]   ;;  %v6041_v1 = vld [vmem:[#allocation7] ss:$48 sps:$4 sm:$0xff]   ;;  %s296_s27 = scalar_lea.vmem [#allocation13], %s5945_s14  ;;  %s5946_s12 = smul.u32 384, %s7141_s26 }
  0x9d   : > { %7053 = vsyncadd (%p7538_p8), [#allocation11], 4294930384  ;;  %2096 = vmatprep.subr.bf16.mxu1 %v6039_v0  ;;  %v6042_v2 = vld [vmem:[#allocation7 + $0x64] ss:$48 sps:$4 sm:$0xff]   ;;  %v6044_v3 = vld [vmem:[#allocation7 + $0x60] ss:$48 sps:$4 sm:$0xff]  }
  0x9e   : > { %2097 = vmatpush1.bf16.msra.mxu1 %v6041_v1  ;;  %v6045_v4 = vld [vmem:[#allocation7 + $0xc4] ss:$48 sps:$4 sm:$0xff]   ;;  %v6047_v5 = vld [vmem:[#allocation7 + $0xc0] ss:$48 sps:$4 sm:$0xff]   ;;  %v7083_v1 = vmov 0   ;;  %s5053_s18 = sshll.u32 %s296_s27, 4  ;;  %s7472_s7 = scalar_lea.hbm %s7522_s6, %s5946_s12  ;;  %s7474_s18 = int_to_ptr.vmem [resolvable:$true] %s5053_s18 }
  0x9f   : > { %2098 = vmatprep.subr.bf16.mxu1 %v6042_v2  ;;  %v6048_v6 = vld [vmem:[#allocation7 + $0x124] ss:$48 sps:$4 sm:$0xff]   ;;  %v6050_v7 = vld [vmem:[#allocation7 + $0x120] ss:$48 sps:$4 sm:$0xff]   ;;  %s5039_s26 = scalar_lea.sflag [#allocation6], %s7326_s9  ;;  %s6998_s17 = scalar_lea.vmem %s7474_s18, 384 }
  0xa0   : > { %v6051_v8 = vld [vmem:[#allocation7 + $0x184] ss:$48 sps:$4 sm:$0xff]   ;;  %v6053_v9 = vld [vmem:[#allocation7 + $0x180] ss:$48 sps:$4 sm:$0xff]   ;;  %p6999_p0 = scmp.ne.s32.totalorder %s7474_s18, %s6998_s17  ;;  %p7539_p6 = scmp.ne.s32.totalorder %s7531_s25, 0 }
  0xa1   : > { %v6054_v10 = vld [vmem:[#allocation7 + $0x1e4] ss:$48 sps:$4 sm:$0xff]   ;;  %v6056_v11 = vld [vmem:[#allocation7 + $0x1e0] ss:$48 sps:$4 sm:$0xff]   ;;  %s7084_s19 = smov [#allocation13]  }
  0xa2   : > { %2099 = vmatpush1.bf16.msra.mxu1 %v6044_v3  ;;  %v6057_v12 = vld [vmem:[#allocation7 + $0x244] ss:$48 sps:$4 sm:$0xff]   ;;  %v6086_v14 = vld [vmem:[#allocation7 + $0x10] ss:$48 sps:$4 sm:$0xff]   ;;  %p7000_p2 = pnand %p6999_p0, %p7539_p6  ;;  %s7002_s13 = sshll.u32 %s7084_s19, 4  ;;  %s7003_s13 = int_to_ptr.vmem [resolvable:$false] %s7002_s13 }
  0xa3   : > { %2100 = vmatprep.subr.bf16.mxu1 %v6045_v4  ;;  %v6084_v13 = vld [vmem:[#allocation7 + $0x14] ss:$48 sps:$4 sm:$0xff]   ;;  %v6059_v15 = vld [vmem:[#allocation7 + $0x240] ss:$48 sps:$4 sm:$0xff]   ;;  %s7004_s16 = scalar_lea.vmem %s7003_s13, 768  ;;  %p7005_p10 = scmp.lt.s32.totalorder %s7474_s18, %s7003_s13 }
  0xa4   : > { %v6060_v16 = vld [vmem:[#allocation7 + $0x2a4] ss:$48 sps:$4 sm:$0xff]   ;;  %2260 = vmatprep.subr.bf16.mxu0 %v6084_v13  ;;  %v6092_v18 = vld [vmem:[#allocation7 + $0x70] ss:$48 sps:$4 sm:$0xff]   ;;  %p7001_p5 = pneg %p7000_p2  ;;  %p7006_p11 = scmp.lt.s32.totalorder %s7004_s16, %s6998_s17 }
  0xa5   : > { %2261 = vmatpush1.bf16.msra.mxu0 %v6086_v14  ;;  %v6090_v17 = vld [vmem:[#allocation7 + $0x74] ss:$48 sps:$4 sm:$0xff]   ;;  %v6062_v20 = vld [vmem:[#allocation7 + $0x2a0] ss:$48 sps:$4 sm:$0xff]  }
  0xa6   : > { %2101 = vmatpush1.bf16.msra.mxu1 %v6047_v5  ;;  %v299_v19 = vld [vmem:[%s7332_s11 + $0x8] sm:$0xff]  ;;  %2262 = vmatprep.subr.bf16.mxu0 %v6090_v17  ;;  %v298_v55 = vld [vmem:[%s7332_s11] sm:$0xff]  ;;  %p7007_p3 = por %p7006_p11, %p7005_p10 }
  0xa7   : > { %2102 = vmatprep.subr.bf16.mxu1 %v6048_v6  ;;  %v7347_v21 = vpack.c.bf16 %v299_v19, %v299_v19  ;;  %v6096_v22 = vld [vmem:[#allocation7 + $0xd4] ss:$48 sps:$4 sm:$0xff]   ;;  %v6098_v23 = vld [vmem:[#allocation7 + $0xd0] ss:$48 sps:$4 sm:$0xff]   ;;  %v7352_v59 = vpack.c.bf16 %v298_v55, %v298_v55 }
  0xa8   : > { %v6063_v24 = vld [vmem:[#allocation7 + $0x304] ss:$48 sps:$4 sm:$0xff]   ;;  %v6065_v26 = vld [vmem:[#allocation7 + $0x300] ss:$48 sps:$4 sm:$0xff]   ;;  %p7008_p12 = pnand %p7007_p3, %p7001_p5 }
  0xa9   : > { %2263 = vmatpush1.bf16.msra.mxu0 %v6092_v18  ;;  %2128 = vmatprep.mubr.bf16.mxu1 %v7347_v21  ;;  %v6102_v25 = vld [vmem:[#allocation7 + $0x134] ss:$48 sps:$4 sm:$0xff]   ;;  %v6104_v27 = vld [vmem:[#allocation7 + $0x130] ss:$48 sps:$4 sm:$0xff]  }
  0xaa   : > { %2103 = vmatpush1.bf16.msra.mxu1 %v6050_v7  ;;  %2264 = vmatprep.subr.bf16.mxu0 %v6096_v22  ;;  %v6066_v28 = vld [vmem:[#allocation7 + $0x364] ss:$48 sps:$4 sm:$0xff]   ;;  %v6068_v30 = vld [vmem:[#allocation7 + $0x360] ss:$48 sps:$4 sm:$0xff]  }
  0xab   : > { %2104 = vmatprep.subr.bf16.mxu1 %v6051_v8  ;;  %2292 = vmatprep.mubr.bf16.mxu0 %v7347_v21  ;;  %v6108_v29 = vld [vmem:[#allocation7 + $0x194] ss:$48 sps:$4 sm:$0xff]   ;;  %v6110_v31 = vld [vmem:[#allocation7 + $0x190] ss:$48 sps:$4 sm:$0xff]  }
  0xac   : > { %v6069_v32 = vld [vmem:[#allocation7 + $0x3c4] ss:$48 sps:$4 sm:$0xff]   ;;  %v6071_v34 = vld [vmem:[#allocation7 + $0x3c0] ss:$48 sps:$4 sm:$0xff]  }
  0xad   : > { %2265 = vmatpush1.bf16.msra.mxu0 %v6098_v23  ;;  %v6114_v33 = vld [vmem:[#allocation7 + $0x1f4] ss:$48 sps:$4 sm:$0xff]   ;;  %v6116_v35 = vld [vmem:[#allocation7 + $0x1f0] ss:$48 sps:$4 sm:$0xff]  }
  0xae   : > { %2105 = vmatpush1.bf16.msra.mxu1 %v6053_v9  ;;  %2266 = vmatprep.subr.bf16.mxu0 %v6102_v25  ;;  %v6072_v36 = vld [vmem:[#allocation7 + $0x424] ss:$48 sps:$4 sm:$0xff]   ;;  %v6074_v38 = vld [vmem:[#allocation7 + $0x420] ss:$48 sps:$4 sm:$0xff]  }
  0xaf   : > { %2106 = vmatprep.subr.bf16.mxu1 %v6054_v10  ;;  %v6120_v37 = vld [vmem:[#allocation7 + $0x254] ss:$48 sps:$4 sm:$0xff]   ;;  %v6122_v39 = vld [vmem:[#allocation7 + $0x250] ss:$48 sps:$4 sm:$0xff]  }
  0xb0   : > { %v6075_v40 = vld [vmem:[#allocation7 + $0x484] ss:$48 sps:$4 sm:$0xff]   ;;  %v6077_v42 = vld [vmem:[#allocation7 + $0x480] ss:$48 sps:$4 sm:$0xff]  }
  0xb1   : > { %2267 = vmatpush1.bf16.msra.mxu0 %v6104_v27  ;;  %v6126_v41 = vld [vmem:[#allocation7 + $0x2b4] ss:$48 sps:$4 sm:$0xff]   ;;  %v6128_v43 = vld [vmem:[#allocation7 + $0x2b0] ss:$48 sps:$4 sm:$0xff]  }
  0xb2   : > { %2107 = vmatpush1.bf16.msra.mxu1 %v6056_v11  ;;  %2268 = vmatprep.subr.bf16.mxu0 %v6108_v29  ;;  %v6078_v44 = vld [vmem:[#allocation7 + $0x4e4] ss:$48 sps:$4 sm:$0xff]   ;;  %v6080_v46 = vld [vmem:[#allocation7 + $0x4e0] ss:$48 sps:$4 sm:$0xff]  }
  0xb3   : > { %2108 = vmatprep.subr.bf16.mxu1 %v6057_v12  ;;  %v6132_v45 = vld [vmem:[#allocation7 + $0x314] ss:$48 sps:$4 sm:$0xff]   ;;  %v6134_v47 = vld [vmem:[#allocation7 + $0x310] ss:$48 sps:$4 sm:$0xff]  }
  0xb4   : > { %v6081_v48 = vld [vmem:[#allocation7 + $0x544] ss:$48 sps:$4 sm:$0xff]   ;;  %v6083_v50 = vld [vmem:[#allocation7 + $0x540] ss:$48 sps:$4 sm:$0xff]  }
  0xb5   : > { %2269 = vmatpush1.bf16.msra.mxu0 %v6110_v31  ;;  %v6138_v49 = vld [vmem:[#allocation7 + $0x374] ss:$48 sps:$4 sm:$0xff]   ;;  %v6140_v51 = vld [vmem:[#allocation7 + $0x370] ss:$48 sps:$4 sm:$0xff]  }
  0xb6   : > { %2109 = vmatpush1.bf16.msra.mxu1 %v6059_v15  ;;  %2270 = vmatprep.subr.bf16.mxu0 %v6114_v33  ;;  %v6087_v52 = vld [vmem:[#allocation7 + $0x5a4] ss:$48 sps:$4 sm:$0xff]   ;;  %v6089_v54 = vld [vmem:[#allocation7 + $0x5a0] ss:$48 sps:$4 sm:$0xff]   ;;  %v6149_v33 = vld [vmem:[#allocation7 + $0x6c] ss:$48 sps:$4 sm:$0xff]  }
  0xb7   : > { %2110 = vmatprep.subr.bf16.mxu1 %v6060_v16  ;;  %v6144_v53 = vld [vmem:[#allocation7 + $0x3d4] ss:$48 sps:$4 sm:$0xff]   ;;  %v6146_v56 = vld [vmem:[#allocation7 + $0x3d0] ss:$48 sps:$4 sm:$0xff]  }
  0xb8   : > { %v6095_v57 = vld [vmem:[#allocation7 + $0x604] ss:$48 sps:$4 sm:$0xff]   ;;  %v6093_v60 = vld [vmem:[#allocation7 + $0x600] ss:$48 sps:$4 sm:$0xff]  }
  0xb9   : > { %2271 = vmatpush1.bf16.msra.mxu0 %v6116_v35  ;;  %v6150_v58 = vld [vmem:[#allocation7 + $0x434] ss:$48 sps:$4 sm:$0xff]   ;;  %v6152_v62 = vld [vmem:[#allocation7 + $0x430] ss:$48 sps:$4 sm:$0xff]  }
  0xba   : > { %2111 = vmatpush1.bf16.msra.mxu1 %v6062_v20  ;;  %2272 = vmatprep.subr.bf16.mxu0 %v6120_v37  ;;  %v6101_v61 = vld [vmem:[#allocation7 + $0x664] ss:$48 sps:$4 sm:$0xff]   ;;  %v6099_v0 = vld [vmem:[#allocation7 + $0x660] ss:$48 sps:$4 sm:$0xff]   ;;  %v6155_v37 = vld [vmem:[#allocation7 + $0xcc] ss:$48 sps:$4 sm:$0xff]  }
  0xbb   : > { %2112 = vmatprep.subr.bf16.mxu1 %v6063_v24  ;;  %v6156_v63 = vld [vmem:[#allocation7 + $0x494] ss:$48 sps:$4 sm:$0xff]   ;;  %v6158_v3 = vld [vmem:[#allocation7 + $0x490] ss:$48 sps:$4 sm:$0xff]  }
  0xbc   : > { %v6107_v2 = vld [vmem:[#allocation7 + $0x6c4] ss:$48 sps:$4 sm:$0xff]   ;;  %v6105_v5 = vld [vmem:[#allocation7 + $0x6c0] ss:$48 sps:$4 sm:$0xff]  }
  0xbd   : > { %2273 = vmatpush1.bf16.msra.mxu0 %v6122_v39  ;;  %v6162_v4 = vld [vmem:[#allocation7 + $0x4f4] ss:$48 sps:$4 sm:$0xff]   ;;  %v6164_v7 = vld [vmem:[#allocation7 + $0x4f0] ss:$48 sps:$4 sm:$0xff]  }
  0xbe   : > { %2113 = vmatpush1.bf16.msra.mxu1 %v6065_v26  ;;  %2274 = vmatprep.subr.bf16.mxu0 %v6126_v41  ;;  %v6113_v6 = vld [vmem:[#allocation7 + $0x724] ss:$48 sps:$4 sm:$0xff]   ;;  %v6111_v9 = vld [vmem:[#allocation7 + $0x720] ss:$48 sps:$4 sm:$0xff]   ;;  %v6161_v41 = vld [vmem:[#allocation7 + $0x12c] ss:$48 sps:$4 sm:$0xff]  }
  0xbf   : > { %2114 = vmatprep.subr.bf16.mxu1 %v6066_v28  ;;  %v6168_v8 = vld [vmem:[#allocation7 + $0x554] ss:$48 sps:$4 sm:$0xff]   ;;  %v6170_v11 = vld [vmem:[#allocation7 + $0x550] ss:$48 sps:$4 sm:$0xff]   ;;  %v6143_v28 = vld [vmem:[#allocation7 + $0xc] ss:$48 sps:$4 sm:$0xff]  }
  0xc0   : > { %v6119_v10 = vld [vmem:[#allocation7 + $0x784] ss:$48 sps:$4 sm:$0xff]   ;;  %v6117_v13 = vld [vmem:[#allocation7 + $0x780] ss:$48 sps:$4 sm:$0xff]  }
  0xc1   : > { %2275 = vmatpush1.bf16.msra.mxu0 %v6128_v43  ;;  %v6174_v12 = vld [vmem:[#allocation7 + $0x5b4] ss:$48 sps:$4 sm:$0xff]   ;;  %v6176_v15 = vld [vmem:[#allocation7 + $0x5b0] ss:$48 sps:$4 sm:$0xff]  }
  0xc2   : > { %2115 = vmatpush1.bf16.msra.mxu1 %v6068_v30  ;;  %2276 = vmatprep.subr.bf16.mxu0 %v6132_v45  ;;  %v6125_v14 = vld [vmem:[#allocation7 + $0x7e4] ss:$48 sps:$4 sm:$0xff]   ;;  %v6123_v17 = vld [vmem:[#allocation7 + $0x7e0] ss:$48 sps:$4 sm:$0xff]   ;;  %v6167_v45 = vld [vmem:[#allocation7 + $0x18c] ss:$48 sps:$4 sm:$0xff]  }
  0xc3   : > { %2116 = vmatprep.subr.bf16.mxu1 %v6069_v32  ;;  %v6182_v16 = vld [vmem:[#allocation7 + $0x614] ss:$48 sps:$4 sm:$0xff]   ;;  %v6180_v19 = vld [vmem:[#allocation7 + $0x610] ss:$48 sps:$4 sm:$0xff]   ;;  %v6141_v32 = vld [vmem:[#allocation7 + $0x8] ss:$48 sps:$4 sm:$0xff]  }
  0xc4   : > { %v6131_v18 = vld [vmem:[#allocation7 + $0x844] ss:$48 sps:$4 sm:$0xff]   ;;  %v6129_v22 = vld [vmem:[#allocation7 + $0x840] ss:$48 sps:$4 sm:$0xff]  }
  0xc5   : > { %2277 = vmatpush1.bf16.msra.mxu0 %v6134_v47  ;;  %v6188_v20 = vld [vmem:[#allocation7 + $0x674] ss:$48 sps:$4 sm:$0xff]   ;;  %v6186_v24 = vld [vmem:[#allocation7 + $0x670] ss:$48 sps:$4 sm:$0xff]  }
  0xc6   : > { %2117 = vmatpush1.bf16.msra.mxu1 %v6071_v34  ;;  %2278 = vmatprep.subr.bf16.mxu0 %v6138_v49  ;;  %v6137_v23 = vld [vmem:[#allocation7 + $0x8a4] ss:$48 sps:$4 sm:$0xff]   ;;  %v6135_v26 = vld [vmem:[#allocation7 + $0x8a0] ss:$48 sps:$4 sm:$0xff]   ;;  %v6173_v49 = vld [vmem:[#allocation7 + $0x1ec] ss:$48 sps:$4 sm:$0xff]  }
  0xc7   : > { %2118 = vmatprep.subr.bf16.mxu1 %v6072_v36  ;;  %v6194_v25 = vld [vmem:[#allocation7 + $0x6d4] ss:$48 sps:$4 sm:$0xff]   ;;  %v6192_v29 = vld [vmem:[#allocation7 + $0x6d0] ss:$48 sps:$4 sm:$0xff]   ;;  %v6147_v36 = vld [vmem:[#allocation7 + $0x68] ss:$48 sps:$4 sm:$0xff]  }
  0xc8   : > { %v300_v27 = vld [vmem:[%s7332_s11 + $0x10] sm:$0xff] }
  0xc9   : > { %2279 = vmatpush1.bf16.msra.mxu0 %v6140_v51  ;;  %v6200_v30 = vld [vmem:[#allocation7 + $0x734] ss:$48 sps:$4 sm:$0xff]   ;;  %v7359_v31 = vpack.c.bf16 %v300_v27, %v300_v27  ;;  %v6198_v34 = vld [vmem:[#allocation7 + $0x730] ss:$48 sps:$4 sm:$0xff]   ;;  %v6225_v27 = vld [vmem:[#allocation7 + $0x548] ss:$48 sps:$4 sm:$0xff]  }
  0xca   : > { %2119 = vmatpush1.bf16.msra.mxu1 %v6074_v38  ;;  %2280 = vmatprep.subr.bf16.mxu0 %v6144_v53  ;;  %v6206_v35 = vld [vmem:[#allocation7 + $0x794] ss:$48 sps:$4 sm:$0xff]   ;;  %v6204_v38 = vld [vmem:[#allocation7 + $0x790] ss:$48 sps:$4 sm:$0xff]   ;;  %v6179_v53 = vld [vmem:[#allocation7 + $0x24c] ss:$48 sps:$4 sm:$0xff]  }
  0xcb   : > { %2120 = vmatprep.subr.bf16.mxu1 %v6075_v40  ;;  %v6212_v39 = vld [vmem:[#allocation7 + $0x7f4] ss:$48 sps:$4 sm:$0xff]   ;;  %v6153_v40 = vld [vmem:[#allocation7 + $0xc8] ss:$48 sps:$4 sm:$0xff]  }
  0xcc   : > { %v6218_v43 = vld [vmem:[#allocation7 + $0x854] ss:$48 sps:$4 sm:$0xff]  }
  0xcd   : > { %2281 = vmatpush1.bf16.msra.mxu0 %v6146_v56  ;;  %v6224_v47 = vld [vmem:[#allocation7 + $0x8b4] ss:$48 sps:$4 sm:$0xff]   ;;  %v6177_v56 = vld [vmem:[#allocation7 + $0x248] ss:$48 sps:$4 sm:$0xff]  }
  0xce   : > { %2121 = vmatpush1.bf16.msra.mxu1 %v6077_v42  ;;  %2282 = vmatprep.subr.bf16.mxu0 %v6150_v58  ;;  %v6210_v42 = vld [vmem:[#allocation7 + $0x7f0] ss:$48 sps:$4 sm:$0xff]   ;;  %v6230_v51 = vld [vmem:[#allocation7 + $0x24] ss:$48 sps:$4 sm:$0xff]  }
  0xcf   : > { %2122 = vmatprep.subr.bf16.mxu1 %v6078_v44  ;;  %v6159_v44 = vld [vmem:[#allocation7 + $0x128] ss:$48 sps:$4 sm:$0xff]   ;;  %v6236_v55 = vld [vmem:[#allocation7 + $0x84] ss:$48 sps:$4 sm:$0xff]   ;;  %v6234_v58 = vld [vmem:[#allocation7 + $0x80] ss:$48 sps:$4 sm:$0xff]  }
  0xd1   : > { %2283 = vmatpush1.bf16.msra.mxu0 %v6152_v62  ;;  %v6191_v62 = vld [vmem:[#allocation7 + $0x30c] ss:$48 sps:$4 sm:$0xff]  }
  0xd2   : > { %2123 = vmatpush1.bf16.msra.mxu1 %v6080_v46  ;;  %2284 = vmatprep.subr.bf16.mxu0 %v6156_v63  ;;  %v6216_v46 = vld [vmem:[#allocation7 + $0x850] ss:$48 sps:$4 sm:$0xff]  }
  0xd3   : > { %2124 = vmatprep.subr.bf16.mxu1 %v6081_v48  ;;  %v6165_v48 = vld [vmem:[#allocation7 + $0x188] ss:$48 sps:$4 sm:$0xff]   ;;  %v6240_v63 = vld [vmem:[#allocation7 + $0xe0] ss:$48 sps:$4 sm:$0xff]  }
  0xd5   : > { %2285 = vmatpush1.bf16.msra.mxu0 %v6158_v3  ;;  %v6197_v3 = vld [vmem:[#allocation7 + $0x36c] ss:$48 sps:$4 sm:$0xff]  }
  0xd6   : > { %2125 = vmatpush1.bf16.msra.mxu1 %v6083_v50  ;;  %2286 = vmatprep.subr.bf16.mxu0 %v6162_v4  ;;  %v6222_v50 = vld [vmem:[#allocation7 + $0x8b0] ss:$48 sps:$4 sm:$0xff]  }
  0xd7   : > { %2126 = vmatprep.subr.bf16.mxu1 %v6087_v52  ;;  %v6171_v52 = vld [vmem:[#allocation7 + $0x1e8] ss:$48 sps:$4 sm:$0xff]   ;;  %v6246_v4 = vld [vmem:[#allocation7 + $0x140] ss:$48 sps:$4 sm:$0xff]  }
  0xd9   : > { %2287 = vmatpush1.bf16.msra.mxu0 %v6164_v7  ;;  %v6203_v7 = vld [vmem:[#allocation7 + $0x3cc] ss:$48 sps:$4 sm:$0xff]  }
  0xda   : > { %2127 = vmatpush1.bf16.msra.mxu1 %v6089_v54  ;;  %2288 = vmatprep.subr.bf16.mxu0 %v6168_v8  ;;  %v6228_v54 = vld [vmem:[#allocation7 + $0x20] ss:$48 sps:$4 sm:$0xff]  }
  0xdb   : > { %2137 = vmatprep.subr.bf16.mxu1 %v6095_v57  ;;  %v6185_v57 = vld [vmem:[#allocation7 + $0x2ac] ss:$48 sps:$4 sm:$0xff]   ;;  %v6252_v8 = vld [vmem:[#allocation7 + $0x1a0] ss:$48 sps:$4 sm:$0xff]  }
  0xdd   : > { %2129 = vmatmul.mubr.bf16.vlgmr.msra.gmra.mrb[0].mxu1 %v7352_v59  ;;  %2289 = vmatpush1.bf16.msra.mxu0 %v6170_v11  ;;  %v6209_v11 = vld [vmem:[#allocation7 + $0x42c] ss:$48 sps:$4 sm:$0xff]  }
  0xde   : > { %2138 = vmatpush1.bf16.msra.mxu1 %v6093_v60  ;;  %2169 = vmatprep.mubr.bf16.mxu1 %v7083_v1  ;;  %v6242_v60 = vld [vmem:[#allocation7 + $0xe4] ss:$48 sps:$4 sm:$0xff]  }
  0xdf   : > { %2139 = vmatprep.subr.bf16.mxu1 %v6101_v61  ;;  %2290 = vmatprep.subr.bf16.mxu0 %v6174_v12  ;;  %v6183_v61 = vld [vmem:[#allocation7 + $0x2a8] ss:$48 sps:$4 sm:$0xff]   ;;  %v6258_v12 = vld [vmem:[#allocation7 + $0x200] ss:$48 sps:$4 sm:$0xff]  }
  0xe1   : > { %2291 = vmatpush1.bf16.msra.mxu0 %v6176_v15  ;;  %v6215_v15 = vld [vmem:[#allocation7 + $0x48c] ss:$48 sps:$4 sm:$0xff]  }
  0xe2   : > { %2140 = vmatpush1.bf16.msra.mxu1 %v6099_v0  ;;  %2301 = vmatprep.subr.bf16.mxu0 %v6182_v16  ;;  %v6248_v0 = vld [vmem:[#allocation7 + $0x144] ss:$48 sps:$4 sm:$0xff]   ;;  %v6264_v16 = vld [vmem:[#allocation7 + $0x260] ss:$48 sps:$4 sm:$0xff]  }
  0xe3   : > { %2141 = vmatprep.subr.bf16.mxu1 %v6107_v2  ;;  %v6189_v2 = vld [vmem:[#allocation7 + $0x308] ss:$48 sps:$4 sm:$0xff]  }
  0xe4   : > { %2293 = vmatmul.mubr.bf16.vlgmr.msra.gmra.mrb[0].mxu0 %v7352_v59 }
  0xe5   : > { %2302 = vmatpush1.bf16.msra.mxu0 %v6180_v19  ;;  %2333 = vmatprep.mubr.bf16.mxu0 %v7083_v1  ;;  %v6221_v19 = vld [vmem:[#allocation7 + $0x4ec] ss:$48 sps:$4 sm:$0xff]  }
  0xe6   : > { %2142 = vmatpush1.bf16.msra.mxu1 %v6105_v5  ;;  %2303 = vmatprep.subr.bf16.mxu0 %v6188_v20  ;;  %v6254_v5 = vld [vmem:[#allocation7 + $0x1a4] ss:$48 sps:$4 sm:$0xff]   ;;  %v6270_v20 = vld [vmem:[#allocation7 + $0x2c0] ss:$48 sps:$4 sm:$0xff]  }
  0xe7   : > { %2143 = vmatprep.subr.bf16.mxu1 %v6113_v6  ;;  %v6195_v6 = vld [vmem:[#allocation7 + $0x368] ss:$48 sps:$4 sm:$0xff]  }
  0xe9   : > { %2304 = vmatpush1.bf16.msra.mxu0 %v6186_v24  ;;  %v6227_v24 = vld [vmem:[#allocation7 + $0x54c] ss:$48 sps:$4 sm:$0xff]  }
  0xea   : > { %2144 = vmatpush1.bf16.msra.mxu1 %v6111_v9  ;;  %2305 = vmatprep.subr.bf16.mxu0 %v6194_v25  ;;  %v6260_v9 = vld [vmem:[#allocation7 + $0x204] ss:$48 sps:$4 sm:$0xff]   ;;  %v6276_v25 = vld [vmem:[#allocation7 + $0x320] ss:$48 sps:$4 sm:$0xff]  }
  0xeb   : > { %2145 = vmatprep.subr.bf16.mxu1 %v6119_v10  ;;  %v6201_v10 = vld [vmem:[#allocation7 + $0x3c8] ss:$48 sps:$4 sm:$0xff]  }
  0xed   : > { %2306 = vmatpush1.bf16.msra.mxu0 %v6192_v29  ;;  %v6282_v29 = vld [vmem:[#allocation7 + $0x380] ss:$48 sps:$4 sm:$0xff]  }
  0xee   : > { %2146 = vmatpush1.bf16.msra.mxu1 %v6117_v13  ;;  %2307 = vmatprep.subr.bf16.mxu0 %v6200_v30  ;;  %v6266_v13 = vld [vmem:[#allocation7 + $0x264] ss:$48 sps:$4 sm:$0xff]  }
  0xef   : > { %2147 = vmatprep.subr.bf16.mxu1 %v6125_v14  ;;  %v6207_v14 = vld [vmem:[#allocation7 + $0x428] ss:$48 sps:$4 sm:$0xff]   ;;  %v6290_v30 = vld [vmem:[#allocation7 + $0x3e4] ss:$48 sps:$4 sm:$0xff]  }
  0xf1   : > { %2308 = vmatpush1.bf16.msra.mxu0 %v6198_v34  ;;  %v6288_v34 = vld [vmem:[#allocation7 + $0x3e0] ss:$48 sps:$4 sm:$0xff]  }
  0xf2   : > { %2148 = vmatpush1.bf16.msra.mxu1 %v6123_v17  ;;  %2309 = vmatprep.subr.bf16.mxu0 %v6206_v35  ;;  %v6272_v17 = vld [vmem:[#allocation7 + $0x2c4] ss:$48 sps:$4 sm:$0xff]  }
  0xf3   : > { %2149 = vmatprep.subr.bf16.mxu1 %v6131_v18  ;;  %v6213_v18 = vld [vmem:[#allocation7 + $0x488] ss:$48 sps:$4 sm:$0xff]   ;;  %v6296_v35 = vld [vmem:[#allocation7 + $0x444] ss:$48 sps:$4 sm:$0xff]  }
  0xf5   : > { %2310 = vmatpush1.bf16.msra.mxu0 %v6204_v38  ;;  %v6294_v38 = vld [vmem:[#allocation7 + $0x440] ss:$48 sps:$4 sm:$0xff]  }
  0xf6   : > { %2150 = vmatpush1.bf16.msra.mxu1 %v6129_v22  ;;  %2311 = vmatprep.subr.bf16.mxu0 %v6212_v39  ;;  %v6278_v22 = vld [vmem:[#allocation7 + $0x324] ss:$48 sps:$4 sm:$0xff]  }
  0xf7   : > { %2151 = vmatprep.subr.bf16.mxu1 %v6137_v23  ;;  %v6219_v23 = vld [vmem:[#allocation7 + $0x4e8] ss:$48 sps:$4 sm:$0xff]   ;;  %v6302_v39 = vld [vmem:[#allocation7 + $0x4a4] ss:$48 sps:$4 sm:$0xff]  }
  0xf9   : > { %2312 = vmatpush1.bf16.msra.mxu0 %v6210_v42  ;;  %v6300_v42 = vld [vmem:[#allocation7 + $0x4a0] ss:$48 sps:$4 sm:$0xff]  }
  0xfa   : > { %2152 = vmatpush1.bf16.msra.mxu1 %v6135_v26  ;;  %2313 = vmatprep.subr.bf16.mxu0 %v6218_v43  ;;  %v6284_v26 = vld [vmem:[#allocation7 + $0x384] ss:$48 sps:$4 sm:$0xff]  }
  0xfb   : > { %2178 = vmatprep.subr.bf16.mxu1 %v6143_v28  ;;  %v6233_v28 = vld [vmem:[#allocation7 + $0x5ac] ss:$48 sps:$4 sm:$0xff]   ;;  %v6308_v43 = vld [vmem:[#allocation7 + $0x504] ss:$48 sps:$4 sm:$0xff]  }
  0xfd   : > { %2170 = vmatmul.mubr.bf16.vlgmr.msra.gmra.mrb[0].mxu1 %v7359_v31  ;;  %2314 = vmatpush1.bf16.msra.mxu0 %v6216_v46  ;;  %v6306_v46 = vld [vmem:[#allocation7 + $0x500] ss:$48 sps:$4 sm:$0xff]  }
  0xfe   : > { %2179 = vmatpush1.bf16.msra.mxu1 %v6141_v32  ;;  %2210 = vmatprep.mubr.bf16.mxu1 %v7347_v21  ;;  %v6231_v32 = vld [vmem:[#allocation7 + $0x5a8] ss:$48 sps:$4 sm:$0xff]  }
  0xff   : > { %2180 = vmatprep.subr.bf16.mxu1 %v6149_v33  ;;  %2315 = vmatprep.subr.bf16.mxu0 %v6224_v47  ;;  %v6239_v33 = vld [vmem:[#allocation7 + $0x60c] ss:$48 sps:$4 sm:$0xff]   ;;  %v6314_v47 = vld [vmem:[#allocation7 + $0x564] ss:$48 sps:$4 sm:$0xff]  }
 0x101   : > { %2316 = vmatpush1.bf16.msra.mxu0 %v6222_v50  ;;  %v6312_v50 = vld [vmem:[#allocation7 + $0x560] ss:$48 sps:$4 sm:$0xff]  }
 0x102   : > { %2181 = vmatpush1.bf16.msra.mxu1 %v6147_v36  ;;  %2424 = vmatprep.subr.bf16.mxu0 %v6230_v51  ;;  %v6237_v36 = vld [vmem:[#allocation7 + $0x608] ss:$48 sps:$4 sm:$0xff]   ;;  %v6320_v51 = vld [vmem:[#allocation7 + $0x5c4] ss:$48 sps:$4 sm:$0xff]  }
 0x103   : > { %2182 = vmatprep.subr.bf16.mxu1 %v6155_v37  ;;  %v6245_v37 = vld [vmem:[#allocation7 + $0x66c] ss:$48 sps:$4 sm:$0xff]  }
 0x104   : > { %2334 = vmatmul.mubr.bf16.vlgmr.msra.gmra.mrb[0].mxu0 %v7359_v31 }
 0x105   : > { %2425 = vmatpush1.bf16.msra.mxu0 %v6228_v54  ;;  %2456 = vmatprep.mubr.bf16.mxu0 %v7347_v21  ;;  %v6318_v54 = vld [vmem:[#allocation7 + $0x5c0] ss:$48 sps:$4 sm:$0xff]  }
 0x106   : > { %2183 = vmatpush1.bf16.msra.mxu1 %v6153_v40  ;;  %2426 = vmatprep.subr.bf16.mxu0 %v6236_v55  ;;  %v6243_v40 = vld [vmem:[#allocation7 + $0x668] ss:$48 sps:$4 sm:$0xff]   ;;  %v6326_v55 = vld [vmem:[#allocation7 + $0x624] ss:$48 sps:$4 sm:$0xff]  }
 0x107   : > { %2184 = vmatprep.subr.bf16.mxu1 %v6161_v41  ;;  %v6251_v41 = vld [vmem:[#allocation7 + $0x6cc] ss:$48 sps:$4 sm:$0xff]  }
 0x109   : > { %2427 = vmatpush1.bf16.msra.mxu0 %v6234_v58  ;;  %v6324_v58 = vld [vmem:[#allocation7 + $0x620] ss:$48 sps:$4 sm:$0xff]  }
 0x10a   : > { %2185 = vmatpush1.bf16.msra.mxu1 %v6159_v44  ;;  %2428 = vmatprep.subr.bf16.mxu0 %v6242_v60  ;;  %v6249_v44 = vld [vmem:[#allocation7 + $0x6c8] ss:$48 sps:$4 sm:$0xff]   ;;  %v6332_v60 = vld [vmem:[#allocation7 + $0x684] ss:$48 sps:$4 sm:$0xff]  }
 0x10b   : > { %2186 = vmatprep.subr.bf16.mxu1 %v6167_v45  ;;  %v6257_v45 = vld [vmem:[#allocation7 + $0x72c] ss:$48 sps:$4 sm:$0xff]  }
 0x10d   : > { %2429 = vmatpush1.bf16.msra.mxu0 %v6240_v63  ;;  %v6330_v63 = vld [vmem:[#allocation7 + $0x680] ss:$48 sps:$4 sm:$0xff]  }
 0x10e   : > { %2187 = vmatpush1.bf16.msra.mxu1 %v6165_v48  ;;  %2430 = vmatprep.subr.bf16.mxu0 %v6248_v0  ;;  %v6255_v48 = vld [vmem:[#allocation7 + $0x728] ss:$48 sps:$4 sm:$0xff]   ;;  %v6338_v0 = vld [vmem:[#allocation7 + $0x6e4] ss:$48 sps:$4 sm:$0xff]  }
 0x10f   : > { %2188 = vmatprep.subr.bf16.mxu1 %v6173_v49  ;;  %v6263_v49 = vld [vmem:[#allocation7 + $0x78c] ss:$48 sps:$4 sm:$0xff]  }
 0x111   : > { %2431 = vmatpush1.bf16.msra.mxu0 %v6246_v4  ;;  %v6336_v4 = vld [vmem:[#allocation7 + $0x6e0] ss:$48 sps:$4 sm:$0xff]  }
 0x112   : > { %2189 = vmatpush1.bf16.msra.mxu1 %v6171_v52  ;;  %2432 = vmatprep.subr.bf16.mxu0 %v6254_v5  ;;  %v6261_v52 = vld [vmem:[#allocation7 + $0x788] ss:$48 sps:$4 sm:$0xff]   ;;  %v6344_v5 = vld [vmem:[#allocation7 + $0x744] ss:$48 sps:$4 sm:$0xff]  }
 0x113   : > { %2190 = vmatprep.subr.bf16.mxu1 %v6179_v53  ;;  %v6269_v53 = vld [vmem:[#allocation7 + $0x7ec] ss:$48 sps:$4 sm:$0xff]  }
 0x115   : > { %2433 = vmatpush1.bf16.msra.mxu0 %v6252_v8  ;;  %v6342_v8 = vld [vmem:[#allocation7 + $0x740] ss:$48 sps:$4 sm:$0xff]  }
 0x116   : > { %2191 = vmatpush1.bf16.msra.mxu1 %v6177_v56  ;;  %2434 = vmatprep.subr.bf16.mxu0 %v6260_v9  ;;  %v6267_v56 = vld [vmem:[#allocation7 + $0x7e8] ss:$48 sps:$4 sm:$0xff]   ;;  %v6350_v9 = vld [vmem:[#allocation7 + $0x7a4] ss:$48 sps:$4 sm:$0xff]  }
 0x117   : > { %2192 = vmatprep.subr.bf16.mxu1 %v6185_v57  ;;  %v6275_v57 = vld [vmem:[#allocation7 + $0x84c] ss:$48 sps:$4 sm:$0xff]  }
 0x119   : > { %2435 = vmatpush1.bf16.msra.mxu0 %v6258_v12  ;;  %v6348_v12 = vld [vmem:[#allocation7 + $0x7a0] ss:$48 sps:$4 sm:$0xff]  }
 0x11a   : > { %2193 = vmatpush1.bf16.msra.mxu1 %v6183_v61  ;;  %2436 = vmatprep.subr.bf16.mxu0 %v6266_v13  ;;  %v6273_v61 = vld [vmem:[#allocation7 + $0x848] ss:$48 sps:$4 sm:$0xff]   ;;  %v6356_v13 = vld [vmem:[#allocation7 + $0x804] ss:$48 sps:$4 sm:$0xff]  }
 0x11b   : > { %2194 = vmatprep.subr.bf16.mxu1 %v6191_v62  ;;  %v6281_v62 = vld [vmem:[#allocation7 + $0x8ac] ss:$48 sps:$4 sm:$0xff]  }
 0x11d   : > { %2437 = vmatpush1.bf16.msra.mxu0 %v6264_v16  ;;  %v6354_v16 = vld [vmem:[#allocation7 + $0x800] ss:$48 sps:$4 sm:$0xff]  }
 0x11e   : > { %2195 = vmatpush1.bf16.msra.mxu1 %v6189_v2  ;;  %2438 = vmatprep.subr.bf16.mxu0 %v6272_v17  ;;  %v6279_v2 = vld [vmem:[#allocation7 + $0x8a8] ss:$48 sps:$4 sm:$0xff]   ;;  %v6362_v17 = vld [vmem:[#allocation7 + $0x864] ss:$48 sps:$4 sm:$0xff]  }
 0x11f   : > { %2196 = vmatprep.subr.bf16.mxu1 %v6197_v3  ;;  %v6287_v3 = vld [vmem:[#allocation7 + $0x1c] ss:$48 sps:$4 sm:$0xff]  }
 0x121   : > { %2439 = vmatpush1.bf16.msra.mxu0 %v6270_v20  ;;  %v6360_v20 = vld [vmem:[#allocation7 + $0x860] ss:$48 sps:$4 sm:$0xff]  }
 0x122   : > { %2197 = vmatpush1.bf16.msra.mxu1 %v6195_v6  ;;  %2440 = vmatprep.subr.bf16.mxu0 %v6278_v22  ;;  %v6285_v6 = vld [vmem:[#allocation7 + $0x18] ss:$48 sps:$4 sm:$0xff]   ;;  %v6368_v22 = vld [vmem:[#allocation7 + $0x8c4] ss:$48 sps:$4 sm:$0xff]  }
 0x123   : > { %2198 = vmatprep.subr.bf16.mxu1 %v6203_v7  ;;  %v6293_v7 = vld [vmem:[#allocation7 + $0x7c] ss:$48 sps:$4 sm:$0xff]  }
 0x125   : > { %2441 = vmatpush1.bf16.msra.mxu0 %v6276_v25  ;;  %v6366_v25 = vld [vmem:[#allocation7 + $0x8c0] ss:$48 sps:$4 sm:$0xff]  }
 0x126   : > { %2199 = vmatpush1.bf16.msra.mxu1 %v6201_v10  ;;  %2442 = vmatprep.subr.bf16.mxu0 %v6284_v26  ;;  %v6291_v10 = vld [vmem:[#allocation7 + $0x78] ss:$48 sps:$4 sm:$0xff]   ;;  %v6377_v26 = vld [vmem:[#allocation10 + $0x4] ss:$12 sps:$4 sm:$0xff]  }
 0x127   : > { %2200 = vmatprep.subr.bf16.mxu1 %v6209_v11  ;;  %v6299_v11 = vld [vmem:[#allocation7 + $0xdc] ss:$48 sps:$4 sm:$0xff]  }
 0x129   : > { %2443 = vmatpush1.bf16.msra.mxu0 %v6282_v29  ;;  %v6375_v29 = vld [vmem:[#allocation10] ss:$12 sps:$4 sm:$0xff]  }
 0x12a   : > { %2201 = vmatpush1.bf16.msra.mxu1 %v6207_v14  ;;  %2444 = vmatprep.subr.bf16.mxu0 %v6290_v30  ;;  %v6297_v14 = vld [vmem:[#allocation7 + $0xd8] ss:$48 sps:$4 sm:$0xff]  }
 0x12b   : > { %2202 = vmatprep.subr.bf16.mxu1 %v6215_v15  ;;  %v6305_v15 = vld [vmem:[#allocation7 + $0x13c] ss:$48 sps:$4 sm:$0xff]   ;;  %v6383_v30 = vld [vmem:[#allocation10 + $0x1c] ss:$12 sps:$4 sm:$0xff]  }
 0x12d   : > { %2445 = vmatpush1.bf16.msra.mxu0 %v6288_v34  ;;  %v6381_v34 = vld [vmem:[#allocation10 + $0x18] ss:$12 sps:$4 sm:$0xff]  }
 0x12e   : > { %2203 = vmatpush1.bf16.msra.mxu1 %v6213_v18  ;;  %2446 = vmatprep.subr.bf16.mxu0 %v6296_v35  ;;  %v6303_v18 = vld [vmem:[#allocation7 + $0x138] ss:$48 sps:$4 sm:$0xff]   ;;  %v6389_v35 = vld [vmem:[#allocation10 + $0x34] ss:$12 sps:$4 sm:$0xff]  }
 0x12f   : > { %2204 = vmatprep.subr.bf16.mxu1 %v6221_v19  ;;  %v6311_v19 = vld [vmem:[#allocation7 + $0x19c] ss:$48 sps:$4 sm:$0xff]  }
 0x131   : > { %2447 = vmatpush1.bf16.msra.mxu0 %v6294_v38  ;;  %v6387_v38 = vld [vmem:[#allocation10 + $0x30] ss:$12 sps:$4 sm:$0xff]  }
 0x132   : > { %2205 = vmatpush1.bf16.msra.mxu1 %v6219_v23  ;;  %2448 = vmatprep.subr.bf16.mxu0 %v6302_v39  ;;  %v6309_v23 = vld [vmem:[#allocation7 + $0x198] ss:$48 sps:$4 sm:$0xff]  }
 0x133   : > { %2206 = vmatprep.subr.bf16.mxu1 %v6227_v24  ;;  %v6317_v24 = vld [vmem:[#allocation7 + $0x1fc] ss:$48 sps:$4 sm:$0xff]   ;;  %v6395_v39 = vld [vmem:[#allocation10 + $0x4c] ss:$12 sps:$4 sm:$0xff]  }
 0x135   : > { %2449 = vmatpush1.bf16.msra.mxu0 %v6300_v42  ;;  %v6393_v42 = vld [vmem:[#allocation10 + $0x48] ss:$12 sps:$4 sm:$0xff]  }
 0x136   : > { %2207 = vmatpush1.bf16.msra.mxu1 %v6225_v27  ;;  %2450 = vmatprep.subr.bf16.mxu0 %v6308_v43  ;;  %v6315_v27 = vld [vmem:[#allocation7 + $0x1f8] ss:$48 sps:$4 sm:$0xff]   ;;  %v6401_v43 = vld [vmem:[#allocation10 + $0x64] ss:$12 sps:$4 sm:$0xff]  }
 0x137   : > { %2208 = vmatprep.subr.bf16.mxu1 %v6233_v28  ;;  %v6323_v28 = vld [vmem:[#allocation7 + $0x25c] ss:$48 sps:$4 sm:$0xff]  }
 0x139   : > { %2451 = vmatpush1.bf16.msra.mxu0 %v6306_v46  ;;  %v6399_v46 = vld [vmem:[#allocation10 + $0x60] ss:$12 sps:$4 sm:$0xff]  }
 0x13a   : > { %2209 = vmatpush1.bf16.msra.mxu1 %v6231_v32  ;;  %2452 = vmatprep.subr.bf16.mxu0 %v6314_v47  ;;  %v6321_v32 = vld [vmem:[#allocation7 + $0x258] ss:$48 sps:$4 sm:$0xff]  }
 0x13b   : > { %2219 = vmatprep.subr.bf16.mxu1 %v6239_v33  ;;  %v6329_v33 = vld [vmem:[#allocation7 + $0x2bc] ss:$48 sps:$4 sm:$0xff]   ;;  %v6407_v47 = vld [vmem:[#allocation10 + $0x7c] ss:$12 sps:$4 sm:$0xff]  }
 0x13d   : > { %2211 = vmatmul.mubr.bf16.vlgmr.msra.gmra.mrb[4].mxu1 %v7352_v59  ;;  %2453 = vmatpush1.bf16.msra.mxu0 %v6312_v50  ;;  %v6405_v50 = vld [vmem:[#allocation10 + $0x78] ss:$12 sps:$4 sm:$0xff]  }
 0x13e   : > { %2220 = vmatpush1.bf16.msra.mxu1 %v6237_v36  ;;  %2251 = vmatprep.mubr.bf16.mxu1 %v7083_v1  ;;  %v6327_v36 = vld [vmem:[#allocation7 + $0x2b8] ss:$48 sps:$4 sm:$0xff]  }
 0x13f   : > { %2221 = vmatprep.subr.bf16.mxu1 %v6245_v37  ;;  %2454 = vmatprep.subr.bf16.mxu0 %v6320_v51  ;;  %v6335_v37 = vld [vmem:[#allocation7 + $0x31c] ss:$48 sps:$4 sm:$0xff]  }
 0x140   : > { %v6413_v51 = vld [vmem:[#allocation10 + $0x94] ss:$12 sps:$4 sm:$0xff]  }
 0x141   : > { %2455 = vmatpush1.bf16.msra.mxu0 %v6318_v54  ;;  %v6411_v54 = vld [vmem:[#allocation10 + $0x90] ss:$12 sps:$4 sm:$0xff]  }
 0x142   : > { %2222 = vmatpush1.bf16.msra.mxu1 %v6243_v40  ;;  %2465 = vmatprep.subr.bf16.mxu0 %v6326_v55  ;;  %v6333_v40 = vld [vmem:[#allocation7 + $0x318] ss:$48 sps:$4 sm:$0xff]  }
 0x143   : > { %2223 = vmatprep.subr.bf16.mxu1 %v6251_v41  ;;  %v6341_v41 = vld [vmem:[#allocation7 + $0x37c] ss:$48 sps:$4 sm:$0xff]   ;;  %v6419_v55 = vld [vmem:[#allocation10 + $0xac] ss:$12 sps:$4 sm:$0xff]  }
 0x144   : > { %2457 = vmatmul.mubr.bf16.vlgmr.msra.gmra.mrb[4].mxu0 %v7352_v59 }
 0x145   : > { %2466 = vmatpush1.bf16.msra.mxu0 %v6324_v58  ;;  %2497 = vmatprep.mubr.bf16.mxu0 %v7083_v1  ;;  %v6417_v58 = vld [vmem:[#allocation10 + $0xa8] ss:$12 sps:$4 sm:$0xff]  }
 0x146   : > { %2224 = vmatpush1.bf16.msra.mxu1 %v6249_v44  ;;  %2467 = vmatprep.subr.bf16.mxu0 %v6332_v60  ;;  %v6339_v44 = vld [vmem:[#allocation7 + $0x378] ss:$48 sps:$4 sm:$0xff]   ;;  %v6425_v60 = vld [vmem:[#allocation10 + $0xc4] ss:$12 sps:$4 sm:$0xff]  }
 0x147   : > { %2225 = vmatprep.subr.bf16.mxu1 %v6257_v45  ;;  %v6347_v45 = vld [vmem:[#allocation7 + $0x3dc] ss:$48 sps:$4 sm:$0xff]  }
 0x149   : > { %2468 = vmatpush1.bf16.msra.mxu0 %v6330_v63  ;;  %v6423_v63 = vld [vmem:[#allocation10 + $0xc0] ss:$12 sps:$4 sm:$0xff]  }
 0x14a   : > { %2226 = vmatpush1.bf16.msra.mxu1 %v6255_v48  ;;  %2469 = vmatprep.subr.bf16.mxu0 %v6338_v0  ;;  %v6345_v48 = vld [vmem:[#allocation7 + $0x3d8] ss:$48 sps:$4 sm:$0xff]  }
 0x14b   : > { %2227 = vmatprep.subr.bf16.mxu1 %v6263_v49  ;;  %v6353_v49 = vld [vmem:[#allocation7 + $0x43c] ss:$48 sps:$4 sm:$0xff]   ;;  %v6431_v0 = vld [vmem:[#allocation10 + $0xdc] ss:$12 sps:$4 sm:$0xff]  }
 0x14d   : > { %2470 = vmatpush1.bf16.msra.mxu0 %v6336_v4  ;;  %v6429_v4 = vld [vmem:[#allocation10 + $0xd8] ss:$12 sps:$4 sm:$0xff]  }
 0x14e   : > { %2228 = vmatpush1.bf16.msra.mxu1 %v6261_v52  ;;  %2471 = vmatprep.subr.bf16.mxu0 %v6344_v5  ;;  %v6351_v52 = vld [vmem:[#allocation7 + $0x438] ss:$48 sps:$4 sm:$0xff]   ;;  %v6437_v5 = vld [vmem:[#allocation10 + $0xf4] ss:$12 sps:$4 sm:$0xff]  }
 0x14f   : > { %2229 = vmatprep.subr.bf16.mxu1 %v6269_v53  ;;  %v6359_v53 = vld [vmem:[#allocation7 + $0x49c] ss:$48 sps:$4 sm:$0xff]  }
 0x151   : > { %2472 = vmatpush1.bf16.msra.mxu0 %v6342_v8  ;;  %v6435_v8 = vld [vmem:[#allocation10 + $0xf0] ss:$12 sps:$4 sm:$0xff]  }
 0x152   : > { %2230 = vmatpush1.bf16.msra.mxu1 %v6267_v56  ;;  %2473 = vmatprep.subr.bf16.mxu0 %v6350_v9  ;;  %v6357_v56 = vld [vmem:[#allocation7 + $0x498] ss:$48 sps:$4 sm:$0xff]  }
 0x153   : > { %2231 = vmatprep.subr.bf16.mxu1 %v6275_v57  ;;  %v6365_v57 = vld [vmem:[#allocation7 + $0x4fc] ss:$48 sps:$4 sm:$0xff]   ;;  %v6443_v9 = vld [vmem:[#allocation10 + $0x10c] ss:$12 sps:$4 sm:$0xff]  }
 0x155   : > { %2474 = vmatpush1.bf16.msra.mxu0 %v6348_v12  ;;  %v6441_v12 = vld [vmem:[#allocation10 + $0x108] ss:$12 sps:$4 sm:$0xff]  }
 0x156   : > { %2232 = vmatpush1.bf16.msra.mxu1 %v6273_v61  ;;  %2475 = vmatprep.subr.bf16.mxu0 %v6356_v13  ;;  %v6363_v61 = vld [vmem:[#allocation7 + $0x4f8] ss:$48 sps:$4 sm:$0xff]   ;;  %v6449_v13 = vld [vmem:[#allocation10 + $0x124] ss:$12 sps:$4 sm:$0xff]  }
 0x157   : > { %2233 = vmatprep.subr.bf16.mxu1 %v6281_v62  ;;  %v6371_v62 = vld [vmem:[#allocation7 + $0x55c] ss:$48 sps:$4 sm:$0xff]  }
 0x159   : > { %2476 = vmatpush1.bf16.msra.mxu0 %v6354_v16  ;;  %v6447_v16 = vld [vmem:[#allocation10 + $0x120] ss:$12 sps:$4 sm:$0xff]  }
 0x15a   : > { %2234 = vmatpush1.bf16.msra.mxu1 %v6279_v2  ;;  %2477 = vmatprep.subr.bf16.mxu0 %v6362_v17  ;;  %v6369_v2 = vld [vmem:[#allocation7 + $0x558] ss:$48 sps:$4 sm:$0xff]  }
 0x15b   : > { %2342 = vmatprep.subr.bf16.mxu1 %v6287_v3  ;;  %v6374_v3 = vld [vmem:[#allocation7 + $0x5bc] ss:$48 sps:$4 sm:$0xff]   ;;  %v6455_v17 = vld [vmem:[#allocation10 + $0x13c] ss:$12 sps:$4 sm:$0xff]  }
 0x15d   : > { %2252 = vmatmul.mubr.bf16.vlgmr.msra.gmra.mrb[4].mxu1 %v7359_v31  ;;  %2478 = vmatpush1.bf16.msra.mxu0 %v6360_v20  ;;  %v6453_v20 = vld [vmem:[#allocation10 + $0x138] ss:$12 sps:$4 sm:$0xff]  }
 0x15e   : > { %2343 = vmatpush1.bf16.msra.mxu1 %v6285_v6  ;;  %2374 = vmatprep.mubr.bf16.mxu1 %v7347_v21  ;;  %v6372_v6 = vld [vmem:[#allocation7 + $0x5b8] ss:$48 sps:$4 sm:$0xff]  }
 0x15f   : > { %2344 = vmatprep.subr.bf16.mxu1 %v6293_v7  ;;  %2479 = vmatprep.subr.bf16.mxu0 %v6368_v22  ;;  %v6380_v7 = vld [vmem:[#allocation7 + $0x61c] ss:$48 sps:$4 sm:$0xff]  }
 0x160   : > { %v6461_v22 = vld [vmem:[#allocation10 + $0x154] ss:$12 sps:$4 sm:$0xff]  }
 0x161   : > { %2480 = vmatpush1.bf16.msra.mxu0 %v6366_v25  ;;  %v6459_v25 = vld [vmem:[#allocation10 + $0x150] ss:$12 sps:$4 sm:$0xff]  }
 0x162   : > { %2345 = vmatpush1.bf16.msra.mxu1 %v6291_v10  ;;  %4549 = vmatprep.subr.bf16.mxu0 %v6377_v26  ;;  %v6378_v10 = vld [vmem:[#allocation7 + $0x618] ss:$48 sps:$4 sm:$0xff]  }
 0x163   : > { %2346 = vmatprep.subr.bf16.mxu1 %v6299_v11  ;;  %v6386_v11 = vld [vmem:[#allocation7 + $0x67c] ss:$48 sps:$4 sm:$0xff]   ;;  %v6467_v26 = vld [vmem:[#allocation10 + $0x16c] ss:$12 sps:$4 sm:$0xff]  }
 0x164   : > { %2498 = vmatmul.mubr.bf16.vlgmr.msra.gmra.mrb[4].mxu0 %v7359_v31 }
 0x165   : > { %4550 = vmatpush1.bf16.msra.mxu0 %v6375_v29  ;;  %v6465_v29 = vld [vmem:[#allocation10 + $0x168] ss:$12 sps:$4 sm:$0xff]  }
 0x166   : > { %2347 = vmatpush1.bf16.msra.mxu1 %v6297_v14  ;;  %4551 = vmatprep.subr.bf16.mxu0 %v6383_v30  ;;  %v6384_v14 = vld [vmem:[#allocation7 + $0x678] ss:$48 sps:$4 sm:$0xff]   ;;  %v6494_v30 = vld [vmem:[#allocation10 + $0x184] ss:$12 sps:$4 sm:$0xff]  }
 0x167   : > { %2348 = vmatprep.subr.bf16.mxu1 %v6305_v15  ;;  %v6392_v15 = vld [vmem:[#allocation7 + $0x6dc] ss:$48 sps:$4 sm:$0xff]  }
 0x169   : > { %4552 = vmatpush1.bf16.msra.mxu0 %v6381_v34  ;;  %v6414_v34 = vld [vmem:[#allocation7 + $0x858] ss:$48 sps:$4 sm:$0xff]  }
 0x16a   : > { %2349 = vmatpush1.bf16.msra.mxu1 %v6303_v18  ;;  %4553 = vmatprep.subr.bf16.mxu0 %v6389_v35  ;;  %v6390_v18 = vld [vmem:[#allocation7 + $0x6d8] ss:$48 sps:$4 sm:$0xff]   ;;  %v6422_v35 = vld [vmem:[#allocation7 + $0x8bc] ss:$48 sps:$4 sm:$0xff]  }
 0x16b   : > { %2350 = vmatprep.subr.bf16.mxu1 %v6311_v19  ;;  %v6398_v19 = vld [vmem:[#allocation7 + $0x73c] ss:$48 sps:$4 sm:$0xff]  }
 0x16d   : > { %4554 = vmatpush1.bf16.msra.mxu0 %v6387_v38  ;;  %v6426_v38 = vld [vmem:[#allocation7 + $0x28] ss:$48 sps:$4 sm:$0xff]  }
 0x16e   : > { %2351 = vmatpush1.bf16.msra.mxu1 %v6309_v23  ;;  %4555 = vmatprep.subr.bf16.mxu0 %v6395_v39  ;;  %v6396_v23 = vld [vmem:[#allocation7 + $0x738] ss:$48 sps:$4 sm:$0xff]   ;;  %v6434_v39 = vld [vmem:[#allocation7 + $0x8c] ss:$48 sps:$4 sm:$0xff]  }
 0x16f   : > { %2352 = vmatprep.subr.bf16.mxu1 %v6317_v24  ;;  %v6404_v24 = vld [vmem:[#allocation7 + $0x79c] ss:$48 sps:$4 sm:$0xff]  }
 0x171   : > { %4556 = vmatpush1.bf16.msra.mxu0 %v6393_v42  ;;  %v596_v42 = vlaneseq }
 0x172   : > { %2353 = vmatpush1.bf16.msra.mxu1 %v6315_v27  ;;  %4557 = vmatprep.subr.bf16.mxu0 %v6401_v43  ;;  %v6402_v27 = vld [vmem:[#allocation7 + $0x798] ss:$48 sps:$4 sm:$0xff]  }
 0x173   : > { %2354 = vmatprep.subr.bf16.mxu1 %v6323_v28  ;;  %v6410_v28 = vld [vmem:[#allocation7 + $0x7fc] ss:$48 sps:$4 sm:$0xff]   ;;  %v6438_v43 = vld [vmem:[#allocation7 + $0xe8] ss:$48 sps:$4 sm:$0xff]  }
 0x175   : > { %4558 = vmatpush1.bf16.msra.mxu0 %v6399_v46  ;;  %v6444_v46 = vld [vmem:[#allocation7 + $0x148] ss:$48 sps:$4 sm:$0xff]  }
 0x176   : > { %2355 = vmatpush1.bf16.msra.mxu1 %v6321_v32  ;;  %4559 = vmatprep.subr.bf16.mxu0 %v6407_v47  ;;  %v6408_v32 = vld [vmem:[#allocation7 + $0x7f8] ss:$48 sps:$4 sm:$0xff]   ;;  %v6452_v47 = vld [vmem:[#allocation7 + $0x1ac] ss:$48 sps:$4 sm:$0xff]  }
 0x177   : > { %2356 = vmatprep.subr.bf16.mxu1 %v6329_v33  ;;  %v6416_v33 = vld [vmem:[#allocation7 + $0x85c] ss:$48 sps:$4 sm:$0xff]  }
 0x179   : > { %4560 = vmatpush1.bf16.msra.mxu0 %v6405_v50 }
 0x17a   : > { %2357 = vmatpush1.bf16.msra.mxu1 %v6327_v36  ;;  %4561 = vmatprep.subr.bf16.mxu0 %v6413_v51  ;;  %v6420_v36 = vld [vmem:[#allocation7 + $0x8b8] ss:$48 sps:$4 sm:$0xff]   ;;  %v6458_v51 = vld [vmem:[#allocation7 + $0x20c] ss:$48 sps:$4 sm:$0xff]  }
 0x17b   : > { %2358 = vmatprep.subr.bf16.mxu1 %v6335_v37  ;;  %v6428_v37 = vld [vmem:[#allocation7 + $0x2c] ss:$48 sps:$4 sm:$0xff]  }
 0x17d   : > { %4562 = vmatpush1.bf16.msra.mxu0 %v6411_v54 }
 0x17e   : > { %2359 = vmatpush1.bf16.msra.mxu1 %v6333_v40  ;;  %4563 = vmatprep.subr.bf16.mxu0 %v6419_v55  ;;  %v6432_v40 = vld [vmem:[#allocation7 + $0x88] ss:$48 sps:$4 sm:$0xff]   ;;  %v6464_v55 = vld [vmem:[#allocation7 + $0x26c] ss:$48 sps:$4 sm:$0xff]  }
 0x17f   : > { %2360 = vmatprep.subr.bf16.mxu1 %v6341_v41  ;;  %v6440_v41 = vld [vmem:[#allocation7 + $0xec] ss:$48 sps:$4 sm:$0xff]  }
 0x181   : > { %4564 = vmatpush1.bf16.msra.mxu0 %v6417_v58 }
 0x182   : > { %2361 = vmatpush1.bf16.msra.mxu1 %v6339_v44  ;;  %4565 = vmatprep.subr.bf16.mxu0 %v6425_v60  ;;  %v6446_v44 = vld [vmem:[#allocation7 + $0x14c] ss:$48 sps:$4 sm:$0xff]   ;;  %v6462_v60 = vld [vmem:[#allocation7 + $0x268] ss:$48 sps:$4 sm:$0xff]  }
 0x183   : > { %2362 = vmatprep.subr.bf16.mxu1 %v6347_v45  ;;  %v7376_v45 = vshrl.u32 %v596_v42, 7  ;;  %v6497_v42 = vld [vmem:[#allocation7 + $0x5cc] ss:$48 sps:$4 sm:$0xff]  }
 0x185   : > { %4566 = vmatpush1.bf16.msra.mxu0 %v6423_v63  ;;  %v7381_v50 = vsub.s32 0, %v7376_v45 }
 0x186   : > { %2363 = vmatpush1.bf16.msra.mxu1 %v6345_v48  ;;  %4567 = vmatprep.subr.bf16.mxu0 %v6431_v0  ;;  %v6450_v48 = vld [vmem:[#allocation7 + $0x1a8] ss:$48 sps:$4 sm:$0xff]  }
 0x187   : > { %2364 = vmatprep.subr.bf16.mxu1 %v6353_v49  ;;  %v7378_v49 = vld [vmem:[#allocation9] sm:$0xff] }
 0x189   : > { %4568 = vmatpush1.bf16.msra.mxu0 %v6429_v4  ;;  %v6468_v4 = vld [vmem:[#allocation7 + $0x2c8] ss:$48 sps:$4 sm:$0xff]  }
 0x18a   : > { %2365 = vmatpush1.bf16.msra.mxu1 %v6351_v52  ;;  %4569 = vmatprep.subr.bf16.mxu0 %v6437_v5  ;;  %v599_v52 = vrot.slane %v7378_v49, %v7381_v50  ;;  %v6492_v5 = vld [vmem:[#allocation10 + $0x180] ss:$12 sps:$4 sm:$0xff]  }
 0x18b   : > { %2366 = vmatprep.subr.bf16.mxu1 %v6359_v53  ;;  %v6456_v53 = vld [vmem:[#allocation7 + $0x208] ss:$48 sps:$4 sm:$0xff]  }
 0x18d   : > { %4570 = vmatpush1.bf16.msra.mxu0 %v6435_v8  ;;  %v6473_v8 = vld [vmem:[#allocation7 + $0x32c] ss:$48 sps:$4 sm:$0xff]  }
 0x18e   : > { %2367 = vmatpush1.bf16.msra.mxu1 %v6357_v56  ;;  %4571 = vmatprep.subr.bf16.mxu0 %v6443_v9  ;;  %v6500_v9 = vld [vmem:[#allocation10 + $0x19c] ss:$12 sps:$4 sm:$0xff]  }
 0x18f   : > { %2368 = vmatprep.subr.bf16.mxu1 %v6365_v57 }
 0x191   : > { %4572 = vmatpush1.bf16.msra.mxu0 %v6441_v12  ;;  %v6476_v12 = vld [vmem:[#allocation7 + $0x38c] ss:$48 sps:$4 sm:$0xff]  }
 0x192   : > { %2369 = vmatpush1.bf16.msra.mxu1 %v6363_v61  ;;  %4573 = vmatprep.subr.bf16.mxu0 %v6449_v13  ;;  %v6506_v13 = vld [vmem:[#allocation10 + $0x1b4] ss:$12 sps:$4 sm:$0xff]  }
 0x193   : > { %2370 = vmatprep.subr.bf16.mxu1 %v6371_v62 }
 0x195   : > { %4574 = vmatpush1.bf16.msra.mxu0 %v6447_v16  ;;  %v6479_v16 = vld [vmem:[#allocation7 + $0x3ec] ss:$48 sps:$4 sm:$0xff]  }
 0x196   : > { %2371 = vmatpush1.bf16.msra.mxu1 %v6369_v2  ;;  %4575 = vmatprep.subr.bf16.mxu0 %v6455_v17  ;;  %v6470_v2 = vld [vmem:[#allocation7 + $0x2cc] ss:$48 sps:$4 sm:$0xff]   ;;  %v6512_v17 = vld [vmem:[#allocation10 + $0x1cc] ss:$12 sps:$4 sm:$0xff]  }
 0x197   : > { %2372 = vmatprep.subr.bf16.mxu1 %v6374_v3 }
 0x199   : > { %4576 = vmatpush1.bf16.msra.mxu0 %v6453_v20  ;;  %v6482_v20 = vld [vmem:[#allocation7 + $0x44c] ss:$48 sps:$4 sm:$0xff]  }
 0x19a   : > { %2373 = vmatpush1.bf16.msra.mxu1 %v6372_v6  ;;  %4577 = vmatprep.subr.bf16.mxu0 %v6461_v22  ;;  %v6518_v22 = vld [vmem:[#allocation10 + $0x1e4] ss:$12 sps:$4 sm:$0xff]  }
 0x19b   : > { %2383 = vmatprep.subr.bf16.mxu1 %v6380_v7 }
 0x19d   : > { %2375 = vmatmul.mubr.bf16.vlgmr.msra.gmra.mrb[8].mxu1 %v7352_v59  ;;  %4578 = vmatpush1.bf16.msra.mxu0 %v6459_v25 }
 0x19e   : > { %2384 = vmatpush1.bf16.msra.mxu1 %v6378_v10  ;;  %2415 = vmatprep.mubr.bf16.mxu1 %v7083_v1  ;;  %v6471_v10 = vld [vmem:[#allocation7 + $0x328] ss:$48 sps:$4 sm:$0xff]  }
 0x19f   : > { %2385 = vmatprep.subr.bf16.mxu1 %v6386_v11  ;;  %4579 = vmatprep.subr.bf16.mxu0 %v6467_v26  ;;  %v6498_v11 = vld [vmem:[#allocation10 + $0x198] ss:$12 sps:$4 sm:$0xff]  }
 0x1a1   : > { %4580 = vmatpush1.bf16.msra.mxu0 %v6465_v29  ;;  %v6524_v29 = vld [vmem:[#allocation10 + $0x1fc] ss:$12 sps:$4 sm:$0xff]  }
 0x1a2   : > { %2386 = vmatpush1.bf16.msra.mxu1 %v6384_v14  ;;  %4590 = vmatprep.subr.bf16.mxu0 %v6494_v30  ;;  %v6474_v14 = vld [vmem:[#allocation7 + $0x388] ss:$48 sps:$4 sm:$0xff]  }
 0x1a3   : > { %2387 = vmatprep.subr.bf16.mxu1 %v6392_v15  ;;  %v6504_v15 = vld [vmem:[#allocation10 + $0x1b0] ss:$12 sps:$4 sm:$0xff]  }
 0x1a4   : > { %v6483_v30 = vld [vmem:[#allocation7 + $0x4a8] ss:$48 sps:$4 sm:$0xff]  }
 0x1a6   : > { %2388 = vmatpush1.bf16.msra.mxu1 %v6390_v18  ;;  %v6477_v18 = vld [vmem:[#allocation7 + $0x3e8] ss:$48 sps:$4 sm:$0xff]  }
 0x1a7   : > { %2389 = vmatprep.subr.bf16.mxu1 %v6398_v19  ;;  %v6510_v19 = vld [vmem:[#allocation10 + $0x1c8] ss:$12 sps:$4 sm:$0xff]  }
 0x1aa   : > { %2390 = vmatpush1.bf16.msra.mxu1 %v6396_v23  ;;  %v6480_v23 = vld [vmem:[#allocation7 + $0x448] ss:$48 sps:$4 sm:$0xff]  }
 0x1ab   : > { %2391 = vmatprep.subr.bf16.mxu1 %v6404_v24  ;;  %v6516_v24 = vld [vmem:[#allocation10 + $0x1e0] ss:$12 sps:$4 sm:$0xff]  }
 0x1ae   : > { %2392 = vmatpush1.bf16.msra.mxu1 %v6402_v27  ;;  %v6485_v27 = vld [vmem:[#allocation7 + $0x4ac] ss:$48 sps:$4 sm:$0xff]  }
 0x1af   : > { %2393 = vmatprep.subr.bf16.mxu1 %v6410_v28 }
 0x1b2   : > { %2394 = vmatpush1.bf16.msra.mxu1 %v6408_v32 }
 0x1b3   : > { %2395 = vmatprep.subr.bf16.mxu1 %v6416_v33  ;;  %v6522_v33 = vld [vmem:[#allocation10 + $0x1f8] ss:$12 sps:$4 sm:$0xff]  }
 0x1b6   : > { %2396 = vmatpush1.bf16.msra.mxu1 %v6414_v34  ;;  %v6488_v34 = vld [vmem:[#allocation7 + $0x50c] ss:$48 sps:$4 sm:$0xff]  }
 0x1b7   : > { %2397 = vmatprep.subr.bf16.mxu1 %v6422_v35  ;;  %v6530_v35 = vld [vmem:[#allocation10 + $0x214] ss:$12 sps:$4 sm:$0xff]  }
 0x1ba   : > { %2398 = vmatpush1.bf16.msra.mxu1 %v6420_v36  ;;  %v6486_v36 = vld [vmem:[#allocation7 + $0x508] ss:$48 sps:$4 sm:$0xff]  }
 0x1bb   : > { %2506 = vmatprep.subr.bf16.mxu1 %v6428_v37  ;;  %v6528_v37 = vld [vmem:[#allocation10 + $0x210] ss:$12 sps:$4 sm:$0xff]  }
 0x1bd   : > { %2416 = vmatmul.mubr.bf16.vlgmr.msra.gmra.mrb[8].mxu1 %v7359_v31 }
 0x1be   : > { %2507 = vmatpush1.bf16.msra.mxu1 %v6426_v38  ;;  %2538 = vmatprep.mubr.bf16.mxu1 %v7347_v21  ;;  %v7384_v21 = vsub.s32 1, %v7376_v45  ;;  %v6491_v38 = vld [vmem:[#allocation7 + $0x56c] ss:$48 sps:$4 sm:$0xff]  }
 0x1bf   : > { %2508 = vmatprep.subr.bf16.mxu1 %v6434_v39  ;;  %v6536_v39 = vld [vmem:[#allocation10 + $0x22c] ss:$12 sps:$4 sm:$0xff]  }
 0x1c0   : > { %v603_v54 = vrot.slane %v7378_v49, %v7384_v21 }
 0x1c2   : > { %2509 = vmatpush1.bf16.msra.mxu1 %v6432_v40  ;;  %v6489_v40 = vld [vmem:[#allocation7 + $0x568] ss:$48 sps:$4 sm:$0xff]  }
 0x1c3   : > { %2510 = vmatprep.subr.bf16.mxu1 %v6440_v41  ;;  %v6534_v41 = vld [vmem:[#allocation10 + $0x228] ss:$12 sps:$4 sm:$0xff]  }
 0x1c6   : > { %2511 = vmatpush1.bf16.msra.mxu1 %v6438_v43  ;;  %v6542_v43 = vld [vmem:[#allocation10 + $0x244] ss:$12 sps:$4 sm:$0xff]  }
 0x1c7   : > { %2512 = vmatprep.subr.bf16.mxu1 %v6446_v44  ;;  %v6495_v44 = vld [vmem:[#allocation7 + $0x5c8] ss:$48 sps:$4 sm:$0xff]  }
 0x1ca   : > { %2513 = vmatpush1.bf16.msra.mxu1 %v6444_v46  ;;  %v6503_v46 = vld [vmem:[#allocation7 + $0x62c] ss:$48 sps:$4 sm:$0xff]  }
 0x1cb   : > { %2514 = vmatprep.subr.bf16.mxu1 %v6452_v47  ;;  %v6540_v47 = vld [vmem:[#allocation10 + $0x240] ss:$12 sps:$4 sm:$0xff]  }
 0x1ce   : > { %2515 = vmatpush1.bf16.msra.mxu1 %v6450_v48  ;;  %v6548_v48 = vld [vmem:[#allocation10 + $0x25c] ss:$12 sps:$4 sm:$0xff]  }
 0x1cf   : > { %2516 = vmatprep.subr.bf16.mxu1 %v6458_v51  ;;  %v6501_v51 = vld [vmem:[#allocation7 + $0x628] ss:$48 sps:$4 sm:$0xff]  }
 0x1d0   : > { %v2171_v56 = vpop.f32.mrb[0].mxu1 }
 0x1d1   : > { %v5885_v57 = vadd.f32 %v2171_v56, %v599_v52  ;;  %v2173_v58 = vpop.f32.mrb[1].mxu1  ;;  %v6509_v52 = vld [vmem:[#allocation7 + $0x68c] ss:$48 sps:$4 sm:$0xff]  }
 0x1d2   : > { %v5886_v61 = vadd.f32 %v2173_v58, %v603_v54  ;;  %v2175_v62 = vpop.f32.mrb[2].mxu1  ;;  %2517 = vmatpush1.bf16.msra.mxu1 %v6456_v53  ;;  %v6546_v53 = vld [vmem:[#allocation10 + $0x258] ss:$12 sps:$4 sm:$0xff]   ;;  %v6553_v54 = vld [vmem:[#allocation10 + $0x274] ss:$12 sps:$4 sm:$0xff]  }
 0x1d3   : > { %v2588_v63 = vmax.f32 %v5885_v57, 0.0  ;;  %v2176_v0 = vpop.f32.mrb[3].mxu1  ;;  %2518 = vmatprep.subr.bf16.mxu1 %v6464_v55  ;;  %v6507_v55 = vld [vmem:[#allocation7 + $0x688] ss:$48 sps:$4 sm:$0xff]   ;;  %v6515_v56 = vld [vmem:[#allocation7 + $0x6ec] ss:$48 sps:$4 sm:$0xff]  }
 0x1d4   : > { %v2589_v3 = vmax.f32 %v5886_v61, 0.0  ;;  %v6551_v57 = vld [vmem:[#allocation10 + $0x270] ss:$12 sps:$4 sm:$0xff]   ;;  %v6558_v58 = vld [vmem:[#allocation10 + $0x28c] ss:$12 sps:$4 sm:$0xff]  }
 0x1d5   : > { %v7392_v7 = vpack.c.bf16 %v2588_v63, %v2588_v63  ;;  %v6521_v61 = vld [vmem:[#allocation7 + $0x74c] ss:$48 sps:$4 sm:$0xff]   ;;  %v6556_v62 = vld [vmem:[#allocation10 + $0x288] ss:$12 sps:$4 sm:$0xff]   ;;  %v6519_v0 = vld [vmem:[#allocation7 + $0x748] ss:$48 sps:$4 sm:$0xff]  }
 0x1d6   : > { %v7390_v6 = vpack.c.bf16 %v2589_v3, %v2589_v3  ;;  %2519 = vmatpush1.bf16.msra.mxu1 %v6462_v60  ;;  %v6513_v60 = vld [vmem:[#allocation7 + $0x6e8] ss:$48 sps:$4 sm:$0xff]   ;;  %v6563_v63 = vld [vmem:[#allocation10 + $0x2a4] ss:$12 sps:$4 sm:$0xff]  }
 0x1d7   : > { %2520 = vmatprep.subr.bf16.mxu1 %v6470_v2  ;;  %v7396_v25 = vpop.f32.mrb[0].mxu0  ;;  %v6568_v2 = vld [vmem:[#allocation10 + $0x2bc] ss:$12 sps:$4 sm:$0xff]  }
 0x1d8   : > { %4581 = vmatprep.mubr.bf16.mxu0 %v7390_v6  ;;  %v7398_v26 = vpop.f32.mrb[1].mxu0  ;;  %v6525_v3 = vld [vmem:[#allocation7 + $0x7a8] ss:$48 sps:$4 sm:$0xff]  }
 0x1d9   : > { %4582 = vmatmul.mubr.bf16.vlgmr.msra.gmra.mrb[8].mxu0 %v7392_v7  ;;  %v2339_v28 = vpop.f32.mrb[2].mxu0 }
 0x1da   : > { %2521 = vmatpush1.bf16.msra.mxu1 %v6468_v4  ;;  %4591 = vmatpush1.bf16.msra.mxu0 %v6492_v5  ;;  %v2340_v32 = vpop.f32.mrb[3].mxu0  ;;  %v6533_v4 = vld [vmem:[#allocation7 + $0x80c] ss:$48 sps:$4 sm:$0xff]   ;;  %v6566_v5 = vld [vmem:[#allocation10 + $0x2b8] ss:$12 sps:$4 sm:$0xff]  }
 0x1db   : > { %2522 = vmatprep.subr.bf16.mxu1 %v6473_v8  ;;  %4592 = vmatprep.subr.bf16.mxu0 %v6500_v9  ;;  %v6531_v8 = vld [vmem:[#allocation7 + $0x808] ss:$48 sps:$4 sm:$0xff]   ;;  %v6573_v9 = vld [vmem:[#allocation10 + $0x2d4] ss:$12 sps:$4 sm:$0xff]   ;;  %v7406_v32 = vsub.s32 2, %v7376_v45 }
 0x1dc   : > { %v6565_v28 = vld [vmem:[#allocation10 + $0x50] ss:$12 sps:$4 sm:$0xff]  }
 0x1de   : > { %2523 = vmatpush1.bf16.msra.mxu1 %v6471_v10  ;;  %4593 = vmatpush1.bf16.msra.mxu0 %v6498_v11  ;;  %v6539_v10 = vld [vmem:[#allocation7 + $0x86c] ss:$48 sps:$4 sm:$0xff]  }
 0x1df   : > { %2524 = vmatprep.subr.bf16.mxu1 %v6476_v12  ;;  %4594 = vmatprep.subr.bf16.mxu0 %v6506_v13  ;;  %v6571_v11 = vld [vmem:[#allocation10 + $0x2d0] ss:$12 sps:$4 sm:$0xff]   ;;  %v6578_v13 = vld [vmem:[#allocation10 + $0x2ec] ss:$12 sps:$4 sm:$0xff]  }
 0x1e0   : > { %v6537_v12 = vld [vmem:[#allocation7 + $0x868] ss:$48 sps:$4 sm:$0xff]  }
 0x1e2   : > { %2525 = vmatpush1.bf16.msra.mxu1 %v6474_v14  ;;  %4595 = vmatpush1.bf16.msra.mxu0 %v6504_v15  ;;  %v6545_v14 = vld [vmem:[#allocation7 + $0x8cc] ss:$48 sps:$4 sm:$0xff]   ;;  %v6576_v15 = vld [vmem:[#allocation10 + $0x2e8] ss:$12 sps:$4 sm:$0xff]  }
 0x1e3   : > { %2526 = vmatprep.subr.bf16.mxu1 %v6479_v16  ;;  %4596 = vmatprep.subr.bf16.mxu0 %v6512_v17  ;;  %v6583_v16 = vld [vmem:[#allocation10 + $0x304] ss:$12 sps:$4 sm:$0xff]   ;;  %v6543_v17 = vld [vmem:[#allocation7 + $0x8c8] ss:$48 sps:$4 sm:$0xff]  }
 0x1e6   : > { %2527 = vmatpush1.bf16.msra.mxu1 %v6477_v18  ;;  %4597 = vmatpush1.bf16.msra.mxu0 %v6510_v19  ;;  %v6549_v18 = vld [vmem:[#allocation10 + $0xc8] ss:$12 sps:$4 sm:$0xff]  }
 0x1e7   : > { %2528 = vmatprep.subr.bf16.mxu1 %v6482_v20  ;;  %4598 = vmatprep.subr.bf16.mxu0 %v6518_v22  ;;  %v6550_v19 = vld [vmem:[#allocation10 + $0x8] ss:$12 sps:$4 sm:$0xff]   ;;  %v6554_v20 = vld [vmem:[#allocation10 + $0xe0] ss:$12 sps:$4 sm:$0xff]  }
 0x1e8   : > { %v6555_v22 = vld [vmem:[#allocation10 + $0x20] ss:$12 sps:$4 sm:$0xff]  }
 0x1ea   : > { %2529 = vmatpush1.bf16.msra.mxu1 %v6480_v23  ;;  %4599 = vmatpush1.bf16.msra.mxu0 %v6516_v24  ;;  %v6559_v23 = vld [vmem:[#allocation10 + $0xf8] ss:$12 sps:$4 sm:$0xff]  }
 0x1eb   : > { %2530 = vmatprep.subr.bf16.mxu1 %v6485_v27  ;;  %4600 = vmatprep.subr.bf16.mxu0 %v6524_v29  ;;  %v6560_v24 = vld [vmem:[#allocation10 + $0x38] ss:$12 sps:$4 sm:$0xff]   ;;  %v6564_v27 = vld [vmem:[#allocation10 + $0x110] ss:$12 sps:$4 sm:$0xff]   ;;  %v6569_v29 = vld [vmem:[#allocation10 + $0x128] ss:$12 sps:$4 sm:$0xff]  }
 0x1ee   : > { %2531 = vmatpush1.bf16.msra.mxu1 %v6483_v30  ;;  %4601 = vmatpush1.bf16.msra.mxu0 %v6522_v33  ;;  %v618_v30 = vsub.s32 5, %v7376_v45  ;;  %v6574_v33 = vld [vmem:[#allocation10 + $0x140] ss:$12 sps:$4 sm:$0xff]  }
 0x1ef   : > { %2532 = vmatprep.subr.bf16.mxu1 %v6488_v34  ;;  %4602 = vmatprep.subr.bf16.mxu0 %v6530_v35  ;;  %v607_v35 = vrot.slane %v7378_v49, %v7406_v32 }
 0x1f0   : > { %v619_v34 = vrot.slane %v7378_v49, %v618_v30  ;;  %v6623_v30 = vld [vmem:[#allocation10 + $0x3c4] ss:$12 sps:$4 sm:$0xff]  }
 0x1f2   : > { %2533 = vmatpush1.bf16.msra.mxu1 %v6486_v36  ;;  %4603 = vmatpush1.bf16.msra.mxu0 %v6528_v37  ;;  %v6575_v37 = vld [vmem:[#allocation10 + $0x80] ss:$12 sps:$4 sm:$0xff]  }
 0x1f3   : > { %2534 = vmatprep.subr.bf16.mxu1 %v6491_v38  ;;  %4604 = vmatprep.subr.bf16.mxu0 %v6536_v39  ;;  %v6579_v38 = vld [vmem:[#allocation10 + $0x158] ss:$12 sps:$4 sm:$0xff]   ;;  %v5890_v39 = vadd.f32 %v7398_v26, %v619_v34  ;;  %v6585_v26 = vld [vmem:[#allocation10 + $0xb0] ss:$12 sps:$4 sm:$0xff]  }
 0x1f4   : > { %v6625_v34 = vld [vmem:[#allocation10 + $0x230] ss:$12 sps:$4 sm:$0xff]  }
 0x1f6   : > { %2535 = vmatpush1.bf16.msra.mxu1 %v6489_v40  ;;  %4605 = vmatpush1.bf16.msra.mxu0 %v6534_v41 }
 0x1f7   : > { %2536 = vmatprep.subr.bf16.mxu1 %v6497_v42  ;;  %4606 = vmatprep.subr.bf16.mxu0 %v6542_v43 }
 0x1fa   : > { %2537 = vmatpush1.bf16.msra.mxu1 %v6495_v44  ;;  %4607 = vmatpush1.bf16.msra.mxu0 %v6540_v47 }
 0x1fb   : > { %2547 = vmatprep.subr.bf16.mxu1 %v6503_v46  ;;  %4608 = vmatprep.subr.bf16.mxu0 %v6548_v48  ;;  %v6580_v46 = vld [vmem:[#allocation10 + $0x98] ss:$12 sps:$4 sm:$0xff]  }
 0x1fd   : > { %2539 = vmatmul.mubr.bf16.vlgmr.msra.gmra.mrb[12].mxu1 %v7352_v59  ;;  %v6527_v59 = vld [vmem:[#allocation7 + $0x7ac] ss:$48 sps:$4 sm:$0xff]  }
 0x1fe   : > { %2548 = vmatpush1.bf16.msra.mxu1 %v6501_v51  ;;  %2579 = vmatprep.mubr.bf16.mxu1 %v7083_v1  ;;  %v6561_v1 = vld [vmem:[#allocation10 + $0x2a0] ss:$12 sps:$4 sm:$0xff]   ;;  %v6584_v51 = vld [vmem:[#allocation10 + $0x170] ss:$12 sps:$4 sm:$0xff]  }
 0x1ff   : > { %2549 = vmatprep.subr.bf16.mxu1 %v6509_v52  ;;  %4609 = vmatpush1.bf16.msra.mxu0 %v6546_v53  ;;  %v2593_v52 = vmax.f32 %v5890_v39, 0.0  ;;  %v6633_v39 = vld [vmem:[#allocation10 + $0x3f4] ss:$12 sps:$4 sm:$0xff]  }
 0x200   : > { %4610 = vmatprep.subr.bf16.mxu0 %v6553_v54 }
 0x202   : > { %2550 = vmatpush1.bf16.msra.mxu1 %v6507_v55  ;;  %v6581_v55 = vld [vmem:[#allocation10 + $0x300] ss:$12 sps:$4 sm:$0xff]  }
 0x203   : > { %2551 = vmatprep.subr.bf16.mxu1 %v6515_v56  ;;  %4611 = vmatpush1.bf16.msra.mxu0 %v6551_v57  ;;  %v6588_v57 = vld [vmem:[#allocation10 + $0x31c] ss:$12 sps:$4 sm:$0xff]  }
 0x204   : > { %4612 = vmatprep.subr.bf16.mxu0 %v6558_v58  ;;  %v7418_v58 = vpack.c.bf16 %v2593_v52, %v2593_v52  ;;  %v6641_v52 = vld [vmem:[#allocation10 + $0x420] ss:$12 sps:$4 sm:$0xff]  }
 0x206   : > { %2552 = vmatpush1.bf16.msra.mxu1 %v6513_v60  ;;  %v6589_v60 = vld [vmem:[#allocation10 + $0x248] ss:$12 sps:$4 sm:$0xff]  }
 0x207   : > { %2553 = vmatprep.subr.bf16.mxu1 %v6521_v61  ;;  %4613 = vmatpush1.bf16.msra.mxu0 %v6556_v62  ;;  %v6586_v61 = vld [vmem:[#allocation10 + $0x318] ss:$12 sps:$4 sm:$0xff]   ;;  %v6590_v62 = vld [vmem:[#allocation10 + $0x188] ss:$12 sps:$4 sm:$0xff]  }
 0x208   : > { %4614 = vmatprep.subr.bf16.mxu0 %v6563_v63  ;;  %v6593_v63 = vld [vmem:[#allocation10 + $0x334] ss:$12 sps:$4 sm:$0xff]  }
 0x20a   : > { %2554 = vmatpush1.bf16.msra.mxu1 %v6519_v0  ;;  %v6594_v0 = vld [vmem:[#allocation10 + $0x260] ss:$12 sps:$4 sm:$0xff]  }
 0x20b   : > { %2555 = vmatprep.subr.bf16.mxu1 %v6527_v59  ;;  %4615 = vmatpush1.bf16.msra.mxu0 %v6561_v1  ;;  %v6591_v59 = vld [vmem:[#allocation10 + $0x330] ss:$12 sps:$4 sm:$0xff]   ;;  %v6595_v1 = vld [vmem:[#allocation10 + $0x1a0] ss:$12 sps:$4 sm:$0xff]  }
 0x20c   : > { %4616 = vmatprep.subr.bf16.mxu0 %v6568_v2  ;;  %v6598_v2 = vld [vmem:[#allocation10 + $0x34c] ss:$12 sps:$4 sm:$0xff]  }
 0x20e   : > { %2556 = vmatpush1.bf16.msra.mxu1 %v6525_v3  ;;  %v6599_v3 = vld [vmem:[#allocation10 + $0x278] ss:$12 sps:$4 sm:$0xff]  }
 0x20f   : > { %2557 = vmatprep.subr.bf16.mxu1 %v6533_v4  ;;  %4617 = vmatpush1.bf16.msra.mxu0 %v6566_v5  ;;  %v6596_v4 = vld [vmem:[#allocation10 + $0x348] ss:$12 sps:$4 sm:$0xff]   ;;  %v6600_v5 = vld [vmem:[#allocation10 + $0x1b8] ss:$12 sps:$4 sm:$0xff]  }
 0x210   : > { %4618 = vmatprep.subr.bf16.mxu0 %v6573_v9  ;;  %v6604_v9 = vld [vmem:[#allocation10 + $0x290] ss:$12 sps:$4 sm:$0xff]  }
 0x212   : > { %2558 = vmatpush1.bf16.msra.mxu1 %v6531_v8  ;;  %v6603_v8 = vld [vmem:[#allocation10 + $0x364] ss:$12 sps:$4 sm:$0xff]  }
 0x213   : > { %2559 = vmatprep.subr.bf16.mxu1 %v6539_v10  ;;  %4619 = vmatpush1.bf16.msra.mxu0 %v6571_v11 }
 0x214   : > { %4620 = vmatprep.subr.bf16.mxu0 %v6578_v13  ;;  %v6608_v13 = vld [vmem:[#allocation10 + $0x37c] ss:$12 sps:$4 sm:$0xff]  }
 0x216   : > { %2560 = vmatpush1.bf16.msra.mxu1 %v6537_v12  ;;  %v6605_v12 = vld [vmem:[#allocation10 + $0x1d0] ss:$12 sps:$4 sm:$0xff]  }
 0x217   : > { %2561 = vmatprep.subr.bf16.mxu1 %v6545_v14  ;;  %4621 = vmatpush1.bf16.msra.mxu0 %v6576_v15  ;;  %v6609_v15 = vld [vmem:[#allocation10 + $0x2a8] ss:$12 sps:$4 sm:$0xff]  }
 0x218   : > { %4631 = vmatprep.subr.bf16.mxu0 %v6583_v16 }
 0x21a   : > { %2562 = vmatpush1.bf16.msra.mxu1 %v6543_v17  ;;  %v6606_v17 = vld [vmem:[#allocation10 + $0x378] ss:$12 sps:$4 sm:$0xff]  }
 0x21b   : > { %5753 = vmatprep.subr.bf16.mxu1 %v6549_v18  ;;  %v6610_v18 = vld [vmem:[#allocation10 + $0x1e8] ss:$12 sps:$4 sm:$0xff]  }
 0x21d   : > { %2580 = vmatmul.mubr.bf16.vlgmr.msra.gmra.mrb[12].mxu1 %v7359_v31  ;;  %v6570_v31 = vld [vmem:[#allocation10 + $0x68] ss:$12 sps:$4 sm:$0xff]  }
 0x21e   : > { %5754 = vmatpush3.bf16.msra.mxu1 %v6550_v19  ;;  %4827 = vmatprep.mubr.bf16.mxu1 %v7390_v6  ;;  %v610_v6 = vsub.s32 3, %v7376_v45  ;;  %v6613_v19 = vld [vmem:[#allocation10 + $0x394] ss:$12 sps:$4 sm:$0xff]  }
 0x21f   : > { %5755 = vmatprep.subr.bf16.mxu1 %v6554_v20  ;;  %v6614_v20 = vld [vmem:[#allocation10 + $0x2c0] ss:$12 sps:$4 sm:$0xff]  }
 0x220   : > { %v611_v36 = vrot.slane %v7378_v49, %v610_v6 }
 0x222   : > { %5756 = vmatpush3.bf16.msra.mxu1 %v6555_v22  ;;  %v6611_v22 = vld [vmem:[#allocation10 + $0x390] ss:$12 sps:$4 sm:$0xff]  }
 0x223   : > { %5757 = vmatprep.subr.bf16.mxu1 %v6559_v23  ;;  %v6615_v23 = vld [vmem:[#allocation10 + $0x200] ss:$12 sps:$4 sm:$0xff]  }
 0x226   : > { %5758 = vmatpush3.bf16.msra.mxu1 %v6560_v24  ;;  %v6618_v24 = vld [vmem:[#allocation10 + $0x3ac] ss:$12 sps:$4 sm:$0xff]  }
 0x227   : > { %5759 = vmatprep.subr.bf16.mxu1 %v6564_v27  ;;  %v6619_v27 = vld [vmem:[#allocation10 + $0x2d8] ss:$12 sps:$4 sm:$0xff]  }
 0x22a   : > { %5760 = vmatpush3.bf16.msra.mxu1 %v6565_v28  ;;  %v6616_v28 = vld [vmem:[#allocation10 + $0x3a8] ss:$12 sps:$4 sm:$0xff]  }
 0x22b   : > { %5761 = vmatprep.subr.bf16.mxu1 %v6569_v29  ;;  %v6620_v29 = vld [vmem:[#allocation10 + $0x218] ss:$12 sps:$4 sm:$0xff]  }
 0x22e   : > { %5762 = vmatpush3.bf16.msra.mxu1 %v6570_v31  ;;  %v6624_v31 = vld [vmem:[#allocation10 + $0x2f0] ss:$12 sps:$4 sm:$0xff]  }
 0x22f   : > { %5763 = vmatprep.subr.bf16.mxu1 %v6574_v33  ;;  %v6621_v33 = vld [vmem:[#allocation10 + $0x3c0] ss:$12 sps:$4 sm:$0xff]  }
 0x230   : > { %v2253_v40 = vpop.f32.mrb[4].mxu1 }
 0x231   : > { %v5887_v41 = vadd.f32 %v2253_v40, %v607_v35  ;;  %v2255_v42 = vpop.f32.mrb[5].mxu1  ;;  %v6628_v35 = vld [vmem:[#allocation10 + $0x3dc] ss:$12 sps:$4 sm:$0xff]   ;;  %v6634_v40 = vld [vmem:[#allocation10 + $0x3e0] ss:$12 sps:$4 sm:$0xff]  }
 0x232   : > { %v5888_v43 = vadd.f32 %v2255_v42, %v611_v36  ;;  %v2257_v44 = vpop.f32.mrb[6].mxu1  ;;  %5764 = vmatpush3.bf16.msra.mxu1 %v6575_v37  ;;  %v6629_v36 = vld [vmem:[#allocation10 + $0x3c8] ss:$12 sps:$4 sm:$0xff]   ;;  %v6626_v37 = vld [vmem:[#allocation10 + $0x3d8] ss:$12 sps:$4 sm:$0xff]  }
 0x233   : > { %v2590_v47 = vmax.f32 %v5887_v41, 0.0  ;;  %v2258_v48 = vpop.f32.mrb[7].mxu1  ;;  %5765 = vmatprep.subr.bf16.mxu1 %v6579_v38  ;;  %v6630_v38 = vld [vmem:[#allocation10 + $0x308] ss:$12 sps:$4 sm:$0xff]   ;;  %v6631_v41 = vld [vmem:[#allocation10 + $0x3f0] ss:$12 sps:$4 sm:$0xff]  }
 0x234   : > { %v2591_v53 = vmax.f32 %v5888_v43, 0.0  ;;  %v6635_v42 = vld [vmem:[#allocation10 + $0x320] ss:$12 sps:$4 sm:$0xff]   ;;  %v6639_v44 = vld [vmem:[#allocation10 + $0x3f8] ss:$12 sps:$4 sm:$0xff]  }
 0x235   : > { %v7416_v56 = vpack.c.bf16 %v2590_v47, %v2590_v47  ;;  %v6638_v43 = vld [vmem:[#allocation10 + $0x40c] ss:$12 sps:$4 sm:$0xff]   ;;  %v6643_v48 = vld [vmem:[#allocation10 + $0x424] ss:$12 sps:$4 sm:$0xff]  }
 0x236   : > { %v2603_v54 = vpack.c.bf16 %v2591_v53, %v2591_v53  ;;  %5766 = vmatpush3.bf16.msra.mxu1 %v6580_v46  ;;  %v6636_v46 = vld [vmem:[#allocation10 + $0x408] ss:$12 sps:$4 sm:$0xff]   ;;  %v6640_v47 = vld [vmem:[#allocation10 + $0x338] ss:$12 sps:$4 sm:$0xff]   ;;  %v614_v53 = vsub.s32 4, %v7376_v45 }
 0x237   : > { %5767 = vmatprep.subr.bf16.mxu1 %v6584_v51  ;;  %v7423_v10 = vpop.f32.mrb[4].mxu0  ;;  %v6644_v51 = vld [vmem:[#allocation10 + $0x410] ss:$12 sps:$4 sm:$0xff]  }
 0x238   : > { %4622 = vmatprep.mubr.bf16.mxu0 %v2603_v54  ;;  %v7425_v11 = vpop.f32.mrb[5].mxu0 }
 0x239   : > { %4623 = vmatmul.mubr.bf16.vlgmr.msra.gmra.mrb[8].mxu0 %v7416_v56  ;;  %v2503_v14 = vpop.f32.mrb[6].mxu0 }
 0x23a   : > { %4632 = vmatpush1.bf16.msra.mxu0 %v6581_v55  ;;  %4663 = vmatprep.mubr.bf16.mxu0 %v7418_v58  ;;  %v2504_v16 = vpop.f32.mrb[7].mxu0  ;;  %v6648_v55 = vld [vmem:[#allocation10 + $0x43c] ss:$12 sps:$4 sm:$0xff]  }
 0x23b   : > { %5768 = vmatpush3.bf16.msra.mxu1 %v6585_v26  ;;  %4633 = vmatprep.subr.bf16.mxu0 %v6588_v57  ;;  %v6646_v26 = vld [vmem:[#allocation10 + $0x438] ss:$12 sps:$4 sm:$0xff]   ;;  %v615_v57 = vrot.slane %v7378_v49, %v614_v53  ;;  %v6670_v14 = vld [vmem:[#allocation10 + $0x488] ss:$12 sps:$4 sm:$0xff]   ;;  %v6674_v16 = vld [vmem:[#allocation10 + $0x560] ss:$12 sps:$4 sm:$0xff]  }
 0x23c   : > { %5775 = vmatprep.subr.bf16.mxu1 %v6589_v60  ;;  %v6653_v60 = vld [vmem:[#allocation10 + $0x454] ss:$12 sps:$4 sm:$0xff]   ;;  %v6660_v49 = vld [vmem:[#allocation10 + $0x398] ss:$12 sps:$4 sm:$0xff]  }
 0x23e   : > { %4634 = vmatpush1.bf16.msra.mxu0 %v6586_v61  ;;  %4828 = vmatmul.mubr.bf16.vlgmr.msra.gmra.mrb[16].mxu1 %v7392_v7  ;;  %v6601_v7 = vld [vmem:[#allocation10 + $0x360] ss:$12 sps:$4 sm:$0xff]  }
 0x23f   : > { %5776 = vmatpush3.bf16.msra.mxu1 %v6590_v62  ;;  %4867 = vmatprep.mubr.bf16.mxu1 %v2603_v54  ;;  %v6645_v54 = vld [vmem:[#allocation10 + $0x350] ss:$12 sps:$4 sm:$0xff]   ;;  %v6654_v61 = vld [vmem:[#allocation10 + $0x440] ss:$12 sps:$4 sm:$0xff]  }
 0x240   : > { %4635 = vmatprep.subr.bf16.mxu0 %v6593_v63  ;;  %5777 = vmatprep.subr.bf16.mxu1 %v6594_v0  ;;  %v6651_v62 = vld [vmem:[#allocation10 + $0x450] ss:$12 sps:$4 sm:$0xff]   ;;  %v5889_v63 = vadd.f32 %v7396_v25, %v615_v57  ;;  %v6655_v0 = vld [vmem:[#allocation10 + $0x380] ss:$12 sps:$4 sm:$0xff]  }
 0x241   : > { %v6665_v25 = vld [vmem:[#allocation10 + $0x3b0] ss:$12 sps:$4 sm:$0xff]  }
 0x242   : > { %4636 = vmatpush1.bf16.msra.mxu0 %v6591_v59  ;;  %v6658_v59 = vld [vmem:[#allocation10 + $0x46c] ss:$12 sps:$4 sm:$0xff]   ;;  %v6703_v57 = vld [vmem:[#allocation10 + $0x544] ss:$12 sps:$4 sm:$0xff]  }
 0x243   : > { %5778 = vmatpush3.bf16.msra.mxu1 %v6595_v1  ;;  %4637 = vmatprep.subr.bf16.mxu0 %v6598_v2  ;;  %v6659_v1 = vld [vmem:[#allocation10 + $0x458] ss:$12 sps:$4 sm:$0xff]   ;;  %v6656_v2 = vld [vmem:[#allocation10 + $0x468] ss:$12 sps:$4 sm:$0xff]  }
 0x244   : > { %5779 = vmatprep.subr.bf16.mxu1 %v6599_v3  ;;  %v2592_v3 = vmax.f32 %v5889_v63, 0.0 }
 0x246   : > { %4638 = vmatpush1.bf16.msra.mxu0 %v6596_v4  ;;  %v6663_v4 = vld [vmem:[#allocation10 + $0x484] ss:$12 sps:$4 sm:$0xff]  }
 0x247   : > { %5780 = vmatpush3.bf16.msra.mxu1 %v6600_v5  ;;  %4639 = vmatprep.subr.bf16.mxu0 %v6603_v8  ;;  %v6664_v5 = vld [vmem:[#allocation10 + $0x470] ss:$12 sps:$4 sm:$0xff]   ;;  %v6661_v8 = vld [vmem:[#allocation10 + $0x480] ss:$12 sps:$4 sm:$0xff]  }
 0x248   : > { %5781 = vmatprep.subr.bf16.mxu1 %v6604_v9  ;;  %v2604_v9 = vpack.c.bf16 %v2592_v3, %v2592_v3  ;;  %v6709_v3 = vld [vmem:[#allocation10 + $0x6c8] ss:$12 sps:$4 sm:$0xff]  }
 0x24a   : > { %4640 = vmatpush1.bf16.msra.mxu0 %v6601_v7  ;;  %v6668_v7 = vld [vmem:[#allocation10 + $0x49c] ss:$12 sps:$4 sm:$0xff]  }
 0x24b   : > { %5782 = vmatpush3.bf16.msra.mxu1 %v6605_v12  ;;  %4641 = vmatprep.subr.bf16.mxu0 %v6608_v13  ;;  %v6669_v12 = vld [vmem:[#allocation10 + $0x548] ss:$12 sps:$4 sm:$0xff]   ;;  %v6666_v13 = vld [vmem:[#allocation10 + $0x498] ss:$12 sps:$4 sm:$0xff]  }
 0x24c   : > { %5783 = vmatprep.subr.bf16.mxu1 %v6609_v15  ;;  %v6673_v15 = vld [vmem:[#allocation10 + $0x4b4] ss:$12 sps:$4 sm:$0xff]  }
 0x24e   : > { %4642 = vmatpush1.bf16.msra.mxu0 %v6606_v17  ;;  %v6671_v17 = vld [vmem:[#allocation10 + $0x4b0] ss:$12 sps:$4 sm:$0xff]  }
 0x24f   : > { %5784 = vmatpush3.bf16.msra.mxu1 %v6610_v18  ;;  %4643 = vmatprep.subr.bf16.mxu0 %v6613_v19  ;;  %v6675_v18 = vld [vmem:[#allocation10 + $0x4a0] ss:$12 sps:$4 sm:$0xff]  }
 0x250   : > { %5785 = vmatprep.subr.bf16.mxu1 %v6614_v20  ;;  %v6678_v19 = vld [vmem:[#allocation10 + $0x4cc] ss:$12 sps:$4 sm:$0xff]  }
 0x251   : > { %v6679_v20 = vld [vmem:[#allocation10 + $0x578] ss:$12 sps:$4 sm:$0xff]  }
 0x252   : > { %4644 = vmatpush1.bf16.msra.mxu0 %v6611_v22  ;;  %v6676_v22 = vld [vmem:[#allocation10 + $0x4c8] ss:$12 sps:$4 sm:$0xff]  }
 0x253   : > { %5786 = vmatpush3.bf16.msra.mxu1 %v6615_v23  ;;  %4645 = vmatprep.subr.bf16.mxu0 %v6618_v24  ;;  %v6680_v23 = vld [vmem:[#allocation10 + $0x4b8] ss:$12 sps:$4 sm:$0xff]  }
 0x254   : > { %5787 = vmatprep.subr.bf16.mxu1 %v6619_v27  ;;  %v6683_v24 = vld [vmem:[#allocation10 + $0x4e4] ss:$12 sps:$4 sm:$0xff]  }
 0x255   : > { %v6684_v27 = vld [vmem:[#allocation10 + $0x590] ss:$12 sps:$4 sm:$0xff]  }
 0x256   : > { %4646 = vmatpush1.bf16.msra.mxu0 %v6616_v28  ;;  %v6681_v28 = vld [vmem:[#allocation10 + $0x4e0] ss:$12 sps:$4 sm:$0xff]  }
 0x257   : > { %5788 = vmatpush3.bf16.msra.mxu1 %v6620_v29  ;;  %4647 = vmatprep.subr.bf16.mxu0 %v6623_v30  ;;  %v6685_v29 = vld [vmem:[#allocation10 + $0x4d0] ss:$12 sps:$4 sm:$0xff]  }
 0x258   : > { %5789 = vmatprep.subr.bf16.mxu1 %v6624_v31  ;;  %v6688_v30 = vld [vmem:[#allocation10 + $0x4fc] ss:$12 sps:$4 sm:$0xff]  }
 0x259   : > { %v6689_v31 = vld [vmem:[#allocation10 + $0x5a8] ss:$12 sps:$4 sm:$0xff]  }
 0x25a   : > { %4648 = vmatpush1.bf16.msra.mxu0 %v6621_v33  ;;  %v6686_v33 = vld [vmem:[#allocation10 + $0x4f8] ss:$12 sps:$4 sm:$0xff]  }
 0x25b   : > { %5790 = vmatpush3.bf16.msra.mxu1 %v6625_v34  ;;  %4649 = vmatprep.subr.bf16.mxu0 %v6628_v35  ;;  %v626_v34 = vsub.s32 7, %v7376_v45  ;;  %v6690_v35 = vld [vmem:[#allocation10 + $0x4e8] ss:$12 sps:$4 sm:$0xff]  }
 0x25c   : > { %5797 = vmatprep.subr.bf16.mxu1 %v6629_v36  ;;  %v6693_v36 = vld [vmem:[#allocation10 + $0x514] ss:$12 sps:$4 sm:$0xff]  }
 0x25e   : > { %4650 = vmatpush1.bf16.msra.mxu0 %v6626_v37  ;;  %4868 = vmatmul.mubr.bf16.vlgmr.msra.gmra.mrb[20].mxu1 %v7416_v56  ;;  %v6649_v56 = vld [vmem:[#allocation10 + $0x428] ss:$12 sps:$4 sm:$0xff]   ;;  %v622_v37 = vsub.s32 6, %v7376_v45  ;;  %v6807_v45 = vld [vmem:[#allocation10 + $0x780] ss:$12 sps:$4 sm:$0xff]  }
 0x25f   : > { %5798 = vmatpush3.bf16.msra.mxu1 %v6630_v38  ;;  %4907 = vmatprep.mubr.bf16.mxu1 %v7418_v58  ;;  %v6650_v58 = vld [vmem:[#allocation10 + $0x368] ss:$12 sps:$4 sm:$0xff]   ;;  %v6694_v38 = vld [vmem:[#allocation10 + $0x5c0] ss:$12 sps:$4 sm:$0xff]  }
 0x260   : > { %4651 = vmatprep.subr.bf16.mxu0 %v6633_v39  ;;  %5799 = vmatprep.subr.bf16.mxu1 %v6634_v40  ;;  %v7434_v39 = vld [vmem:[#allocation9 + $0x8] sm:$0xf] }
 0x261   : > { %v6691_v40 = vld [vmem:[#allocation10 + $0x510] ss:$12 sps:$4 sm:$0xff]  }
 0x262   : > { %4652 = vmatpush1.bf16.msra.mxu0 %v6631_v41  ;;  %v6855_v41 = vld [vmem:[#allocation9] sm:$0xff] }
 0x263   : > { %5800 = vmatpush3.bf16.msra.mxu1 %v6635_v42  ;;  %4653 = vmatprep.subr.bf16.mxu0 %v6638_v43  ;;  %v627_v42 = vrot.slane %v6855_v41, %v626_v34  ;;  %v6695_v43 = vld [vmem:[#allocation10 + $0x500] ss:$12 sps:$4 sm:$0xff]   ;;  %v631_v34 = vrot.slane %v7434_v39, %v7381_v50 }
 0x264   : > { %5801 = vmatprep.subr.bf16.mxu1 %v6639_v44  ;;  %v6698_v44 = vld [vmem:[#allocation10 + $0x52c] ss:$12 sps:$4 sm:$0xff]  }
 0x266   : > { %4654 = vmatpush1.bf16.msra.mxu0 %v6636_v46  ;;  %v623_v46 = vrot.slane %v6855_v41, %v622_v37  ;;  %v6740_v37 = vld [vmem:[#allocation10 + $0x698] ss:$12 sps:$4 sm:$0xff]   ;;  %v6744_v41 = vld [vmem:[#allocation10 + $0x770] ss:$12 sps:$4 sm:$0xff]  }
 0x267   : > { %5802 = vmatpush3.bf16.msra.mxu1 %v6640_v47  ;;  %4655 = vmatprep.subr.bf16.mxu0 %v6643_v48  ;;  %v6699_v48 = vld [vmem:[#allocation10 + $0x5d8] ss:$12 sps:$4 sm:$0xff]  }
 0x268   : > { %5803 = vmatprep.subr.bf16.mxu1 %v6644_v51  ;;  %v635_v51 = vrot.slane %v7434_v39, %v7384_v21 }
 0x26a   : > { %4656 = vmatpush1.bf16.msra.mxu0 %v6641_v52 }
 0x26b   : > { %5804 = vmatpush3.bf16.msra.mxu1 %v6645_v54  ;;  %4657 = vmatprep.subr.bf16.mxu0 %v6648_v55  ;;  %v6696_v55 = vld [vmem:[#allocation10 + $0x528] ss:$12 sps:$4 sm:$0xff]  }
 0x26c   : > { %5805 = vmatprep.subr.bf16.mxu1 %v6649_v56 }
 0x26e   : > { %4658 = vmatpush1.bf16.msra.mxu0 %v6646_v26  ;;  %v6700_v26 = vld [vmem:[#allocation10 + $0x518] ss:$12 sps:$4 sm:$0xff]  }
 0x26f   : > { %5806 = vmatpush3.bf16.msra.mxu1 %v6650_v58  ;;  %4659 = vmatprep.subr.bf16.mxu0 %v6653_v60 }
 0x270   : > { %5807 = vmatprep.subr.bf16.mxu1 %v6654_v61  ;;  %v5894_v61 = vadd.f32 %v7425_v11, %v635_v51  ;;  %v6771_v51 = vld [vmem:[#allocation10 + $0x788] ss:$12 sps:$4 sm:$0xff]  }
 0x272   : > { %4660 = vmatpush1.bf16.msra.mxu0 %v6651_v62  ;;  %v6704_v62 = vld [vmem:[#allocation10 + $0x5f0] ss:$12 sps:$4 sm:$0xff]  }
 0x273   : > { %5808 = vmatpush3.bf16.msra.mxu1 %v6655_v0  ;;  %4661 = vmatprep.subr.bf16.mxu0 %v6658_v59  ;;  %v6701_v0 = vld [vmem:[#allocation10 + $0x540] ss:$12 sps:$4 sm:$0xff]   ;;  %v6705_v59 = vld [vmem:[#allocation10 + $0x530] ss:$12 sps:$4 sm:$0xff]  }
 0x274   : > { %5809 = vmatprep.subr.bf16.mxu1 %v6659_v1  ;;  %v6708_v1 = vld [vmem:[#allocation10 + $0x55c] ss:$12 sps:$4 sm:$0xff]  }
 0x276   : > { %4662 = vmatpush1.bf16.msra.mxu0 %v6656_v2 }
 0x277   : > { %5810 = vmatpush3.bf16.msra.mxu1 %v6660_v49  ;;  %4672 = vmatprep.subr.bf16.mxu0 %v6663_v4  ;;  %v2597_v49 = vmax.f32 %v5894_v61, 0.0  ;;  %v6706_v4 = vld [vmem:[#allocation10 + $0x558] ss:$12 sps:$4 sm:$0xff]   ;;  %v6785_v61 = vld [vmem:[#allocation10 + $0x890] ss:$12 sps:$4 sm:$0xff]  }
 0x278   : > { %5811 = vmatprep.subr.bf16.mxu1 %v6664_v5  ;;  %v6710_v5 = vld [vmem:[#allocation10 + $0x608] ss:$12 sps:$4 sm:$0xff]  }
 0x279   : > { %4664 = vmatmul.mubr.bf16.vlgmr.msra.gmra.mrb[8].mxu0 %v2604_v9 }
 0x27a   : > { %4673 = vmatpush1.bf16.msra.mxu0 %v6661_v8  ;;  %v6713_v8 = vld [vmem:[#allocation10 + $0x574] ss:$12 sps:$4 sm:$0xff]  }
 0x27b   : > { %5812 = vmatpush3.bf16.msra.mxu1 %v6665_v25  ;;  %4674 = vmatprep.subr.bf16.mxu0 %v6668_v7  ;;  %v7441_v25 = vpack.c.bf16 %v2597_v49, %v2597_v49  ;;  %v6711_v7 = vld [vmem:[#allocation10 + $0x570] ss:$12 sps:$4 sm:$0xff]   ;;  %v6795_v49 = vld [vmem:[#allocation10 + $0x8c0] ss:$12 sps:$4 sm:$0xff]  }
 0x27c   : > { %5819 = vmatprep.subr.bf16.mxu1 %v6669_v12  ;;  %v6715_v12 = vld [vmem:[#allocation10 + $0x620] ss:$12 sps:$4 sm:$0xff]  }
 0x27e   : > { %4675 = vmatpush1.bf16.msra.mxu0 %v6666_v13  ;;  %4908 = vmatmul.mubr.bf16.vlgmr.msra.gmra.mrb[24].mxu1 %v2604_v9  ;;  %v6714_v9 = vld [vmem:[#allocation10 + $0x6e0] ss:$12 sps:$4 sm:$0xff]  }
 0x27f   : > { %5820 = vmatpush3.bf16.msra.mxu1 %v6670_v14  ;;  %4676 = vmatprep.subr.bf16.mxu0 %v6673_v15  ;;  %v6718_v13 = vld [vmem:[#allocation10 + $0x58c] ss:$12 sps:$4 sm:$0xff]   ;;  %v6716_v15 = vld [vmem:[#allocation10 + $0x588] ss:$12 sps:$4 sm:$0xff]  }
 0x280   : > { %5821 = vmatprep.subr.bf16.mxu1 %v6674_v16  ;;  %v6719_v14 = vld [vmem:[#allocation10 + $0x6f8] ss:$12 sps:$4 sm:$0xff]  }
 0x281   : > { %v6720_v16 = vld [vmem:[#allocation10 + $0x638] ss:$12 sps:$4 sm:$0xff]  }
 0x282   : > { %4677 = vmatpush1.bf16.msra.mxu0 %v6671_v17  ;;  %v6723_v17 = vld [vmem:[#allocation10 + $0x5a4] ss:$12 sps:$4 sm:$0xff]  }
 0x283   : > { %5822 = vmatpush3.bf16.msra.mxu1 %v6675_v18  ;;  %4678 = vmatprep.subr.bf16.mxu0 %v6678_v19  ;;  %v6724_v18 = vld [vmem:[#allocation10 + $0x710] ss:$12 sps:$4 sm:$0xff]   ;;  %v6721_v19 = vld [vmem:[#allocation10 + $0x5a0] ss:$12 sps:$4 sm:$0xff]  }
 0x284   : > { %5823 = vmatprep.subr.bf16.mxu1 %v6679_v20  ;;  %v6725_v20 = vld [vmem:[#allocation10 + $0x650] ss:$12 sps:$4 sm:$0xff]  }
 0x286   : > { %4679 = vmatpush1.bf16.msra.mxu0 %v6676_v22  ;;  %v6728_v22 = vld [vmem:[#allocation10 + $0x5bc] ss:$12 sps:$4 sm:$0xff]  }
 0x287   : > { %5824 = vmatpush3.bf16.msra.mxu1 %v6680_v23  ;;  %4680 = vmatprep.subr.bf16.mxu0 %v6683_v24  ;;  %v6729_v23 = vld [vmem:[#allocation10 + $0x728] ss:$12 sps:$4 sm:$0xff]   ;;  %v6726_v24 = vld [vmem:[#allocation10 + $0x5b8] ss:$12 sps:$4 sm:$0xff]  }
 0x288   : > { %5825 = vmatprep.subr.bf16.mxu1 %v6684_v27  ;;  %v6730_v27 = vld [vmem:[#allocation10 + $0x668] ss:$12 sps:$4 sm:$0xff]  }
 0x28a   : > { %4681 = vmatpush1.bf16.msra.mxu0 %v6681_v28  ;;  %v6733_v28 = vld [vmem:[#allocation10 + $0x5d4] ss:$12 sps:$4 sm:$0xff]  }
 0x28b   : > { %5826 = vmatpush3.bf16.msra.mxu1 %v6685_v29  ;;  %4682 = vmatprep.subr.bf16.mxu0 %v6688_v30  ;;  %v6734_v29 = vld [vmem:[#allocation10 + $0x740] ss:$12 sps:$4 sm:$0xff]   ;;  %v6731_v30 = vld [vmem:[#allocation10 + $0x5d0] ss:$12 sps:$4 sm:$0xff]  }
 0x28c   : > { %5827 = vmatprep.subr.bf16.mxu1 %v6689_v31  ;;  %v6735_v31 = vld [vmem:[#allocation10 + $0x680] ss:$12 sps:$4 sm:$0xff]  }
 0x28e   : > { %4683 = vmatpush1.bf16.msra.mxu0 %v6686_v33  ;;  %v6738_v33 = vld [vmem:[#allocation10 + $0x5ec] ss:$12 sps:$4 sm:$0xff]  }
 0x28f   : > { %5828 = vmatpush3.bf16.msra.mxu1 %v6690_v35  ;;  %4684 = vmatprep.subr.bf16.mxu0 %v6693_v36  ;;  %v6739_v35 = vld [vmem:[#allocation10 + $0x758] ss:$12 sps:$4 sm:$0xff]   ;;  %v6736_v36 = vld [vmem:[#allocation10 + $0x5e8] ss:$12 sps:$4 sm:$0xff]  }
 0x290   : > { %v2417_v47 = vpop.f32.mrb[8].mxu1  ;;  %5829 = vmatprep.subr.bf16.mxu1 %v6694_v38  ;;  %v6743_v38 = vld [vmem:[#allocation10 + $0x604] ss:$12 sps:$4 sm:$0xff]  }
 0x291   : > { %v2419_v52 = vpop.f32.mrb[9].mxu1  ;;  %v5891_v58 = vadd.f32 %v2417_v47, %v623_v46  ;;  %v6770_v47 = vld [vmem:[#allocation10 + $0x848] ss:$12 sps:$4 sm:$0xff]  }
 0x292   : > { %v5892_v53 = vadd.f32 %v2419_v52, %v627_v42  ;;  %4685 = vmatpush1.bf16.msra.mxu0 %v6691_v40  ;;  %v2421_v54 = vpop.f32.mrb[10].mxu1  ;;  %v5893_v40 = vadd.f32 %v7423_v10, %v631_v34  ;;  %v6741_v42 = vld [vmem:[#allocation10 + $0x600] ss:$12 sps:$4 sm:$0xff]  }
 0x293   : > { %5830 = vmatpush3.bf16.msra.mxu1 %v6695_v43  ;;  %v2422_v56 = vpop.f32.mrb[11].mxu1  ;;  %4686 = vmatprep.subr.bf16.mxu0 %v6698_v44  ;;  %v2594_v2 = vmax.f32 %v5891_v58, 0.0  ;;  %v6745_v43 = vld [vmem:[#allocation10 + $0x6b0] ss:$12 sps:$4 sm:$0xff]   ;;  %v6751_v10 = vld [vmem:[#allocation10 + $0x634] ss:$12 sps:$4 sm:$0xff]  }
 0x294   : > { %v2595_v60 = vmax.f32 %v5892_v53, 0.0  ;;  %5831 = vmatprep.subr.bf16.mxu1 %v6699_v48  ;;  %v6748_v44 = vld [vmem:[#allocation10 + $0x61c] ss:$12 sps:$4 sm:$0xff]   ;;  %v2596_v46 = vmax.f32 %v5893_v40, 0.0  ;;  %v6746_v48 = vld [vmem:[#allocation10 + $0x618] ss:$12 sps:$4 sm:$0xff]  }
 0x295   : > { %v7439_v11 = vpack.c.bf16 %v2594_v2, %v2594_v2  ;;  %v6775_v53 = vld [vmem:[#allocation10 + $0x860] ss:$12 sps:$4 sm:$0xff]   ;;  %v6749_v54 = vld [vmem:[#allocation10 + $0x630] ss:$12 sps:$4 sm:$0xff]  }
 0x296   : > { %v2607_v63 = vpack.c.bf16 %v2595_v60, %v2595_v60  ;;  %4687 = vmatpush1.bf16.msra.mxu0 %v6696_v55  ;;  %v7450_v52 = vpack.c.bf16 %v2596_v46, %v2596_v46  ;;  %v6754_v55 = vld [vmem:[#allocation10 + $0x64c] ss:$12 sps:$4 sm:$0xff]   ;;  %v6757_v58 = vld [vmem:[#allocation10 + $0x664] ss:$12 sps:$4 sm:$0xff]   ;;  %v6763_v2 = vld [vmem:[#allocation10 + $0x694] ss:$12 sps:$4 sm:$0xff]  }
 0x297   : > { %5832 = vmatpush3.bf16.msra.mxu1 %v6700_v26  ;;  %4688 = vmatprep.subr.bf16.mxu0 %v6703_v57  ;;  %v6776_v56 = vld [vmem:[#allocation10 + $0x7a0] ss:$12 sps:$4 sm:$0xff]   ;;  %v6780_v26 = vld [vmem:[#allocation10 + $0x878] ss:$12 sps:$4 sm:$0xff]   ;;  %v6752_v57 = vld [vmem:[#allocation10 + $0x648] ss:$12 sps:$4 sm:$0xff]  }
 0x298   : > { %4704 = vmatprep.mubr.bf16.mxu0 %v2607_v63  ;;  %4947 = vmatprep.mubr.bf16.mxu1 %v2607_v63  ;;  %v6781_v60 = vld [vmem:[#allocation10 + $0x7b8] ss:$12 sps:$4 sm:$0xff]   ;;  %v6760_v63 = vld [vmem:[#allocation10 + $0x67c] ss:$12 sps:$4 sm:$0xff]  }
 0x299   : > { %5833 = vmatprep.subr.bf16.mxu1 %v6704_v62  ;;  %v6755_v62 = vld [vmem:[#allocation10 + $0x660] ss:$12 sps:$4 sm:$0xff]  }
 0x29a   : > { %4689 = vmatpush1.bf16.msra.mxu0 %v6701_v0  ;;  %v6786_v0 = vld [vmem:[#allocation10 + $0x7d0] ss:$12 sps:$4 sm:$0xff]  }
 0x29b   : > { %5834 = vmatpush3.bf16.msra.mxu1 %v6705_v59  ;;  %4690 = vmatprep.subr.bf16.mxu0 %v6708_v1  ;;  %v6790_v59 = vld [vmem:[#allocation10 + $0x8a8] ss:$12 sps:$4 sm:$0xff]   ;;  %v6758_v1 = vld [vmem:[#allocation10 + $0x678] ss:$12 sps:$4 sm:$0xff]  }
 0x29c   : > { %5841 = vmatprep.subr.bf16.mxu1 %v6709_v3  ;;  %v6791_v3 = vld [vmem:[#allocation10 + $0x7e8] ss:$12 sps:$4 sm:$0xff]  }
 0x29e   : > { %4691 = vmatpush1.bf16.msra.mxu0 %v6706_v4  ;;  %4948 = vmatmul.mubr.bf16.vlgmr.msra.gmra.mrb[28].mxu1 %v7439_v11  ;;  %v6761_v4 = vld [vmem:[#allocation10 + $0x690] ss:$12 sps:$4 sm:$0xff]  }
 0x29f   : > { %5842 = vmatpush3.bf16.msra.mxu1 %v6710_v5  ;;  %4987 = vmatprep.mubr.bf16.mxu1 %v7441_v25  ;;  %v6766_v5 = vld [vmem:[#allocation10 + $0x6ac] ss:$12 sps:$4 sm:$0xff]  }
 0x2a0   : > { %4692 = vmatprep.subr.bf16.mxu0 %v6713_v8  ;;  %5843 = vmatprep.subr.bf16.mxu1 %v6714_v9  ;;  %v6800_v8 = vld [vmem:[#allocation10 + $0x8d8] ss:$12 sps:$4 sm:$0xff]   ;;  %v6764_v9 = vld [vmem:[#allocation10 + $0x6a8] ss:$12 sps:$4 sm:$0xff]  }
 0x2a2   : > { %4693 = vmatpush1.bf16.msra.mxu0 %v6711_v7  ;;  %v6801_v7 = vld [vmem:[#allocation10 + $0x818] ss:$12 sps:$4 sm:$0xff]  }
 0x2a3   : > { %5844 = vmatpush3.bf16.msra.mxu1 %v6715_v12  ;;  %4694 = vmatprep.subr.bf16.mxu0 %v6718_v13  ;;  %v6805_v12 = vld [vmem:[#allocation10 + $0x8f0] ss:$12 sps:$4 sm:$0xff]   ;;  %v6767_v13 = vld [vmem:[#allocation10 + $0x6c0] ss:$12 sps:$4 sm:$0xff]  }
 0x2a4   : > { %5845 = vmatprep.subr.bf16.mxu1 %v6719_v14  ;;  %v6774_v14 = vld [vmem:[#allocation10 + $0x6dc] ss:$12 sps:$4 sm:$0xff]  }
 0x2a6   : > { %4695 = vmatpush1.bf16.msra.mxu0 %v6716_v15  ;;  %v6806_v15 = vld [vmem:[#allocation10 + $0x830] ss:$12 sps:$4 sm:$0xff]  }
 0x2a7   : > { %5846 = vmatpush3.bf16.msra.mxu1 %v6720_v16  ;;  %4696 = vmatprep.subr.bf16.mxu0 %v6723_v17  ;;  %v6772_v16 = vld [vmem:[#allocation10 + $0x6d8] ss:$12 sps:$4 sm:$0xff]   ;;  %v6779_v17 = vld [vmem:[#allocation10 + $0x6f4] ss:$12 sps:$4 sm:$0xff]  }
 0x2a8   : > { %5847 = vmatprep.subr.bf16.mxu1 %v6724_v18  ;;  %v6777_v18 = vld [vmem:[#allocation10 + $0x6f0] ss:$12 sps:$4 sm:$0xff]  }
 0x2aa   : > { %4697 = vmatpush1.bf16.msra.mxu0 %v6721_v19  ;;  %v6784_v19 = vld [vmem:[#allocation10 + $0x70c] ss:$12 sps:$4 sm:$0xff]  }
 0x2ab   : > { %5848 = vmatpush3.bf16.msra.mxu1 %v6725_v20  ;;  %4698 = vmatprep.subr.bf16.mxu0 %v6728_v22  ;;  %v6782_v20 = vld [vmem:[#allocation10 + $0x708] ss:$12 sps:$4 sm:$0xff]   ;;  %v6789_v22 = vld [vmem:[#allocation10 + $0x724] ss:$12 sps:$4 sm:$0xff]  }
 0x2ac   : > { %5849 = vmatprep.subr.bf16.mxu1 %v6729_v23  ;;  %v6787_v23 = vld [vmem:[#allocation10 + $0x720] ss:$12 sps:$4 sm:$0xff]  }
 0x2ae   : > { %4699 = vmatpush1.bf16.msra.mxu0 %v6726_v24  ;;  %v6794_v24 = vld [vmem:[#allocation10 + $0x73c] ss:$12 sps:$4 sm:$0xff]  }
 0x2af   : > { %5850 = vmatpush3.bf16.msra.mxu1 %v6730_v27  ;;  %4700 = vmatprep.subr.bf16.mxu0 %v6733_v28  ;;  %v6792_v27 = vld [vmem:[#allocation10 + $0x738] ss:$12 sps:$4 sm:$0xff]   ;;  %v6799_v28 = vld [vmem:[#allocation10 + $0x754] ss:$12 sps:$4 sm:$0xff]  }
 0x2b0   : > { %5851 = vmatprep.subr.bf16.mxu1 %v6734_v29  ;;  %v639_v29 = vrot.slane %v7434_v39, %v7406_v32 }
 0x2b2   : > { %4701 = vmatpush1.bf16.msra.mxu0 %v6731_v30  ;;  %v6797_v30 = vld [vmem:[#allocation10 + $0x750] ss:$12 sps:$4 sm:$0xff]  }
 0x2b3   : > { %5852 = vmatpush3.bf16.msra.mxu1 %v6735_v31  ;;  %4702 = vmatprep.subr.bf16.mxu0 %v6738_v33  ;;  %v643_v31 = vrot.slane %v7434_v39, %v610_v6  ;;  %v6804_v33 = vld [vmem:[#allocation10 + $0x76c] ss:$12 sps:$4 sm:$0xff]   ;;  %v6812_v6 = vld [vmem:[#allocation10 + $0x79c] ss:$12 sps:$4 sm:$0xff]  }
 0x2b4   : > { %5853 = vmatprep.subr.bf16.mxu1 %v6739_v35  ;;  %v6810_v39 = vld [vmem:[#allocation10 + $0x798] ss:$12 sps:$4 sm:$0xff]  }
 0x2b6   : > { %4703 = vmatpush1.bf16.msra.mxu0 %v6736_v36 }
 0x2b7   : > { %5854 = vmatpush3.bf16.msra.mxu1 %v6740_v37  ;;  %4713 = vmatprep.subr.bf16.mxu0 %v6743_v38  ;;  %v6802_v38 = vld [vmem:[#allocation10 + $0x768] ss:$12 sps:$4 sm:$0xff]  }
 0x2b8   : > { %5855 = vmatprep.subr.bf16.mxu1 %v6744_v41 }
 0x2b9   : > { %4705 = vmatmul.mubr.bf16.vlgmr.msra.gmra.mrb[8].mxu0 %v7439_v11  ;;  %v6796_v11 = vld [vmem:[#allocation10 + $0x800] ss:$12 sps:$4 sm:$0xff]  }
 0x2ba   : > { %4714 = vmatpush1.bf16.msra.mxu0 %v6741_v42  ;;  %4745 = vmatprep.mubr.bf16.mxu0 %v7441_v25  ;;  %v6769_v25 = vld [vmem:[#allocation10 + $0x6c4] ss:$12 sps:$4 sm:$0xff]  }
 0x2bb   : > { %5856 = vmatpush3.bf16.msra.mxu1 %v6745_v43  ;;  %4715 = vmatprep.subr.bf16.mxu0 %v6748_v44  ;;  %v6809_v42 = vld [vmem:[#allocation10 + $0x784] ss:$12 sps:$4 sm:$0xff]  }
 0x2bc   : > { %5863 = vmatprep.subr.bf16.mxu1 %v6770_v47 }
 0x2be   : > { %4716 = vmatpush1.bf16.msra.mxu0 %v6746_v48  ;;  %4988 = vmatmul.mubr.bf16.vlgmr.msra.gmra.mrb[32].mxu1 %v7450_v52  ;;  %v6815_v48 = vld [vmem:[#allocation10 + $0x7b4] ss:$12 sps:$4 sm:$0xff]  }
 0x2bf   : > { %4717 = vmatprep.subr.bf16.mxu0 %v6751_v10  ;;  %5864 = vmatpush3.bf16.msra.mxu1 %v6771_v51  ;;  %v6813_v10 = vld [vmem:[#allocation10 + $0x7b0] ss:$12 sps:$4 sm:$0xff]   ;;  %v6818_v51 = vld [vmem:[#allocation10 + $0x7cc] ss:$12 sps:$4 sm:$0xff]  }
 0x2c0   : > { %5865 = vmatprep.subr.bf16.mxu1 %v6775_v53  ;;  %v6816_v53 = vld [vmem:[#allocation10 + $0x7c8] ss:$12 sps:$4 sm:$0xff]  }
 0x2c2   : > { %4718 = vmatpush1.bf16.msra.mxu0 %v6749_v54  ;;  %v6821_v54 = vld [vmem:[#allocation10 + $0x7e4] ss:$12 sps:$4 sm:$0xff]  }
 0x2c3   : > { %4719 = vmatprep.subr.bf16.mxu0 %v6754_v55  ;;  %5866 = vmatpush3.bf16.msra.mxu1 %v6776_v56  ;;  %v6819_v55 = vld [vmem:[#allocation10 + $0x7e0] ss:$12 sps:$4 sm:$0xff]   ;;  %v6824_v56 = vld [vmem:[#allocation10 + $0x7fc] ss:$12 sps:$4 sm:$0xff]  }
 0x2c4   : > { %5867 = vmatprep.subr.bf16.mxu1 %v6780_v26  ;;  %v6827_v26 = vld [vmem:[#allocation10 + $0x814] ss:$12 sps:$4 sm:$0xff]  }
 0x2c6   : > { %4720 = vmatpush1.bf16.msra.mxu0 %v6752_v57  ;;  %v6825_v57 = vld [vmem:[#allocation10 + $0x810] ss:$12 sps:$4 sm:$0xff]  }
 0x2c7   : > { %4721 = vmatprep.subr.bf16.mxu0 %v6757_v58  ;;  %5868 = vmatpush3.bf16.msra.mxu1 %v6781_v60  ;;  %v6830_v58 = vld [vmem:[#allocation10 + $0x82c] ss:$12 sps:$4 sm:$0xff]  }
 0x2c8   : > { %5869 = vmatprep.subr.bf16.mxu1 %v6785_v61 }
 0x2ca   : > { %4722 = vmatpush1.bf16.msra.mxu0 %v6755_v62  ;;  %v6828_v62 = vld [vmem:[#allocation10 + $0x828] ss:$12 sps:$4 sm:$0xff]  }
 0x2cb   : > { %4723 = vmatprep.subr.bf16.mxu0 %v6760_v63  ;;  %5870 = vmatpush3.bf16.msra.mxu1 %v6786_v0 }
 0x2cc   : > { %5871 = vmatprep.subr.bf16.mxu1 %v6790_v59  ;;  %v6833_v59 = vld [vmem:[#allocation10 + $0x844] ss:$12 sps:$4 sm:$0xff]  }
 0x2ce   : > { %4724 = vmatpush1.bf16.msra.mxu0 %v6758_v1 }
 0x2cf   : > { %4725 = vmatprep.subr.bf16.mxu0 %v6763_v2  ;;  %5872 = vmatpush3.bf16.msra.mxu1 %v6791_v3  ;;  %v6831_v2 = vld [vmem:[#allocation10 + $0x840] ss:$12 sps:$4 sm:$0xff]   ;;  %v6836_v3 = vld [vmem:[#allocation10 + $0x85c] ss:$12 sps:$4 sm:$0xff]  }
 0x2d0   : > { %5873 = vmatprep.subr.bf16.mxu1 %v6795_v49  ;;  %v6834_v49 = vld [vmem:[#allocation10 + $0x858] ss:$12 sps:$4 sm:$0xff]  }
 0x2d2   : > { %4726 = vmatpush1.bf16.msra.mxu0 %v6761_v4  ;;  %v6839_v4 = vld [vmem:[#allocation10 + $0x874] ss:$12 sps:$4 sm:$0xff]  }
 0x2d3   : > { %4727 = vmatprep.subr.bf16.mxu0 %v6766_v5  ;;  %5874 = vmatpush3.bf16.msra.mxu1 %v6796_v11  ;;  %v6837_v5 = vld [vmem:[#allocation10 + $0x870] ss:$12 sps:$4 sm:$0xff]   ;;  %v6842_v11 = vld [vmem:[#allocation10 + $0x88c] ss:$12 sps:$4 sm:$0xff]  }
 0x2d4   : > { %5875 = vmatprep.subr.bf16.mxu1 %v6800_v8  ;;  %v6840_v8 = vld [vmem:[#allocation10 + $0x888] ss:$12 sps:$4 sm:$0xff]  }
 0x2d6   : > { %4728 = vmatpush1.bf16.msra.mxu0 %v6764_v9  ;;  %v6845_v9 = vld [vmem:[#allocation10 + $0x8a4] ss:$12 sps:$4 sm:$0xff]  }
 0x2d7   : > { %4729 = vmatprep.subr.bf16.mxu0 %v6769_v25  ;;  %5876 = vmatpush3.bf16.msra.mxu1 %v6801_v7  ;;  %v6843_v25 = vld [vmem:[#allocation10 + $0x8a0] ss:$12 sps:$4 sm:$0xff]   ;;  %v6848_v7 = vld [vmem:[#allocation10 + $0x8bc] ss:$12 sps:$4 sm:$0xff]  }
 0x2d8   : > { %5877 = vmatprep.subr.bf16.mxu1 %v6805_v12  ;;  %v6846_v12 = vld [vmem:[#allocation10 + $0x8b8] ss:$12 sps:$4 sm:$0xff]  }
 0x2da   : > { %4730 = vmatpush1.bf16.msra.mxu0 %v6767_v13  ;;  %v6851_v13 = vld [vmem:[#allocation10 + $0x8d4] ss:$12 sps:$4 sm:$0xff]  }
 0x2db   : > { %4731 = vmatprep.subr.bf16.mxu0 %v6774_v14  ;;  %5878 = vmatpush3.bf16.msra.mxu1 %v6806_v15  ;;  %v2996_v14 = vld [vmem:[#allocation12] sm:$0x7]  ;;  %v6849_v15 = vld [vmem:[#allocation10 + $0x8d0] ss:$12 sps:$4 sm:$0xff]  }
 0x2de   : > { %4732 = vmatpush1.bf16.msra.mxu0 %v6772_v16  ;;  %v3009_v16 = vrot.slane %v2996_v14, %v7406_v32 }
 0x2df   : > { %4733 = vmatprep.subr.bf16.mxu0 %v6779_v17  ;;  %v6854_v17 = vld [vmem:[#allocation10 + $0x8ec] ss:$12 sps:$4 sm:$0xff]  }
 0x2e2   : > { %4734 = vmatpush1.bf16.msra.mxu0 %v6777_v18 }
 0x2e3   : > { %4735 = vmatprep.subr.bf16.mxu0 %v6784_v19 }
 0x2e6   : > { %4736 = vmatpush1.bf16.msra.mxu0 %v6782_v20  ;;  %v6852_v20 = vld [vmem:[#allocation10 + $0x8e8] ss:$12 sps:$4 sm:$0xff]  }
 0x2e7   : > { %4737 = vmatprep.subr.bf16.mxu0 %v6789_v22 }
 0x2ea   : > { %4738 = vmatpush1.bf16.msra.mxu0 %v6787_v23 }
 0x2eb   : > { %4739 = vmatprep.subr.bf16.mxu0 %v6794_v24 }
 0x2ee   : > { %4740 = vmatpush1.bf16.msra.mxu0 %v6792_v27 }
 0x2ef   : > { %4741 = vmatprep.subr.bf16.mxu0 %v6799_v28 }
 0x2f0   : > { %v2581_v34 = vpop.f32.mrb[12].mxu1 }
 0x2f1   : > { %v5895_v35 = vadd.f32 %v2581_v34, %v639_v29  ;;  %v2583_v36 = vpop.f32.mrb[13].mxu1 }
 0x2f2   : > { %v5896_v37 = vadd.f32 %v2583_v36, %v643_v31  ;;  %4742 = vmatpush1.bf16.msra.mxu0 %v6797_v30  ;;  %v2585_v40 = vpop.f32.mrb[14].mxu1 }
 0x2f3   : > { %v2598_v41 = vmax.f32 %v5895_v35, 0.0  ;;  %4743 = vmatprep.subr.bf16.mxu0 %v6804_v33  ;;  %v2586_v43 = vpop.f32.mrb[15].mxu1 }
 0x2f4   : > { %v2599_v44 = vmax.f32 %v5896_v37, 0.0 }
 0x2f5   : > { %v7458_v46 = vpack.c.bf16 %v2598_v41, %v2598_v41 }
 0x2f6   : > { %v2611_v47 = vpack.c.bf16 %v2599_v44, %v2599_v44  ;;  %4744 = vmatpush1.bf16.msra.mxu0 %v6802_v38 }
 0x2f7   : > { %4754 = vmatprep.subr.bf16.mxu0 %v6809_v42 }
 0x2f8   : > { %5027 = vmatprep.mubr.bf16.mxu1 %v2611_v47 }
 0x2f9   : > { %4746 = vmatmul.mubr.bf16.vlgmr.msra.gmra.mrb[8].mxu0 %v7450_v52  ;;  %5028 = vmatmul.mubr.bf16.vlgmr.msra.gmra.mrb[36].mxu1 %v7458_v46  ;;  %v6822_v52 = vld [vmem:[#allocation10 + $0x7f8] ss:$12 sps:$4 sm:$0xff]  }
 0x2fa   : > { %4755 = vmatpush1.bf16.msra.mxu0 %v6807_v45  ;;  %4786 = vmatprep.mubr.bf16.mxu0 %v2611_v47 }
 0x2fb   : > { %4756 = vmatprep.subr.bf16.mxu0 %v6812_v6 }
 0x2fe   : > { %4757 = vmatpush1.bf16.msra.mxu0 %v6810_v39 }
 0x2ff   : > { %4758 = vmatprep.subr.bf16.mxu0 %v6815_v48 }
 0x302   : > { %4759 = vmatpush1.bf16.msra.mxu0 %v6813_v10 }
 0x303   : > { %4760 = vmatprep.subr.bf16.mxu0 %v6818_v51 }
 0x306   : > { %4761 = vmatpush1.bf16.msra.mxu0 %v6816_v53 }
 0x307   : > { %4762 = vmatprep.subr.bf16.mxu0 %v6821_v54  ;;  %v3001_v54 = vrot.slane %v2996_v14, %v7381_v50 }
 0x30a   : > { %4763 = vmatpush1.bf16.msra.mxu0 %v6819_v55  ;;  %v3005_v55 = vrot.slane %v2996_v14, %v7384_v21 }
 0x30b   : > { %4764 = vmatprep.subr.bf16.mxu0 %v6824_v56 }
 0x30e   : > { %4765 = vmatpush1.bf16.msra.mxu0 %v6822_v52 }
 0x30f   : > { %4766 = vmatprep.subr.bf16.mxu0 %v6827_v26 }
 0x311   : > { %v5769_v60 = vpop.f32.mrb[16].mxu1 }
 0x312   : > { %4767 = vmatpush1.bf16.msra.mxu0 %v6825_v57  ;;  %v5770_v61 = vpop.f32.mrb[17].mxu1 }
 0x313   : > { %v5771_v63 = vadd.f32 %v5770_v61, %v5769_v60  ;;  %v5772_v0 = vpop.f32.mrb[18].mxu1  ;;  %4768 = vmatprep.subr.bf16.mxu0 %v6830_v58 }
 0x314   : > { %v5773_v1 = vpop.f32.mrb[19].mxu1 }
 0x315   : > { %v4830_v22 = vadd.f32 %v5771_v63, %v3009_v16 }
 0x316   : > { %4769 = vmatpush1.bf16.msra.mxu0 %v6828_v62 }
 0x317   : > { %4770 = vmatprep.subr.bf16.mxu0 %v6833_v59 }
 0x31a   : > { %4771 = vmatpush1.bf16.msra.mxu0 %v6831_v2 }
 0x31b   : > { %4772 = vmatprep.subr.bf16.mxu0 %v6836_v3 }
 0x31e   : > { %4773 = vmatpush1.bf16.msra.mxu0 %v6834_v49 }
 0x31f   : > { %4774 = vmatprep.subr.bf16.mxu0 %v6839_v4 }
 0x322   : > { %4775 = vmatpush1.bf16.msra.mxu0 %v6837_v5 }
 0x323   : > { %4776 = vmatprep.subr.bf16.mxu0 %v6842_v11 }
 0x326   : > { %4777 = vmatpush1.bf16.msra.mxu0 %v6840_v8 }
 0x327   : > { %4778 = vmatprep.subr.bf16.mxu0 %v6845_v9 }
 0x32a   : > { %4779 = vmatpush1.bf16.msra.mxu0 %v6843_v25 }
 0x32b   : > { %4780 = vmatprep.subr.bf16.mxu0 %v6848_v7 }
 0x32e   : > { %4781 = vmatpush1.bf16.msra.mxu0 %v6846_v12 }
 0x32f   : > { %4782 = vmatprep.subr.bf16.mxu0 %v6851_v13 }
 0x331   : > { %v5791_v18 = vpop.f32.mrb[20].mxu1 }
 0x332   : > { %4783 = vmatpush1.bf16.msra.mxu0 %v6849_v15  ;;  %v5792_v19 = vpop.f32.mrb[21].mxu1 }
 0x333   : > { %v5793_v23 = vadd.f32 %v5792_v19, %v5791_v18  ;;  %v5794_v24 = vpop.f32.mrb[22].mxu1  ;;  %4784 = vmatprep.subr.bf16.mxu0 %v6854_v17 }
 0x334   : > { %v5795_v27 = vpop.f32.mrb[23].mxu1 }
 0x335   : > { %v4870_v28 = vadd.f32 %v5793_v23, %v4830_v22 }
 0x336   : > { %4785 = vmatpush1.bf16.msra.mxu0 %v6852_v20 }
 0x339   : > { %4787 = vmatmul.mubr.bf16.vlgmr.msra.gmra.mrb[8].mxu0 %v7458_v46 }
 0x351   : > { %v5813_v29 = vpop.f32.mrb[24].mxu1 }
 0x352   : > { %v5814_v30 = vpop.f32.mrb[25].mxu1 }
 0x353   : > { %v5815_v31 = vadd.f32 %v5814_v30, %v5813_v29  ;;  %v5816_v33 = vpop.f32.mrb[26].mxu1 }
 0x354   : > { %v5817_v32 = vpop.f32.mrb[27].mxu1 }
 0x355   : > { %v4910_v34 = vadd.f32 %v5815_v31, %v4870_v28 }
 0x371   : > { %v5835_v35 = vpop.f32.mrb[28].mxu1 }
 0x372   : > { %v5836_v36 = vpop.f32.mrb[29].mxu1 }
 0x373   : > { %v5837_v37 = vadd.f32 %v5836_v36, %v5835_v35  ;;  %v5838_v38 = vpop.f32.mrb[30].mxu1 }
 0x374   : > { %v5839_v40 = vpop.f32.mrb[31].mxu1 }
 0x375   : > { %v4950_v41 = vadd.f32 %v5837_v37, %v4910_v34 }
 0x391   : > { %v5857_v42 = vpop.f32.mrb[32].mxu1 }
 0x392   : > { %v5858_v43 = vpop.f32.mrb[33].mxu1 }
 0x393   : > { %v5859_v44 = vadd.f32 %v5858_v43, %v5857_v42  ;;  %v5860_v47 = vpop.f32.mrb[34].mxu1 }
 0x394   : > { %v5861_v45 = vpop.f32.mrb[35].mxu1 }
 0x395   : > { %v4990_v46 = vadd.f32 %v5859_v44, %v4950_v41 }
 0x3cc   : > { %v5879_v6 = vpop.f32.mrb[36].mxu1 }
 0x3cd   : > { %v5880_v39 = vpop.f32.mrb[37].mxu1 }
 0x3ce   : > { %v5881_v48 = vadd.f32 %v5880_v39, %v5879_v6  ;;  %v5882_v10 = vpop.f32.mrb[38].mxu1 }
 0x3cf   : > { %v5883_v51 = vpop.f32.mrb[39].mxu1 }
 0x3d0   : > { %v5030_v53 = vadd.f32 %v5881_v48, %v4990_v46 }
 0x3d2   : > { %5037 = vst [vmem:[%s296_s27 + $0x10] sm:$0xff] %v5030_v53 }
 0x40c   : > { %v4788_v56 = vpop.f32.mrb[8].mxu0 }
 0x40d   : > { %v5897_v52 = vadd.f32 %v4788_v56, %v3001_v54  ;;  %v4790_v26 = vpop.f32.mrb[9].mxu0 }
 0x40e   : > { %v5898_v57 = vadd.f32 %v4790_v26, %v3005_v55  ;;  %v4792_v58 = vpop.f32.mrb[10].mxu0 }
 0x40f   : > { %5035 = vst [vmem:[%s296_s27] sm:$0xff] %v5897_v52  ;;  %v4793_v50 = vpop.f32.mrb[11].mxu0 }
 0x410   : > { %5036 = vst [vmem:[%s296_s27 + $0x8] sm:$0xff] %v5898_v57 }
 0x411   : > { %7011 = shalt.err (!%p7008_p12)
}
 0x412   : > { %s7012_s20 = scalar_lea.hbm %s7472_s7, 384  ;;  %s7016_s14 = scalar_lea.hbm %s7522_s6, 768 }
 0x413   : > { %p7013_p13 = scmp.ne.s32.totalorder %s7472_s7, %s7012_s20  ;;  %p7017_p9 = scmp.lt.u32.totalorder %s7472_s7, %s7522_s6 }
 0x414   : > { %p7018_p4 = scmp.lt.u32.totalorder %s7016_s14, %s7012_s20  ;;  %p7020_p0 = scmp.lt.u32.totalorder %s7012_s20, %s7472_s7 }
 0x415   : > { %p7014_p1 = pnand %p7013_p13, %p7539_p6 }
 0x416   : > { %p7019_p8 = por %p7018_p4, %p7017_p9 }
 0x417   : > { %p7015_p7 = pneg %p7014_p1 }
 0x418   : > { %p7021_p2 = por %p7020_p0, %p7019_p8 }
 0x41a   : > { %p7022_p5 = pnand %p7021_p2, %p7015_p7 }
 0x41c   : > { %7025 = shalt.err (!%p7022_p5)
}
 0x41d   : > { %5965 = dma.vmem_to_hbm [thread:$0]  (%p7539_p6), %s7474_s18, 384, %s7472_s7, %s5039_s26  }
 0x41e PF: > { %s5065_s27 = sand.u32 1, %s7060_s0   ;;  %p7540_p10 = scmp.ne.s32.totalorder %s7532_s15, 0 }
 0x41f   : > { %p7541_p11 = scmp.ge.s32.totalorder %s7072_s23, 2  ;;  %s5066_s12 = scalar_lea.sflag [#allocation6], %s5065_s27 }
 0x421   : > { %p5985_p3 = pnand %p7541_p11, %p7540_p10 }
 0x423   : > { %7055 = dma.done.wait (!%p5985_p3), %s5066_s12, 384  }
 0x424   : > { %7057 = vsyncadd (!%p5985_p3), %s5066_s12, 4294966912  ;;  %p22_p12 = scmp.ge.s32.totalorder %s7256_s30, 4   ;;  %s7542_s0 = smov %s7064_s21 }
 0x425   : > { %s7543_s21 = smov %s7068_s22  ;;  %s7544_s22 = smov %s7267_s29 }
 0x426   : > { %s7545_s23 = smov %s7256_s30  ;;  %24 = sbr.rel (!%p22_p12) target bundleno = 7 (0x7), region = 101 }
 0x42d   :  { %5071 = vsyncpa [#allocation5], 1 }
 0x42e   :  { %5073 = vsyncpa [#allocation5 + $0x1], 1 }
 0x42f   :  { %5074 = vsyncpa [#allocation8], 1 }
 0x430   :  { %5075 = vsyncpa [#allocation11], 1 }
 0x431   :  { %5076 = vsyncpa [#allocation6], 1 }
 0x432   :  { %5078 = vsyncpa [#allocation6 + $0x1], 1 }

</bundles_post_ra>
